<compile_context>
chip_gen: v7x
topology: tpu7x:2x2x1
jax: 0.10.0
libtpu: 0.0.40
codegen_flags: <defaults>
</compile_context>

<pallas_src>
import jax
import jax.numpy as jnp
import numpy as np
from jax.experimental import pallas as pl
from jax.experimental.pallas import tpu as pltpu


def sae_forward_kernel(x_ref, w_in_ref, b_in_ref, tg_w_ref, tg_b_ref,
                       sg_w_ref, sg_b_ref, w_out_ref, b_out_ref, out_ref):
    x = x_ref[...]                                        # [bt, d_in] bf16
    d_sae = sg_w_ref.shape[0]
    d_in = out_ref.shape[1]
    H = (w_in_ref.shape[1] - d_sae) // 3                  # lstm_hidden_size

    # --- fused encoder-side matmul: x @ [W_enc | enc_W_ih(i,g,o)] + [b_enc' | enc_b] ---
    enc = jnp.dot(x, w_in_ref[...],
                  preferred_element_type=jnp.float32) + b_in_ref[...]   # [bt, d_sae+3H] f32

    static_acts = jnp.maximum(enc[:, :d_sae], 0.0)        # relu(x @ W_enc + b_enc - b_dec@W_enc)
    i_e = jax.nn.sigmoid(enc[:, d_sae:d_sae + H])
    g_e = jnp.tanh(enc[:, d_sae + H:d_sae + 2 * H])
    o_e = jax.nn.sigmoid(enc[:, d_sae + 2 * H:])
    h_e = o_e * jnp.tanh(i_e * g_e)                       # [bt, H]  (c0 == 0 -> no f-gate)

    # --- gates (distinct LHS, cannot fuse with each other) ---
    t_gate = jax.nn.sigmoid(
        jnp.dot(h_e.astype(jnp.bfloat16), tg_w_ref[...],
                preferred_element_type=jnp.float32) + tg_b_ref[...])     # [bt, d_sae]
    s_gate = jax.nn.sigmoid(
        jnp.dot(static_acts.astype(jnp.bfloat16), sg_w_ref[...],
                preferred_element_type=jnp.float32) + sg_b_ref[...])     # [bt, d_sae]
    encoded = static_acts * (s_gate + t_gate)             # algebraically fused gating

    # --- fused decoder-side matmul: encoded @ [W_dec | dec_W_ih(i,g,o)] + [b_dec | dec_b] ---
    dec = jnp.dot(encoded.astype(jnp.bfloat16), w_out_ref[...],
                  preferred_element_type=jnp.float32) + b_out_ref[...]   # [bt, d_in+3H] f32
    static_dec = dec[:, :d_in]                            # already includes b_dec
    i_d = jax.nn.sigmoid(dec[:, d_in:d_in + H])
    g_d = jnp.tanh(dec[:, d_in + H:d_in + 2 * H])
    o_d = jax.nn.sigmoid(dec[:, d_in + 2 * H:])
    h_d = o_d * jnp.tanh(i_d * g_d)                       # [bt, H]

    # PyTorch: static_decoded + temporal_decoded.squeeze(1); requires d_in == H.
    out_ref[...] = static_dec + h_d


def prepare_weights(p):
    """Host-side: fold b_dec, drop forget-gate columns, fuse matmuls, cast to bf16."""
    f32, bf16 = jnp.float32, jnp.bfloat16
    W_enc = p["W_enc"].astype(f32)
    H = p["enc_wih"].shape[1] // 4

    def drop_f(w_ih, b):  # drop f-gate block (cols H:2H) -> gate order (i, g, o)
        w = jnp.concatenate([w_ih[:, :H], w_ih[:, 2 * H:]], axis=1)
        bb = jnp.concatenate([b[:H], b[2 * H:]], axis=0)
        return w, bb

    enc_wih, enc_b = drop_f(p["enc_wih"].astype(f32), p["enc_b"].astype(f32))
    dec_wih, dec_b = drop_f(p["dec_wih"].astype(f32), p["dec_b"].astype(f32))

    b_enc_folded = p["b_enc"].astype(f32) - p["b_dec"].astype(f32) @ W_enc

    W_in = jnp.concatenate([W_enc, enc_wih], axis=1).astype(bf16)              # [d_in, d_sae+3H]
    b_in = jnp.concatenate([b_enc_folded, enc_b], axis=0).reshape(1, -1)        # f32
    W_out = jnp.concatenate([p["W_dec"].astype(f32), dec_wih], axis=1).astype(bf16)  # [d_sae, d_in+3H]
    b_out = jnp.concatenate([p["b_dec"].astype(f32), dec_b], axis=0).reshape(1, -1)  # f32

    return [W_in, b_in,
            p["tg_w"].astype(bf16), p["tg_b"].astype(f32).reshape(1, -1),
            p["sg_w"].astype(bf16), p["sg_b"].astype(f32).reshape(1, -1),
            W_out, b_out]


def custom_sae_forward(acts, params, *, batch_tile=128):
    B, d_in = acts.shape
    d_sae = params["W_enc"].shape[1]
    H = params["enc_wih"].shape[1] // 4
    assert d_in == H, "decode() adds [B,d_in] + [B,H]; requires d_in == lstm_hidden_size"
    assert d_in % 128 == 0 and d_sae % 128 == 0 and H % 128 == 0, "need lane-aligned dims"
    batch_tile = min(batch_tile, B)
    assert B % batch_tile == 0 and batch_tile % 8 == 0

    weights = prepare_weights(params)
    x_bf16 = acts.astype(jnp.bfloat16)

    in_specs = [pl.BlockSpec((batch_tile, d_in), lambda i: (i, 0))]
    # Grid-invariant weight blocks: whole-array blocks with a constant index map
    # (never re-fetched across grid steps; footprint is tiny at these shapes).
    in_specs += [pl.BlockSpec(w.shape, lambda i, nd=w.ndim: (0,) * nd) for w in weights]
    out_spec = pl.BlockSpec((batch_tile, d_in), lambda i: (i, 0))

    flops = 2 * B * (d_in * (d_sae + 3 * H) + H * d_sae
                     + d_sae * d_sae + d_sae * (d_in + 3 * H))
    transcendentals = B * (2 * d_sae + 8 * H)
    bytes_accessed = (x_bf16.size * x_bf16.dtype.itemsize + B * d_in * 4
                      + sum(int(w.size) * w.dtype.itemsize for w in weights))

    return pl.pallas_call(
        sae_forward_kernel,
        out_shape=jax.ShapeDtypeStruct((B, d_in), jnp.float32),
        grid=(B // batch_tile,),
        in_specs=in_specs,
        out_specs=out_spec,
        compiler_params=pltpu.CompilerParams(
            dimension_semantics=("parallel",),          # shards batch across TCs on v7x
            vmem_limit_bytes=32 * 1024 * 1024),         # explicit budget, safe on v5e/v6e/v7x
        cost_estimate=pl.CostEstimate(flops=flops,
                                      transcendentals=transcendentals,
                                      bytes_accessed=bytes_accessed),
    )(x_bf16, *weights)


def init_params(key, d_in, d_sae, H):
    """Deterministic synthetic init (shapes match CustomSAE.__init__, pre-transposed)."""
    ks = jax.random.split(key, 16)
    s = 0.05
    n = lambda k, shape: jax.random.normal(k, shape, jnp.float32) * s
    return dict(
        W_enc=n(ks[0], (d_in, d_sae)),
        b_enc=n(ks[1], (d_sae,)),
        W_dec=n(ks[2], (d_sae, d_in)),
        b_dec=n(ks[3], (d_in,)),
        # lstm_encoder: weight_ih_l0^T, (bias_ih_l0 + bias_hh_l0), gate order i,f,g,o
        enc_wih=n(ks[4], (d_in, 4 * H)),
        enc_b=n(ks[5], (4 * H,)) + n(ks[6], (4 * H,)),
        # lstm_decoder: weight_ih_l0^T, (bias_ih_l0 + bias_hh_l0)
        dec_wih=n(ks[7], (d_sae, 4 * H)),
        dec_b=n(ks[8], (4 * H,)) + n(ks[9], (4 * H,)),
        # temporal_gate: Linear(H -> d_sae), stored transposed
        tg_w=n(ks[10], (H, d_sae)),
        tg_b=n(ks[11], (d_sae,)),
        # static_gate: Linear(d_sae -> d_sae), stored transposed
        sg_w=n(ks[12], (d_sae, d_sae)),
        sg_b=n(ks[13], (d_sae,)),
    )


def reference_forward(x, p):
    """Pure-JAX float32 reference of CustomSAE.forward (decoded only)."""
    static_acts = jax.nn.relu((x - p["b_dec"]) @ p["W_enc"] + p["b_enc"])
    g = x @ p["enc_wih"] + p["enc_b"]
    H = g.shape[1] // 4
    c_e = jax.nn.sigmoid(g[:, :H]) * jnp.tanh(g[:, 2 * H:3 * H])
    h_e = jax.nn.sigmoid(g[:, 3 * H:]) * jnp.tanh(c_e)
    tg = jax.nn.sigmoid(h_e @ p["tg_w"] + p["tg_b"])
    sg = jax.nn.sigmoid(static_acts @ p["sg_w"] + p["sg_b"])
    enc = static_acts * sg + static_acts * tg
    sd = enc @ p["W_dec"] + p["b_dec"]
    gd = enc @ p["dec_wih"] + p["dec_b"]
    c_d = jax.nn.sigmoid(gd[:, :H]) * jnp.tanh(gd[:, 2 * H:3 * H])
    h_d = jax.nn.sigmoid(gd[:, 3 * H:]) * jnp.tanh(c_d)
    return sd + h_d


if __name__ == "__main__":
    # Lane-aligned toy shapes; B=256 with batch_tile=128 -> 2 grid steps (v7x megacore).
    B, d_in, d_sae = 256, 128, 256
    H = d_in  # lstm_hidden_size must equal d_in for the decode() addition to be valid

    key = jax.random.PRNGKey(0)
    k_params, k_acts = jax.random.split(key)
    params = init_params(k_params, d_in, d_sae, H)
    acts = jax.random.normal(k_acts, (B, d_in), jnp.float32)

    out = custom_sae_forward(acts, params, batch_tile=128)
    out = jax.block_until_ready(out)

    ref = jax.block_until_ready(reference_forward(acts, params))
    # bf16 matmul inputs with f32 accumulation vs full-f32 reference -> loose tolerance.
    np.testing.assert_allclose(np.asarray(out), np.asarray(ref), rtol=3e-2, atol=3e-2)

    assert out.shape == (B, d_in) and out.dtype == jnp.float32
    print("KERNEL_OK")
</pallas_src>

<mosaic_0001>
module attributes {stable_mosaic.version = 11 : i64} {
  func.func @sae_forward_kernel(%arg0: i32, %arg1: memref<128x128xbf16, #tpu.memory_space<vmem>>, %arg2: memref<128x640xbf16, #tpu.memory_space<vmem>>, %arg3: memref<1x640xf32, #tpu.memory_space<vmem>>, %arg4: memref<128x256xbf16, #tpu.memory_space<vmem>>, %arg5: memref<1x256xf32, #tpu.memory_space<vmem>>, %arg6: memref<256x256xbf16, #tpu.memory_space<vmem>>, %arg7: memref<1x256xf32, #tpu.memory_space<vmem>>, %arg8: memref<256x512xbf16, #tpu.memory_space<vmem>>, %arg9: memref<1x512xf32, #tpu.memory_space<vmem>>, %arg10: memref<128x128xf32, #tpu.memory_space<vmem>>) attributes {dimension_semantics = [#tpu.dimension_semantics<parallel>], iteration_bounds = array<i64: 2>, scalar_prefetch = 0 : i64, scratch_operands = 0 : i64, tpu.core_type = #tpu.core_type<tc>, window_params = [{transform_indices = @transform_0, window_bounds = array<i64: 128, 128>}, {pipeline_mode = #tpu.pipeline_mode<synchronous>, transform_indices = @transform_1, window_bounds = array<i64: 128, 640>}, {pipeline_mode = #tpu.pipeline_mode<synchronous>, transform_indices = @transform_2, window_bounds = array<i64: 1, 640>}, {pipeline_mode = #tpu.pipeline_mode<synchronous>, transform_indices = @transform_3, window_bounds = array<i64: 128, 256>}, {pipeline_mode = #tpu.pipeline_mode<synchronous>, transform_indices = @transform_4, window_bounds = array<i64: 1, 256>}, {pipeline_mode = #tpu.pipeline_mode<synchronous>, transform_indices = @transform_5, window_bounds = array<i64: 256, 256>}, {pipeline_mode = #tpu.pipeline_mode<synchronous>, transform_indices = @transform_6, window_bounds = array<i64: 1, 256>}, {pipeline_mode = #tpu.pipeline_mode<synchronous>, transform_indices = @transform_7, window_bounds = array<i64: 256, 512>}, {pipeline_mode = #tpu.pipeline_mode<synchronous>, transform_indices = @transform_8, window_bounds = array<i64: 1, 512>}, {transform_indices = @transform_9, window_bounds = array<i64: 128, 128>}]} {
    %c0 = arith.constant 0 : index
    %c0_0 = arith.constant 0 : index
    %0 = vector.load %arg1[%c0, %c0_0] : memref<128x128xbf16, #tpu.memory_space<vmem>>, vector<128x128xbf16>
    %c0_1 = arith.constant 0 : index
    %c0_2 = arith.constant 0 : index
    %1 = vector.load %arg2[%c0_1, %c0_2] : memref<128x640xbf16, #tpu.memory_space<vmem>>, vector<128x640xbf16>
    %cst = arith.constant dense<0.000000e+00> : vector<128x640xf32>
    %2 = tpu.matmul %0, %1, %cst {dimension_numbers = #tpu.dot_dimension_numbers<[1], [0], [0], [1], [0, 0, 1, 1], [], []>} : vector<128x128xbf16>, vector<128x640xbf16>, vector<128x640xf32> -> vector<128x640xf32>
    %c0_3 = arith.constant 0 : index
    %c0_4 = arith.constant 0 : index
    %3 = vector.load %arg3[%c0_3, %c0_4] : memref<1x640xf32, #tpu.memory_space<vmem>>, vector<1x640xf32>
    %4 = vector.broadcast %3 : vector<1x640xf32> to vector<128x640xf32>
    %5 = arith.addf %2, %4 : vector<128x640xf32>
    %6 = vector.extract_strided_slice %5 {offsets = [0, 0], sizes = [128, 256], strides = [1, 1]} : vector<128x640xf32> to vector<128x256xf32>
    %cst_5 = arith.constant 0.000000e+00 : f32
    %7 = vector.broadcast %cst_5 : f32 to vector<128x256xf32>
    %8 = arith.maximumf %6, %7 : vector<128x256xf32>
    %9 = vector.extract_strided_slice %5 {offsets = [0, 256], sizes = [128, 128], strides = [1, 1]} : vector<128x640xf32> to vector<128x128xf32>
    %10 = arith.negf %9 : vector<128x128xf32>
    %11 = math.exp %10 : vector<128x128xf32>
    %cst_6 = arith.constant 1.000000e+00 : f32
    %12 = vector.broadcast %cst_6 : f32 to vector<128x128xf32>
    %13 = arith.addf %12, %11 : vector<128x128xf32>
    %14 = arith.divf %12, %13 : vector<128x128xf32>
    %15 = vector.extract_strided_slice %5 {offsets = [0, 384], sizes = [128, 128], strides = [1, 1]} : vector<128x640xf32> to vector<128x128xf32>
    %16 = math.tanh %15 : vector<128x128xf32>
    %17 = vector.extract_strided_slice %5 {offsets = [0, 512], sizes = [128, 128], strides = [1, 1]} : vector<128x640xf32> to vector<128x128xf32>
    %18 = arith.negf %17 : vector<128x128xf32>
    %19 = math.exp %18 : vector<128x128xf32>
    %cst_7 = arith.constant 1.000000e+00 : f32
    %20 = vector.broadcast %cst_7 : f32 to vector<128x128xf32>
    %21 = arith.addf %20, %19 : vector<128x128xf32>
    %22 = arith.divf %20, %21 : vector<128x128xf32>
    %23 = arith.mulf %14, %16 : vector<128x128xf32>
    %24 = math.tanh %23 : vector<128x128xf32>
    %25 = arith.mulf %22, %24 : vector<128x128xf32>
    %26 = arith.truncf %25 : vector<128x128xf32> to vector<128x128xbf16>
    %c0_8 = arith.constant 0 : index
    %c0_9 = arith.constant 0 : index
    %27 = vector.load %arg4[%c0_8, %c0_9] : memref<128x256xbf16, #tpu.memory_space<vmem>>, vector<128x256xbf16>
    %cst_10 = arith.constant dense<0.000000e+00> : vector<128x256xf32>
    %28 = tpu.matmul %26, %27, %cst_10 {dimension_numbers = #tpu.dot_dimension_numbers<[1], [0], [0], [1], [0, 0, 1, 1], [], []>} : vector<128x128xbf16>, vector<128x256xbf16>, vector<128x256xf32> -> vector<128x256xf32>
    %c0_11 = arith.constant 0 : index
    %c0_12 = arith.constant 0 : index
    %29 = vector.load %arg5[%c0_11, %c0_12] : memref<1x256xf32, #tpu.memory_space<vmem>>, vector<1x256xf32>
    %30 = vector.broadcast %29 : vector<1x256xf32> to vector<128x256xf32>
    %31 = arith.addf %28, %30 : vector<128x256xf32>
    %32 = arith.negf %31 : vector<128x256xf32>
    %33 = math.exp %32 : vector<128x256xf32>
    %cst_13 = arith.constant 1.000000e+00 : f32
    %34 = vector.broadcast %cst_13 : f32 to vector<128x256xf32>
    %35 = arith.addf %34, %33 : vector<128x256xf32>
    %36 = arith.divf %34, %35 : vector<128x256xf32>
    %37 = arith.truncf %8 : vector<128x256xf32> to vector<128x256xbf16>
    %c0_14 = arith.constant 0 : index
    %c0_15 = arith.constant 0 : index
    %38 = vector.load %arg6[%c0_14, %c0_15] : memref<256x256xbf16, #tpu.memory_space<vmem>>, vector<256x256xbf16>
    %cst_16 = arith.constant dense<0.000000e+00> : vector<128x256xf32>
    %39 = tpu.matmul %37, %38, %cst_16 {dimension_numbers = #tpu.dot_dimension_numbers<[1], [0], [0], [1], [0, 0, 1, 1], [], []>} : vector<128x256xbf16>, vector<256x256xbf16>, vector<128x256xf32> -> vector<128x256xf32>
    %c0_17 = arith.constant 0 : index
    %c0_18 = arith.constant 0 : index
    %40 = vector.load %arg7[%c0_17, %c0_18] : memref<1x256xf32, #tpu.memory_space<vmem>>, vector<1x256xf32>
    %41 = vector.broadcast %40 : vector<1x256xf32> to vector<128x256xf32>
    %42 = arith.addf %39, %41 : vector<128x256xf32>
    %43 = arith.negf %42 : vector<128x256xf32>
    %44 = math.exp %43 : vector<128x256xf32>
    %cst_19 = arith.constant 1.000000e+00 : f32
    %45 = vector.broadcast %cst_19 : f32 to vector<128x256xf32>
    %46 = arith.addf %45, %44 : vector<128x256xf32>
    %47 = arith.divf %45, %46 : vector<128x256xf32>
    %48 = arith.addf %47, %36 : vector<128x256xf32>
    %49 = arith.mulf %8, %48 : vector<128x256xf32>
    %50 = arith.truncf %49 : vector<128x256xf32> to vector<128x256xbf16>
    %c0_20 = arith.constant 0 : index
    %c0_21 = arith.constant 0 : index
    %51 = vector.load %arg8[%c0_20, %c0_21] : memref<256x512xbf16, #tpu.memory_space<vmem>>, vector<256x512xbf16>
    %cst_22 = arith.constant dense<0.000000e+00> : vector<128x512xf32>
    %52 = tpu.matmul %50, %51, %cst_22 {dimension_numbers = #tpu.dot_dimension_numbers<[1], [0], [0], [1], [0, 0, 1, 1], [], []>} : vector<128x256xbf16>, vector<256x512xbf16>, vector<128x512xf32> -> vector<128x512xf32>
    %c0_23 = arith.constant 0 : index
    %c0_24 = arith.constant 0 : index
    %53 = vector.load %arg9[%c0_23, %c0_24] : memref<1x512xf32, #tpu.memory_space<vmem>>, vector<1x512xf32>
    %54 = vector.broadcast %53 : vector<1x512xf32> to vector<128x512xf32>
    %55 = arith.addf %52, %54 : vector<128x512xf32>
    %56 = vector.extract_strided_slice %55 {offsets = [0, 0], sizes = [128, 128], strides = [1, 1]} : vector<128x512xf32> to vector<128x128xf32>
    %57 = vector.extract_strided_slice %55 {offsets = [0, 128], sizes = [128, 128], strides = [1, 1]} : vector<128x512xf32> to vector<128x128xf32>
    %58 = arith.negf %57 : vector<128x128xf32>
    %59 = math.exp %58 : vector<128x128xf32>
    %cst_25 = arith.constant 1.000000e+00 : f32
    %60 = vector.broadcast %cst_25 : f32 to vector<128x128xf32>
    %61 = arith.addf %60, %59 : vector<128x128xf32>
    %62 = arith.divf %60, %61 : vector<128x128xf32>
    %63 = vector.extract_strided_slice %55 {offsets = [0, 256], sizes = [128, 128], strides = [1, 1]} : vector<128x512xf32> to vector<128x128xf32>
    %64 = math.tanh %63 : vector<128x128xf32>
    %65 = vector.extract_strided_slice %55 {offsets = [0, 384], sizes = [128, 128], strides = [1, 1]} : vector<128x512xf32> to vector<128x128xf32>
    %66 = arith.negf %65 : vector<128x128xf32>
    %67 = math.exp %66 : vector<128x128xf32>
    %cst_26 = arith.constant 1.000000e+00 : f32
    %68 = vector.broadcast %cst_26 : f32 to vector<128x128xf32>
    %69 = arith.addf %68, %67 : vector<128x128xf32>
    %70 = arith.divf %68, %69 : vector<128x128xf32>
    %71 = arith.mulf %62, %64 : vector<128x128xf32>
    %72 = math.tanh %71 : vector<128x128xf32>
    %73 = arith.mulf %70, %72 : vector<128x128xf32>
    %74 = arith.addf %56, %73 : vector<128x128xf32>
    %c0_27 = arith.constant 0 : index
    %c0_28 = arith.constant 0 : index
    %75 = vector.load %arg10[%c0_27, %c0_28] : memref<128x128xf32, #tpu.memory_space<vmem>>, vector<128x128xf32>
    tpu.vector_store %arg10[%c0_27, %c0_28], %74 {strides = array<i32>} : memref<128x128xf32, #tpu.memory_space<vmem>>, vector<128x128xf32>,
    return
  }
  func.func @transform_0(%arg0: i32) -> (i32, i32) {
    %c0_i32 = arith.constant 0 : i32
    %c0_i32_0 = arith.constant 0 : i32
    return %arg0, %c0_i32 : i32, i32
  }
  func.func @transform_1(%arg0: i32) -> (i32, i32) {
    %c0_i32 = arith.constant 0 : i32
    %c0_i32_0 = arith.constant 0 : i32
    %c0_i32_1 = arith.constant 0 : i32
    return %c0_i32, %c0_i32_0 : i32, i32
  }
  func.func @transform_2(%arg0: i32) -> (i32, i32) {
    %c0_i32 = arith.constant 0 : i32
    %c0_i32_0 = arith.constant 0 : i32
    %c0_i32_1 = arith.constant 0 : i32
    return %c0_i32, %c0_i32_0 : i32, i32
  }
  func.func @transform_3(%arg0: i32) -> (i32, i32) {
    %c0_i32 = arith.constant 0 : i32
    %c0_i32_0 = arith.constant 0 : i32
    %c0_i32_1 = arith.constant 0 : i32
    return %c0_i32, %c0_i32_0 : i32, i32
  }
  func.func @transform_4(%arg0: i32) -> (i32, i32) {
    %c0_i32 = arith.constant 0 : i32
    %c0_i32_0 = arith.constant 0 : i32
    %c0_i32_1 = arith.constant 0 : i32
    return %c0_i32, %c0_i32_0 : i32, i32
  }
  func.func @transform_5(%arg0: i32) -> (i32, i32) {
    %c0_i32 = arith.constant 0 : i32
    %c0_i32_0 = arith.constant 0 : i32
    %c0_i32_1 = arith.constant 0 : i32
    return %c0_i32, %c0_i32_0 : i32, i32
  }
  func.func @transform_6(%arg0: i32) -> (i32, i32) {
    %c0_i32 = arith.constant 0 : i32
    %c0_i32_0 = arith.constant 0 : i32
    %c0_i32_1 = arith.constant 0 : i32
    return %c0_i32, %c0_i32_0 : i32, i32
  }
  func.func @transform_7(%arg0: i32) -> (i32, i32) {
    %c0_i32 = arith.constant 0 : i32
    %c0_i32_0 = arith.constant 0 : i32
    %c0_i32_1 = arith.constant 0 : i32
    return %c0_i32, %c0_i32_0 : i32, i32
  }
  func.func @transform_8(%arg0: i32) -> (i32, i32) {
    %c0_i32 = arith.constant 0 : i32
    %c0_i32_0 = arith.constant 0 : i32
    %c0_i32_1 = arith.constant 0 : i32
    return %c0_i32, %c0_i32_0 : i32, i32
  }
  func.func @transform_9(%arg0: i32) -> (i32, i32) {
    %c0_i32 = arith.constant 0 : i32
    %c0_i32_0 = arith.constant 0 : i32
    return %arg0, %c0_i32 : i32, i32
  }
}

</mosaic_0001>

<bundles_post_ra>
// kernel: tpu_custom_call.1
= control target key start
LH: loop header
LB: loop body
LE: loop exit
PB: predicated region body
PF: predicated region fallthrough
CT: control target
= control target key end

     0   :  { %s6285_s0 = inlined_call_operand.hbm [shape: bf16[256,128], index: 0, kind: input, shape index: {}]   ;;  %s6286_s1 = inlined_call_operand.hbm [shape: bf16[128,640], index: 1, kind: input, shape index: {}]   ;;  %s6287_s2 = inlined_call_operand.vmem [shape: f32[1,640], index: 2, kind: input, shape index: {}]   ;;  %s6288_s3 = inlined_call_operand.hbm [shape: bf16[128,256], index: 3, kind: input, shape index: {}]   ;;  %s6289_s4 = inlined_call_operand.vmem [shape: f32[1,256], index: 4, kind: input, shape index: {}]   ;;  %s6290_s5 = inlined_call_operand.hbm [shape: bf16[256,256], index: 5, kind: input, shape index: {}]   ;;  %s6291_s6 = inlined_call_operand.vmem [shape: f32[1,256], index: 6, kind: input, shape index: {}]   ;;  %s6292_s7 = inlined_call_operand.hbm [shape: bf16[256,512], index: 7, kind: input, shape index: {}]   ;;  %s6293_s8 = inlined_call_operand.vmem [shape: f32[1,512], index: 8, kind: input, shape index: {}]   ;;  %s6294_s9 = inlined_call_operand.hbm [shape: f32[256,128], index: 9, kind: output, shape index: {}]  }
   0x1   :  { %6357 = sst [smem:[#allocation37_spill]] %s6293_s8 }
   0x2   :  { %6358 = sst [smem:[#allocation38_spill]] %s6294_s9 }
   0x3   :  { %14 = vsyncpa [#allocation3], 0 }
   0x4   :  { %16 = vsyncpa [#allocation3 + $0x1], 0 }
   0x5   :  { %17 = vsyncpa [#allocation6], 0 }
   0x6   :  { %18 = vsyncpa [#allocation9], 0 }
   0x7   :  { %19 = vsyncpa [#allocation4], 0 }
   0x8   :  { %21 = vsyncpa [#allocation4 + $0x1], 0  ;;  %s5072_s30 = smov 0   ;;  %s5074_s10 = smov 0  }
   0x9   :  { %s5076_s11 = smov 0   ;;  %s5078_s12 = smov 0  }
   0xa LB: > { %6359 = sst [smem:[#allocation16_spill]] %s4991_s30  ;;  %s5093_s13 = sadd.s32 4294967295, %s5003_s12   ;;  %s5003_s12 = sphi %s5078_s12, %s6457_s12   ;;  %s4999_s11 = sphi %s5076_s11, %s6456_s11   ;;  %s4995_s10 = sphi %s5074_s10, %s6455_s10   ;;  %s4991_s30 = sphi %s5072_s30, %s6454_s30  }
   0xb   : > { %s3441_s14 = sadd.s32 4294967294, %s5003_s12   ;;  %p47_p0 = scmp.ne.s32.totalorder %s4995_s10, %s4991_s30 }
   0xc   : > { %p6295_p1 = scmp.eq.s32.totalorder %s5093_s13, 0  ;;  %p245_p3 = scmp.eq.s32.totalorder %s3441_s14, 1 }
   0xd   : > { %p3442_p5 = scmp.ge.s32.totalorder %s5003_s12, 1  ;;  %p252_p7 = scmp.lt.s32.totalorder %s5003_s12, 3 }
   0xe   : > { %p5102_p4 = por %p6295_p1, %p47_p0  ;;  %p5107_p6 = por %p245_p3, %p47_p0 }
   0xf   : > { %p5112_p8 = pnand %p3442_p5, %p252_p7  ;;  %s5005_s18 = smov [#allocation5]  }
  0x10   : > { %s6360_s15 = scalar_select %p5102_p4, 1, 0 }
  0x11   : > { %s6361_s16 = scalar_select %p5107_p6, 1, 0 }
  0x12   : > { %s6363_s17 = scalar_select %p5112_p8, 1, 0 }
  0x13   : > { %6362 = sst [smem:[#allocation17_spill]] %s6361_s16  ;;  %s264_s19 = sshll.u32 %s5005_s18, 4  ;;  %s265_s19 = int_to_ptr.vmem [resolvable:$true] %s264_s19 }
  0x14   : > { %p3837_p9 = pneg %p5112_p8  ;;  %s5006_s21 = smov [#allocation8]  }
  0x15   : > { %s296_s22 = sshll.u32 %s5006_s21, 4  ;;  %s4787_s25 = scalar_lea.hbm %s6286_s1, 5120  ;;  %s297_s22 = int_to_ptr.vmem [resolvable:$true] %s296_s22 }
  0x16   : > { %p5121_p11 = pnand %p3837_p9, %p6295_p1  ;;  %p4788_p12 = scmp.ne.s32.totalorder %s6286_s1, %s4787_s25 }
  0x17   : > { %p4794_p5 = scmp.lt.u32.totalorder %s4787_s25, %s6286_s1 }
  0x18   : > { %p5133_p13 = pneg %p5121_p11 }
  0x1a   : > { %p4790_p0 = pnand %p5133_p13, %p4788_p12 }
  0x1c   : > { %p4791_p3 = pneg %p4790_p0 }
  0x1e   : > { %p4796_p7 = pnand %p4794_p5, %p4791_p3 }
  0x20   : > { %4799 = shalt.err (!%p4796_p7)
}
  0x21   : > { %s4800_s18 = scalar_lea.vmem %s265_s19, 5120  ;;  %p4808_p2 = scmp.lt.s32.totalorder %s265_s19, %s265_s19 }
  0x22   : > { %p4801_p9 = scmp.ne.s32.totalorder %s265_s19, %s4800_s18  ;;  %p4809_p6 = scmp.lt.s32.totalorder %s4800_s18, %s4800_s18 }
  0x24   : > { %p4803_p10 = pnand %p4801_p9, %p5133_p13  ;;  %p4810_p4 = por %p4809_p6, %p4808_p2 }
  0x26   : > { %p4804_p1 = pneg %p4803_p10 }
  0x28   : > { %p4811_p8 = pnand %p4810_p4, %p4804_p1 }
  0x2a   : > { %4814 = shalt.err (!%p4811_p8)
}
  0x2b   : > { %s5007_s21 = smov 320   ;;  %s5008_s23 = smov 20  }
  0x2c   : > { %3840 = dma.hbm_to_vmem [thread:$0]  (!%p5121_p11), %s6286_s1, 5120, %s265_s19, [#allocation6], %s5007_s21, %s5007_s21, %s5008_s23  }
  0x2d   : > { %s5009_s26 = smov [#allocation7]   ;;  %s4815_s16 = scalar_lea.hbm %s6290_s5, 4096 }
  0x2e   : > { %s280_s27 = sshll.u32 %s5009_s26, 4  ;;  %p4816_p1 = scmp.ne.s32.totalorder %s6290_s5, %s4815_s16  ;;  %s281_s27 = int_to_ptr.vmem [resolvable:$true] %s280_s27 }
  0x2f   : > { %p4822_p6 = scmp.lt.u32.totalorder %s4815_s16, %s6290_s5 }
  0x30   : > { %p4818_p2 = pnand %p4816_p1, %p5133_p13 }
  0x32   : > { %p4819_p4 = pneg %p4818_p2 }
  0x34   : > { %p4824_p8 = pnand %p4822_p6, %p4819_p4 }
  0x36   : > { %4827 = shalt.err (!%p4824_p8)
}
  0x37   : > { %s4828_s19 = scalar_lea.vmem %s297_s22, 4096  ;;  %p4836_p3 = scmp.lt.s32.totalorder %s297_s22, %s297_s22 }
  0x38   : > { %p4829_p10 = scmp.ne.s32.totalorder %s297_s22, %s4828_s19  ;;  %p4837_p5 = scmp.lt.s32.totalorder %s4828_s19, %s4828_s19 }
  0x3a   : > { %p4831_p12 = pnand %p4829_p10, %p5133_p13  ;;  %p4838_p7 = por %p4837_p5, %p4836_p3 }
  0x3c   : > { %p4832_p0 = pneg %p4831_p12 }
  0x3e   : > { %p4839_p9 = pnand %p4838_p7, %p4832_p0 }
  0x40   : > { %4842 = shalt.err (!%p4839_p9)
}
  0x41   : > { %s5010_s30 = smov 128   ;;  %s5011_s21 = smov 8  }
  0x42   : > { %3846 = dma.hbm_to_vmem [thread:$0]  (!%p5121_p11), %s6290_s5, 4096, %s297_s22, [#allocation9], %s5010_s30, %s5010_s30, %s5011_s21  }
  0x43   : > { %s4843_s24 = scalar_lea.hbm %s6288_s3, 2048 }
  0x44   : > { %p4844_p1 = scmp.ne.s32.totalorder %s6288_s3, %s4843_s24  ;;  %p4850_p6 = scmp.lt.u32.totalorder %s4843_s24, %s6288_s3 }
  0x46   : > { %p4846_p2 = pnand %p4844_p1, %p5133_p13 }
  0x48   : > { %p4847_p4 = pneg %p4846_p2 }
  0x4a   : > { %p4852_p8 = pnand %p4850_p6, %p4847_p4 }
  0x4c   : > { %4855 = shalt.err (!%p4852_p8)
}
  0x4d   : > { %s4856_s18 = scalar_lea.vmem %s281_s27, 2048  ;;  %p4864_p3 = scmp.lt.s32.totalorder %s281_s27, %s281_s27 }
  0x4e   : > { %p4857_p10 = scmp.ne.s32.totalorder %s281_s27, %s4856_s18  ;;  %p4865_p5 = scmp.lt.s32.totalorder %s4856_s18, %s4856_s18 }
  0x50   : > { %p4859_p12 = pnand %p4857_p10, %p5133_p13  ;;  %p4866_p7 = por %p4865_p5, %p4864_p3 }
  0x52   : > { %p4860_p0 = pneg %p4859_p12 }
  0x54   : > { %p4867_p9 = pnand %p4866_p7, %p4860_p0 }
  0x56   : > { %4870 = shalt.err (!%p4867_p9)
}
  0x57   : > { %3843 = dma.hbm_to_vmem [thread:$0]  (!%p5121_p11), %s6288_s3, 2048, %s281_s27, [#allocation6], %s5010_s30, %s5010_s30, %s5011_s21  }
  0x58   : > { %s5012_s8 = smov [#allocation10]   ;;  %s4871_s24 = scalar_lea.hbm %s6292_s7, 8192 }
  0x59   : > { %s312_s9 = sshll.u32 %s5012_s8, 4  ;;  %p4872_p1 = scmp.ne.s32.totalorder %s6292_s7, %s4871_s24  ;;  %s313_s9 = int_to_ptr.vmem [resolvable:$true] %s312_s9 }
  0x5a   : > { %p4878_p6 = scmp.lt.u32.totalorder %s4871_s24, %s6292_s7 }
  0x5b   : > { %p4874_p2 = pnand %p4872_p1, %p5133_p13 }
  0x5d   : > { %p4875_p4 = pneg %p4874_p2 }
  0x5f   : > { %p4880_p8 = pnand %p4878_p6, %p4875_p4 }
  0x61   : > { %4883 = shalt.err (!%p4880_p8)
}
  0x62   : > { %s4884_s27 = scalar_lea.vmem %s313_s9, 8192  ;;  %p4892_p3 = scmp.lt.s32.totalorder %s313_s9, %s313_s9 }
  0x63   : > { %p4885_p10 = scmp.ne.s32.totalorder %s313_s9, %s4884_s27  ;;  %p4893_p5 = scmp.lt.s32.totalorder %s4884_s27, %s4884_s27 }
  0x65   : > { %p4887_p12 = pnand %p4885_p10, %p5133_p13  ;;  %p4894_p7 = por %p4893_p5, %p4892_p3 }
  0x67   : > { %p4888_p0 = pneg %p4887_p12 }
  0x69   : > { %p4895_p9 = pnand %p4894_p7, %p4888_p0 }
  0x6b   : > { %4898 = shalt.err (!%p4895_p9)
}
  0x6c   : > { %s5013_s30 = smov 256   ;;  %s5014_s28 = smov 16  }
  0x6d   : > { %3849 = dma.hbm_to_vmem [thread:$0]  (!%p5121_p11), %s6292_s7, 8192, %s313_s9, [#allocation9], %s5013_s30, %s5013_s30, %s5014_s28  }
  0x6e   : > { %s5204_s22 = sadd.s32 1, %s5003_s12   ;;  %s34_s8 = sadd.s32 1, %s4999_s11 }
  0x6f   : > { %s31_s19 = ssub.s32 %s5003_s12, %s5204_s22  ;;  %p41_p1 = scmp.ne.s32.totalorder %s4999_s11, %s4995_s10 }
  0x70   : > { %p32_p13 = scmp.eq.s32.totalorder %s31_s19, 0  ;;  %p42_p2 = scmp.eq.s32.totalorder %s5003_s12, 0 }
  0x71   : > { %p6366_p6 = scmp.eq.s32.totalorder %s5093_s13, 1  ;;  %p3862_p10 = scmp.lt.s32.totalorder %s5003_s12, 2 }
  0x72   : > { %s5213_s16 = scalar_select %p32_p13, %s4999_s11, %s34_s8  }
  0x73   : > { %p43_p4 = por %p42_p2, %p41_p1  ;;  %p5217_p8 = por %p6366_p6, %p41_p1 }
  0x74   : > { %s329_s20 = sand.u32 1, %s4999_s11   ;;  %s3751_s9 = sshll.u32 %s5003_s12, 10 }
  0x75   : > { %s3448_s24 = sshll.u32 %s329_s20, 6  ;;  %s5227_s29 = scalar_lea.hbm %s6285_s0, %s3751_s9 }
  0x76   : > { %s333_s14 = scalar_lea.vmem [#allocation2], %s3448_s24  ;;  %p5231_p11 = pnand %p3862_p10, %p43_p4 }
  0x77   : > { %s340_s27 = sshll.u32 %s333_s14, 4  ;;  %s5235_s28 = scalar_lea.sflag [#allocation3], %s329_s20  ;;  %s5229_s27 = int_to_ptr.vmem [resolvable:$true] %s340_s27 }
  0x78   : > { %s4899_s21 = scalar_lea.hbm %s5227_s29, 1024  ;;  %p4901_p0 = pneg %p5231_p11 }
  0x79   : > { %p4900_p12 = scmp.ne.s32.totalorder %s5227_s29, %s4899_s21  ;;  %s4904_s8 = scalar_lea.hbm %s6285_s0, 2048 }
  0x7a   : > { %p4905_p7 = scmp.lt.u32.totalorder %s5227_s29, %s6285_s0  ;;  %p4906_p9 = scmp.lt.u32.totalorder %s4904_s8, %s4899_s21 }
  0x7b   : > { %p4902_p3 = pnand %p4901_p0, %p4900_p12  ;;  %p4908_p1 = scmp.lt.u32.totalorder %s4899_s21, %s5227_s29 }
  0x7c   : > { %p4907_p13 = por %p4906_p9, %p4905_p7 }
  0x7d   : > { %p4903_p5 = pneg %p4902_p3 }
  0x7e   : > { %p4909_p2 = por %p4908_p1, %p4907_p13 }
  0x80   : > { %p4910_p4 = pnand %p4909_p2, %p4903_p5 }
  0x82   : > { %4913 = shalt.err (!%p4910_p4)
}
  0x83   : > { %s4914_s20 = scalar_lea.vmem %s5229_s27, 1024  ;;  %s5015_s25 = smov [#allocation2]  }
  0x84   : > { %p4915_p6 = scmp.ne.s32.totalorder %s5229_s27, %s4914_s20  ;;  %s4919_s26 = sshll.u32 %s5015_s25, 4  ;;  %s4920_s26 = int_to_ptr.vmem [resolvable:$false] %s4919_s26 }
  0x85   : > { %s4921_s14 = scalar_lea.vmem %s4920_s26, 2048  ;;  %p4922_p3 = scmp.lt.s32.totalorder %s5229_s27, %s4920_s26 }
  0x86   : > { %p4917_p10 = pnand %p4915_p6, %p4901_p0  ;;  %p4923_p7 = scmp.lt.s32.totalorder %s4921_s14, %s4914_s20 }
  0x88   : > { %p4918_p12 = pneg %p4917_p10  ;;  %p4924_p9 = por %p4923_p7, %p4922_p3 }
  0x8a   : > { %p4925_p13 = pnand %p4924_p9, %p4918_p12 }
  0x8c   : > { %4928 = shalt.err (!%p4925_p13)
}
  0x8d   : > { %s5016_s21 = smov 64   ;;  %s5017_s18 = smov 4  }
  0x8e   : > { %3853 = dma.hbm_to_vmem [thread:$0]  (!%p5231_p11), %s5227_s29, 1024, %s5229_s27, %s5235_s28, %s5016_s21, %s5016_s21, %s5017_s18  }
  0x8f   : > { %p6369_p0 = scmp.ne.s32.totalorder %s6363_s17, 0 }
  0x91   : > { %352 = sbr.rel (%p6369_p0) target bundleno = 1107 (0x453), region = 56 }
  0x98   : > { %s5266_s19 = sand.u32 1, %s4995_s10   ;;  %p6370_p5 = scmp.ne.s32.totalorder %s6360_s15, 0 }
  0x99   : > { %s3452_s8 = sshll.u32 %s5266_s19, 6  ;;  %s355_s24 = scalar_lea.sflag [#allocation3], %s5266_s19 }
  0x9a   : > { %s5270_s9 = scalar_lea.vmem [#allocation2], %s3452_s8 }
  0x9b   : > { %4974 = dma.done.wait (%p6370_p5), %s355_s24, 1024  }
  0x9c   : > { %4976 = vsyncadd (%p6370_p5), %s355_s24, 4294966272  ;;  %p6371_p11 = scmp.eq.s32.totalorder %s5093_s13, 0 }
  0x9e   : > { %4978 = dma.done.wait (%p6371_p11), [#allocation6], 7168   ;;  %p6372_p1 = pmov %p6371_p11 }
  0xa0   : > { %4980 = vsyncadd (%p6372_p1), [#allocation6], 4294960128  ;;  %p6373_p2 = pmov %p6372_p1 }
  0xa1   : > { %p6374_p4 = pmov %p6372_p1 }
  0xa2   : > { %4982 = dma.done.wait (%p6373_p2), [#allocation9], 12288  }
  0xa3   : > { %4984 = vsyncadd (%p6374_p4), [#allocation9], 4294955008  ;;  %v6329_v0 = vmov 0   ;;  %v3915_v1 = vld [vmem:[#allocation5 + $0x4] ss:$20 sps:$4 sm:$0xff]   ;;  %v5297_v26 = vld [vmem:[%s5270_s9 + $0x8] sm:$0xff]  }
  0xa4   : > { %791 = vmatprep.mubr.bf16.mxu0 %v6329_v0  ;;  %831 = vmatprep.mubr.bf16.mxu1 %v6329_v0  ;;  %v3917_v2 = vld [vmem:[#allocation5] ss:$20 sps:$4 sm:$0xff]   ;;  %v3920_v4 = vld [vmem:[#allocation5 + $0x28] ss:$20 sps:$4 sm:$0xff]   ;;  %v3923_v6 = vld [vmem:[#allocation5 + $0x50] ss:$20 sps:$4 sm:$0xff]  }
  0xa5   : > { %759 = vmatprep.subr.bf16.mxu0 %v3915_v1  ;;  %3801 = vmatprep.subr.bf16.mxu1 %v3915_v1  ;;  %v3918_v3 = vld [vmem:[#allocation5 + $0x2c] ss:$20 sps:$4 sm:$0xff]   ;;  %v3921_v5 = vld [vmem:[#allocation5 + $0x54] ss:$20 sps:$4 sm:$0xff]   ;;  %v3924_v7 = vld [vmem:[#allocation5 + $0x7c] ss:$20 sps:$4 sm:$0xff]  }
  0xa6   : > { %760 = vmatpush1.bf16.msra.mxu0 %v3917_v2  ;;  %3809 = vmatpush1.bf16.msra.mxu1 %v3917_v2  ;;  %v3926_v8 = vld [vmem:[#allocation5 + $0x78] ss:$20 sps:$4 sm:$0xff]   ;;  %v3929_v10 = vld [vmem:[#allocation5 + $0xa0] ss:$20 sps:$4 sm:$0xff]   ;;  %v3932_v12 = vld [vmem:[#allocation5 + $0xc8] ss:$20 sps:$4 sm:$0xff]  }
  0xa7   : > { %761 = vmatprep.subr.bf16.mxu0 %v3918_v3  ;;  %3802 = vmatprep.subr.bf16.mxu1 %v3918_v3  ;;  %v3927_v9 = vld [vmem:[#allocation5 + $0xa4] ss:$20 sps:$4 sm:$0xff]   ;;  %v3930_v11 = vld [vmem:[#allocation5 + $0xcc] ss:$20 sps:$4 sm:$0xff]   ;;  %v3933_v13 = vld [vmem:[#allocation5 + $0xf4] ss:$20 sps:$4 sm:$0xff]  }
  0xa8   : > { %v3935_v14 = vld [vmem:[#allocation5 + $0xf0] ss:$20 sps:$4 sm:$0xff]   ;;  %v3938_v16 = vld [vmem:[#allocation5 + $0x118] ss:$20 sps:$4 sm:$0xff]   ;;  %v3941_v21 = vld [vmem:[#allocation5 + $0x8] ss:$20 sps:$4 sm:$0xff]  }
  0xa9   : > { %v3936_v15 = vld [vmem:[#allocation5 + $0x11c] ss:$20 sps:$4 sm:$0xff]   ;;  %v3943_v17 = vld [vmem:[#allocation5 + $0xc] ss:$20 sps:$4 sm:$0xff]   ;;  %v3946_v22 = vld [vmem:[#allocation5 + $0x34] ss:$20 sps:$4 sm:$0xff]  }
  0xaa   : > { %762 = vmatpush1.bf16.msra.mxu0 %v3920_v4  ;;  %3810 = vmatpush1.bf16.msra.mxu1 %v3920_v4  ;;  %v3952_v18 = vld [vmem:[#allocation5 + $0x10] ss:$20 sps:$4 sm:$0xff]   ;;  %v3956_v23 = vld [vmem:[#allocation5 + $0x38] ss:$20 sps:$4 sm:$0xff]   ;;  %v3962_v30 = vld [vmem:[#allocation5 + $0x60] ss:$20 sps:$4 sm:$0xff]  }
  0xab   : > { %763 = vmatprep.subr.bf16.mxu0 %v3921_v5  ;;  %3803 = vmatprep.subr.bf16.mxu1 %v3921_v5  ;;  %v5287_v19 = vld [vmem:[%s5270_s9] sm:$0xff]   ;;  %v3951_v25 = vld [vmem:[#allocation5 + $0x5c] ss:$20 sps:$4 sm:$0xff]   ;;  %v5300_v27 = vld [vmem:[%s5270_s9 + $0x28] sm:$0xff]   ;;  %s6443_s26 = sld [smem:[#allocation37_spill]]  ;;  %s3457_s14 = sshll.u32 %s5266_s19, 7 }
  0xac   : > { %v5290_v20 = vld [vmem:[%s5270_s9 + $0x20] sm:$0xff]   ;;  %v3949_v28 = vld [vmem:[#allocation5 + $0x58] ss:$20 sps:$4 sm:$0xff]   ;;  %v3966_v32 = vld [vmem:[#allocation5 + $0x88] ss:$20 sps:$4 sm:$0xff]   ;;  %s6140_s21 = scalar_lea.vmem [#allocation11], %s3457_s14 }
  0xad   : > { %v3944_v24 = vld [vmem:[#allocation5 + $0x30] ss:$20 sps:$4 sm:$0xff]   ;;  %v3953_v31 = vld [vmem:[#allocation5 + $0x80] ss:$20 sps:$4 sm:$0xff]   ;;  %v3959_v36 = vld [vmem:[#allocation5 + $0xa8] ss:$20 sps:$4 sm:$0xff]  }
  0xae   : > { %764 = vmatpush1.bf16.msra.mxu0 %v3923_v6  ;;  %3811 = vmatpush1.bf16.msra.mxu1 %v3923_v6  ;;  %v3955_v29 = vld [vmem:[#allocation5 + $0x84] ss:$20 sps:$4 sm:$0xff]   ;;  %v3961_v33 = vld [vmem:[#allocation5 + $0xac] ss:$20 sps:$4 sm:$0xff]   ;;  %v5307_v34 = vld [vmem:[%s5270_s9 + $0x10] sm:$0xff]   ;;  %s3752_s18 = sshll.u32 %s5093_s13, 11 }
  0xaf   : > { %765 = vmatprep.subr.bf16.mxu0 %v3924_v7  ;;  %3804 = vmatprep.subr.bf16.mxu1 %v3924_v7  ;;  %v5310_v35 = vld [vmem:[%s5270_s9 + $0x30] sm:$0xff]   ;;  %v3967_v41 = vld [vmem:[%s5270_s9 + $0x18] sm:$0xff]   ;;  %v3981_v49 = vld [vmem:[#allocation8 + $0x4] ss:$8 sps:$4 sm:$0xff]   ;;  %s3330_s8 = sshll.u32 %s6140_s21, 4  ;;  %s6449_s15 = sld [smem:[#allocation38_spill]]  ;;  %s6240_s8 = int_to_ptr.vmem [resolvable:$true] %s3330_s8 }
  0xb0   : > { %v3965_v37 = vld [vmem:[#allocation5 + $0xd4] ss:$20 sps:$4 sm:$0xff]   ;;  %v3972_v38 = vld [vmem:[#allocation5 + $0xb0] ss:$20 sps:$4 sm:$0xff]   ;;  %v5318_v42 = vld [vmem:[%s5270_s9 + $0x38] sm:$0xff]   ;;  %s3317_s13 = scalar_lea.sflag [#allocation4], %s5266_s19 }
  0xb1   : > { %v3963_v39 = vld [vmem:[#allocation5 + $0xd0] ss:$20 sps:$4 sm:$0xff]   ;;  %v3969_v43 = vld [vmem:[#allocation5 + $0xf8] ss:$20 sps:$4 sm:$0xff]   ;;  %v3977_v46 = vld [vmem:[#allocation5 + $0x100] ss:$20 sps:$4 sm:$0xff]  }
  0xb2   : > { %766 = vmatpush1.bf16.msra.mxu0 %v3926_v8  ;;  %3812 = vmatpush1.bf16.msra.mxu1 %v3926_v8  ;;  %v3971_v40 = vld [vmem:[#allocation5 + $0xfc] ss:$20 sps:$4 sm:$0xff]   ;;  %v3975_v44 = vld [vmem:[#allocation5 + $0x124] ss:$20 sps:$4 sm:$0xff]   ;;  %v3973_v47 = vld [vmem:[#allocation5 + $0x120] ss:$20 sps:$4 sm:$0xff]  }
  0xb3   : > { %767 = vmatprep.subr.bf16.mxu0 %v3927_v9  ;;  %3805 = vmatprep.subr.bf16.mxu1 %v3927_v9  ;;  %v3976_v45 = vld [vmem:[#allocation5 + $0xd8] ss:$20 sps:$4 sm:$0xff]   ;;  %v3978_v48 = vld [vmem:[#allocation5 + $0x128] ss:$20 sps:$4 sm:$0xff]   ;;  %s4929_s29 = scalar_lea.vmem %s6240_s8, 2048  ;;  %s5019_s27 = smov [#allocation11]  }
  0xb4   : > { %v3979_v50 = vld [vmem:[#allocation8] ss:$8 sps:$4 sm:$0xff]   ;;  %v3984_v51 = vld [vmem:[#allocation8 + $0x14] ss:$8 sps:$4 sm:$0xff]   ;;  %v3982_v52 = vld [vmem:[#allocation8 + $0x10] ss:$8 sps:$4 sm:$0xff]   ;;  %p4930_p6 = scmp.ne.s32.totalorder %s6240_s8, %s4929_s29 }
  0xb5   : > { %v3987_v53 = vld [vmem:[#allocation8 + $0x24] ss:$8 sps:$4 sm:$0xff]   ;;  %v3985_v54 = vld [vmem:[#allocation8 + $0x20] ss:$8 sps:$4 sm:$0xff]   ;;  %v3990_v55 = vld [vmem:[#allocation8 + $0x34] ss:$8 sps:$4 sm:$0xff]   ;;  %s6238_s17 = scalar_lea.hbm %s6449_s15, %s3752_s18 }
  0xb6   : > { %768 = vmatpush1.bf16.msra.mxu0 %v3929_v10  ;;  %3813 = vmatpush1.bf16.msra.mxu1 %v3929_v10  ;;  %v3988_v56 = vld [vmem:[#allocation8 + $0x30] ss:$8 sps:$4 sm:$0xff]   ;;  %v3993_v57 = vld [vmem:[#allocation8 + $0x44] ss:$8 sps:$4 sm:$0xff]   ;;  %v3991_v58 = vld [vmem:[#allocation8 + $0x40] ss:$8 sps:$4 sm:$0xff]   ;;  %p4931_p10 = pnand %p4930_p6, %p5217_p8 }
  0xb7   : > { %769 = vmatprep.subr.bf16.mxu0 %v3930_v11  ;;  %3806 = vmatprep.subr.bf16.mxu1 %v3930_v11  ;;  %v3996_v59 = vld [vmem:[#allocation8 + $0x54] ss:$8 sps:$4 sm:$0xff]   ;;  %v3994_v60 = vld [vmem:[#allocation8 + $0x50] ss:$8 sps:$4 sm:$0xff]   ;;  %v3999_v61 = vld [vmem:[#allocation8 + $0x64] ss:$8 sps:$4 sm:$0xff]  }
  0xb8   : > { %v3997_v62 = vld [vmem:[#allocation8 + $0x60] ss:$8 sps:$4 sm:$0xff]   ;;  %v4002_v63 = vld [vmem:[#allocation8 + $0x74] ss:$8 sps:$4 sm:$0xff]   ;;  %v4000_v1 = vld [vmem:[#allocation8 + $0x70] ss:$8 sps:$4 sm:$0xff]   ;;  %p4932_p12 = pneg %p4931_p10 }
  0xb9   : > { %v4005_v2 = vld [vmem:[#allocation8 + $0x84] ss:$8 sps:$4 sm:$0xff]   ;;  %v4003_v3 = vld [vmem:[#allocation8 + $0x80] ss:$8 sps:$4 sm:$0xff]   ;;  %v4008_v4 = vld [vmem:[#allocation8 + $0x94] ss:$8 sps:$4 sm:$0xff]  }
  0xba   : > { %770 = vmatpush1.bf16.msra.mxu0 %v3932_v12  ;;  %3814 = vmatpush1.bf16.msra.mxu1 %v3932_v12  ;;  %v4006_v5 = vld [vmem:[#allocation8 + $0x90] ss:$8 sps:$4 sm:$0xff]   ;;  %v4011_v6 = vld [vmem:[#allocation8 + $0xa4] ss:$8 sps:$4 sm:$0xff]   ;;  %v4009_v7 = vld [vmem:[#allocation8 + $0xa0] ss:$8 sps:$4 sm:$0xff]  }
  0xbb   : > { %771 = vmatprep.subr.bf16.mxu0 %v3933_v13  ;;  %3807 = vmatprep.subr.bf16.mxu1 %v3933_v13  ;;  %v4014_v8 = vld [vmem:[#allocation8 + $0xb4] ss:$8 sps:$4 sm:$0xff]   ;;  %v4012_v9 = vld [vmem:[#allocation8 + $0xb0] ss:$8 sps:$4 sm:$0xff]   ;;  %v4017_v10 = vld [vmem:[#allocation8 + $0xc4] ss:$8 sps:$4 sm:$0xff]  }
  0xbc   : > { %v4015_v11 = vld [vmem:[#allocation8 + $0xc0] ss:$8 sps:$4 sm:$0xff]   ;;  %v4020_v12 = vld [vmem:[#allocation8 + $0xd4] ss:$8 sps:$4 sm:$0xff]   ;;  %v4018_v13 = vld [vmem:[#allocation8 + $0xd0] ss:$8 sps:$4 sm:$0xff]  }
  0xbd   : > { %s4933_s30 = sshll.u32 %s5019_s27, 4  ;;  %s4934_s30 = int_to_ptr.vmem [resolvable:$false] %s4933_s30 }
  0xbe   : > { %772 = vmatpush1.bf16.msra.mxu0 %v3935_v14  ;;  %3815 = vmatpush1.bf16.msra.mxu1 %v3935_v14  ;;  %v4023_v14 = vld [vmem:[#allocation8 + $0xe4] ss:$8 sps:$4 sm:$0xff]   ;;  %s4935_s28 = scalar_lea.vmem %s4934_s30, 4096  ;;  %p4936_p3 = scmp.lt.s32.totalorder %s6240_s8, %s4934_s30 }
  0xbf   : > { %773 = vmatprep.subr.bf16.mxu0 %v3936_v15  ;;  %3808 = vmatprep.subr.bf16.mxu1 %v3936_v15  ;;  %v4021_v15 = vld [vmem:[#allocation8 + $0xe0] ss:$8 sps:$4 sm:$0xff]   ;;  %p4937_p7 = scmp.lt.s32.totalorder %s4935_s28, %s4929_s29 }
  0xc1   : > { %p4938_p9 = por %p4937_p7, %p4936_p3 }
  0xc2   : > { %774 = vmatpush1.bf16.msra.mxu0 %v3938_v16  ;;  %3816 = vmatpush1.bf16.msra.mxu1 %v3938_v16  ;;  %v4026_v16 = vld [vmem:[#allocation8 + $0xf4] ss:$8 sps:$4 sm:$0xff]  }
  0xc3   : > { %872 = vmatprep.subr.bf16.mxu1 %v3943_v17  ;;  %3769 = vmatprep.subr.bf16.mxu0 %v3952_v18  ;;  %v4024_v17 = vld [vmem:[#allocation8 + $0xf0] ss:$8 sps:$4 sm:$0xff]   ;;  %p4939_p13 = pnand %p4938_p9, %p4932_p12 }
  0xc5   : > { %792 = vmatmul.mubr.bf16.vlgmr.msra.gmra.mrb[0].mxu0 %v5287_v19  ;;  %832 = vmatmul.mubr.bf16.vlgmr.msra.gmra.mrb[0].mxu1 %v5290_v20 }
  0xc6   : > { %873 = vmatpush1.bf16.msra.mxu1 %v3941_v21  ;;  %801 = vmatprep.mubr.bf16.mxu0 %v6329_v0  ;;  %v4032_v21 = vld [vmem:[#allocation7 + $0x14] ss:$8 sps:$4 sm:$0xff]  }
  0xc7   : > { %874 = vmatprep.subr.bf16.mxu1 %v3946_v22  ;;  %841 = vmatprep.mubr.bf16.mxu1 %v6329_v0  ;;  %v4033_v22 = vld [vmem:[#allocation7 + $0x20] ss:$8 sps:$4 sm:$0xff]  }
  0xc8   : > { %3770 = vmatpush3.bf16.msra.mxu0 %v3952_v18  ;;  %v4027_v18 = vld [vmem:[#allocation7] ss:$8 sps:$4 sm:$0xff]  }
  0xc9   : > { %3771 = vmatprep.subr.bf16.mxu0 %v3956_v23 }
  0xca   : > { %875 = vmatpush1.bf16.msra.mxu1 %v3944_v24  ;;  %v4038_v24 = vld [vmem:[#allocation7 + $0x34] ss:$8 sps:$4 sm:$0xff]  }
  0xcb   : > { %876 = vmatprep.subr.bf16.mxu1 %v3951_v25  ;;  %v4036_v25 = vld [vmem:[#allocation7 + $0x30] ss:$8 sps:$4 sm:$0xff]  }
  0xcc   : > { %3772 = vmatpush3.bf16.msra.mxu0 %v3956_v23  ;;  %v4035_v23 = vld [vmem:[#allocation7 + $0x24] ss:$8 sps:$4 sm:$0xff]  }
  0xcd   : > { %802 = vmatmul.mubr.bf16.gmra.mrb[4].mxu0 %v5297_v26  ;;  %842 = vmatmul.mubr.bf16.gmra.mrb[4].mxu1 %v5300_v27 }
  0xce   : > { %877 = vmatpush1.bf16.msra.mxu1 %v3949_v28  ;;  %811 = vmatprep.mubr.bf16.mxu0 %v6329_v0  ;;  %v4044_v28 = vld [vmem:[#allocation7 + $0x54] ss:$8 sps:$4 sm:$0xff]  }
  0xcf   : > { %878 = vmatprep.subr.bf16.mxu1 %v3955_v29  ;;  %851 = vmatprep.mubr.bf16.mxu1 %v6329_v0  ;;  %v4042_v29 = vld [vmem:[#allocation7 + $0x50] ss:$8 sps:$4 sm:$0xff]  }
  0xd0   : > { %3773 = vmatprep.subr.bf16.mxu0 %v3962_v30 }
  0xd1   : > { %3774 = vmatpush3.bf16.msra.mxu0 %v3962_v30  ;;  %v4047_v30 = vld [vmem:[#allocation7 + $0x64] ss:$8 sps:$4 sm:$0xff]  }
  0xd2   : > { %879 = vmatpush1.bf16.msra.mxu1 %v3953_v31  ;;  %3775 = vmatprep.subr.bf16.mxu0 %v3966_v32  ;;  %v4045_v31 = vld [vmem:[#allocation7 + $0x60] ss:$8 sps:$4 sm:$0xff]  }
  0xd3   : > { %880 = vmatprep.subr.bf16.mxu1 %v3961_v33  ;;  %v4048_v33 = vld [vmem:[#allocation7 + $0x70] ss:$8 sps:$4 sm:$0xff]  }
  0xd5   : > { %812 = vmatmul.mubr.bf16.gmra.mrb[8].mxu0 %v5307_v34  ;;  %852 = vmatmul.mubr.bf16.gmra.mrb[8].mxu1 %v5310_v35 }
  0xd6   : > { %881 = vmatpush1.bf16.msra.mxu1 %v3959_v36  ;;  %821 = vmatprep.mubr.bf16.mxu0 %v6329_v0 }
  0xd7   : > { %882 = vmatprep.subr.bf16.mxu1 %v3965_v37  ;;  %861 = vmatprep.mubr.bf16.mxu1 %v6329_v0  ;;  %v5352_v37 = vld [vmem:[%s6287_s2] sm:$0x1f] }
  0xd8   : > { %3776 = vmatpush3.bf16.msra.mxu0 %v3966_v32  ;;  %v4050_v32 = vld [vmem:[#allocation7 + $0x74] ss:$8 sps:$4 sm:$0xff]  }
  0xd9   : > { %3777 = vmatprep.subr.bf16.mxu0 %v3972_v38 }
  0xda   : > { %883 = vmatpush1.bf16.msra.mxu1 %v3963_v39 }
  0xdb   : > { %884 = vmatprep.subr.bf16.mxu1 %v3971_v40 }
  0xdc   : > { %3778 = vmatpush3.bf16.msra.mxu0 %v3972_v38 }
  0xdd   : > { %822 = vmatmul.mubr.bf16.gmra.mrb[12].mxu0 %v3967_v41  ;;  %862 = vmatmul.mubr.bf16.gmra.mrb[12].mxu1 %v5318_v42 }
  0xde   : > { %885 = vmatpush1.bf16.msra.mxu1 %v3969_v43  ;;  %3779 = vmatprep.subr.bf16.mxu0 %v3976_v45 }
  0xdf   : > { %886 = vmatprep.subr.bf16.mxu1 %v3975_v44  ;;  %904 = vmatprep.mubr.bf16.mxu1 %v6329_v0 }
  0xe0   : > { %3780 = vmatpush3.bf16.msra.mxu0 %v3976_v45  ;;  %3785 = vmatprep.mubr.bf16.mxu0 %v5287_v19 }
  0xe1   : > { %3781 = vmatprep.subr.bf16.mxu0 %v3977_v46 }
  0xe2   : > { %887 = vmatpush1.bf16.msra.mxu1 %v3973_v47 }
  0xe4   : > { %3782 = vmatpush3.bf16.msra.mxu0 %v3977_v46 }
  0xe5   : > { %905 = vmatmul.mubr.bf16.vlgmr.msra.gmra.mrb[16].mxu1 %v5287_v19  ;;  %3783 = vmatprep.subr.bf16.mxu0 %v3978_v48  ;;  %v4029_v19 = vld [vmem:[#allocation7 + $0x4] ss:$8 sps:$4 sm:$0xff]  }
  0xe6   : > { %914 = vmatprep.mubr.bf16.mxu1 %v6329_v0  ;;  %1486 = vmatprep.subr.bf16.mxu1 %v4029_v19 }
  0xe7   : > { %1487 = vmatpush1.bf16.msra.mxu1 %v4027_v18 }
  0xe8   : > { %3784 = vmatpush3.bf16.msra.mxu0 %v3978_v48  ;;  %1488 = vmatprep.subr.bf16.mxu1 %v4032_v21 }
  0xe9   : > { %2011 = vmatprep.subr.bf16.mxu0 %v3981_v49 }
  0xeb   : > { %3786 = vmatmul.mubr.bf16.vlgmr.msra.gmra.mrb[16].mxu0 %v5297_v26 }
  0xec   : > { %3789 = vmatprep.mubr.bf16.mxu0 %v5307_v34  ;;  %2012 = vmatpush1.bf16.msra.mxu0 %v3979_v50 }
  0xed   : > { %915 = vmatmul.mubr.bf16.gmra.mrb[20].mxu1 %v5297_v26  ;;  %2013 = vmatprep.subr.bf16.mxu0 %v3984_v51  ;;  %v4041_v26 = vld [vmem:[#allocation7 + $0x44] ss:$8 sps:$4 sm:$0xff]  }
  0xee   : > { %924 = vmatprep.mubr.bf16.mxu1 %v6329_v0 }
  0xf0   : > { %2014 = vmatpush1.bf16.msra.mxu0 %v3982_v52 }
  0xf1   : > { %2015 = vmatprep.subr.bf16.mxu0 %v3987_v53 }
  0xf3   : > { %3790 = vmatmul.mubr.bf16.gmra.mrb[20].mxu0 %v3967_v41 }
  0xf4   : > { %3793 = vmatprep.mubr.bf16.mxu0 %v5290_v20  ;;  %2016 = vmatpush1.bf16.msra.mxu0 %v3985_v54 }
  0xf5   : > { %925 = vmatmul.mubr.bf16.gmra.mrb[24].mxu1 %v5307_v34  ;;  %2017 = vmatprep.subr.bf16.mxu0 %v3990_v55  ;;  %v478_v34 = vlaneseq }
  0xf6   : > { %934 = vmatprep.mubr.bf16.mxu1 %v6329_v0 }
  0xf8   : > { %2018 = vmatpush1.bf16.msra.mxu0 %v3988_v56 }
  0xf9   : > { %2019 = vmatprep.subr.bf16.mxu0 %v3993_v57 }
  0xfb   : > { %3794 = vmatmul.mubr.bf16.gmra.mrb[24].mxu0 %v5300_v27 }
  0xfc   : > { %3797 = vmatprep.mubr.bf16.mxu0 %v5310_v35  ;;  %2020 = vmatpush1.bf16.msra.mxu0 %v3991_v58 }
  0xfd   : > { %935 = vmatmul.mubr.bf16.gmra.mrb[28].mxu1 %v3967_v41  ;;  %2021 = vmatprep.subr.bf16.mxu0 %v3996_v59 }
  0xfe   : > { %944 = vmatprep.mubr.bf16.mxu1 %v6329_v0 }
 0x100   : > { %2022 = vmatpush1.bf16.msra.mxu0 %v3994_v60 }
 0x101   : > { %2023 = vmatprep.subr.bf16.mxu0 %v3999_v61 }
 0x103   : > { %3798 = vmatmul.mubr.bf16.gmra.mrb[28].mxu0 %v5318_v42 }
 0x104   : > { %2024 = vmatpush1.bf16.msra.mxu0 %v3997_v62 }
 0x105   : > { %945 = vmatmul.mubr.bf16.gmra.mrb[32].mxu1 %v5290_v20  ;;  %2025 = vmatprep.subr.bf16.mxu0 %v4002_v63  ;;  %v4030_v20 = vld [vmem:[#allocation7 + $0x10] ss:$8 sps:$4 sm:$0xff]  }
 0x106   : > { %954 = vmatprep.mubr.bf16.mxu1 %v6329_v0  ;;  %1489 = vmatpush1.bf16.msra.mxu1 %v4030_v20 }
 0x107   : > { %1490 = vmatprep.subr.bf16.mxu1 %v4035_v23 }
 0x108   : > { %2026 = vmatpush1.bf16.msra.mxu0 %v4000_v1 }
 0x109   : > { %2027 = vmatprep.subr.bf16.mxu0 %v4005_v2 }
 0x10a   : > { %1491 = vmatpush1.bf16.msra.mxu1 %v4033_v22 }
 0x10b   : > { %1492 = vmatprep.subr.bf16.mxu1 %v4038_v24 }
 0x10c   : > { %2028 = vmatpush1.bf16.msra.mxu0 %v4003_v3 }
 0x10d   : > { %955 = vmatmul.mubr.bf16.gmra.mrb[36].mxu1 %v5300_v27  ;;  %2029 = vmatprep.subr.bf16.mxu0 %v4008_v4  ;;  %v4039_v27 = vld [vmem:[#allocation7 + $0x40] ss:$8 sps:$4 sm:$0xff]  }
 0x10e   : > { %964 = vmatprep.mubr.bf16.mxu1 %v6329_v0  ;;  %1493 = vmatpush1.bf16.msra.mxu1 %v4036_v25 }
 0x10f   : > { %1494 = vmatprep.subr.bf16.mxu1 %v4041_v26 }
 0x110   : > { %2030 = vmatpush1.bf16.msra.mxu0 %v4006_v5 }
 0x111   : > { %2031 = vmatprep.subr.bf16.mxu0 %v4011_v6 }
 0x112   : > { %1495 = vmatpush1.bf16.msra.mxu1 %v4039_v27 }
 0x113   : > { %1496 = vmatprep.subr.bf16.mxu1 %v4044_v28 }
 0x114   : > { %2032 = vmatpush1.bf16.msra.mxu0 %v4009_v7 }
 0x115   : > { %965 = vmatmul.mubr.bf16.gmra.mrb[40].mxu1 %v5310_v35  ;;  %2033 = vmatprep.subr.bf16.mxu0 %v4014_v8  ;;  %v5344_v35 = vshrl.u32 %v478_v34, 7 }
 0x116   : > { %974 = vmatprep.mubr.bf16.mxu1 %v6329_v0  ;;  %1497 = vmatpush1.bf16.msra.mxu1 %v4042_v29 }
 0x117   : > { %1498 = vmatprep.subr.bf16.mxu1 %v4047_v30  ;;  %6375 = vst [vmem:[#allocation18_spill] sm:$0xff] %v5344_v35  ;;  %v5347_v36 = vsub.s32 0, %v5344_v35  ;;  %v5355_v38 = vsub.s32 1, %v5344_v35 }
 0x118   : > { %2034 = vmatpush1.bf16.msra.mxu0 %v4012_v9 }
 0x119   : > { %2035 = vmatprep.subr.bf16.mxu0 %v4017_v10  ;;  %6376 = vst [vmem:[#allocation19_spill] sm:$0xff] %v5347_v36  ;;  %6377 = vst [vmem:[#allocation20_spill] sm:$0xff] %v5355_v38  ;;  %v5359_v39 = vrot.slane %v5352_v37, %v5347_v36 }
 0x11a   : > { %1499 = vmatpush1.bf16.msra.mxu1 %v4045_v31 }
 0x11b   : > { %1500 = vmatprep.subr.bf16.mxu1 %v4050_v32 }
 0x11c   : > { %2036 = vmatpush1.bf16.msra.mxu0 %v4015_v11 }
 0x11d   : > { %975 = vmatmul.mubr.bf16.gmra.mrb[44].mxu1 %v5318_v42  ;;  %2037 = vmatprep.subr.bf16.mxu0 %v4020_v12  ;;  %v5365_v42 = vrot.slane %v5352_v37, %v5355_v38 }
 0x11e   : > { %1518 = vmatprep.mubr.bf16.mxu1 %v6329_v0  ;;  %1501 = vmatpush1.bf16.msra.mxu1 %v4048_v33 }
 0x120   : > { %2038 = vmatpush1.bf16.msra.mxu0 %v4018_v13 }
 0x121   : > { %2039 = vmatprep.subr.bf16.mxu0 %v4023_v14 }
 0x124   : > { %2040 = vmatpush1.bf16.msra.mxu0 %v4021_v15 }
 0x125   : > { %2041 = vmatprep.subr.bf16.mxu0 %v4026_v16 }
 0x128   : > { %2042 = vmatpush1.bf16.msra.mxu0 %v4024_v17 }
 0x198   : > { %v793_v40 = vpop.f32.mrb[0].mxu0  ;;  %v5361_v41 = vpop.f32.mrb[0].mxu1 }
 0x199   : > { %v5368_v43 = vadd.f32 %v793_v40, %v5359_v39  ;;  %v795_v44 = vpop.f32.mrb[1].mxu0  ;;  %v5370_v45 = vpop.f32.mrb[1].mxu1 }
 0x19a   : > { %v5373_v46 = vadd.f32 %v795_v44, %v5365_v42  ;;  %v797_v47 = vpop.f32.mrb[2].mxu0  ;;  %v5375_v48 = vpop.f32.mrb[2].mxu1 }
 0x19b   : > { %v6328_v49 = vmax.f32 %v5368_v43, 0.0  ;;  %v5379_v50 = vadd.f32 %v797_v47, %v5359_v39  ;;  %v799_v51 = vpop.f32.mrb[3].mxu0  ;;  %v839_v52 = vpop.f32.mrb[3].mxu1  ;;  %v6301_v47 = vsub.s32 2, %v5344_v35 }
 0x19c   : > { %v6324_v53 = vmax.f32 %v5373_v46, 0.0  ;;  %v5383_v54 = vadd.f32 %v799_v51, %v5365_v42  ;;  %v5466_v51 = vadd.f32 %v839_v52, %v5365_v42  ;;  %v5481_v52 = vadd.f32 %v5370_v45, %v5365_v42 }
 0x19d   : > { %v6325_v55 = vmax.f32 %v5379_v50, 0.0  ;;  %v5498_v45 = vadd.f32 %v5375_v48, %v5359_v39 }
 0x19e   : > { %v6319_v56 = vmax.f32 %v5383_v54, 0.0  ;;  %6378 = vst [vmem:[#allocation21_spill] sm:$0xff] %v5466_v51  ;;  %6379 = vst [vmem:[#allocation22_spill] sm:$0xff] %v5481_v52 }
 0x19f   : > { %v1791_v57 = vpack.c.bf16 %v6325_v55, %v6328_v49  ;;  %6380 = vst [vmem:[#allocation23_spill] sm:$0xff] %v5498_v45 }
 0x1a0   : > { %v1792_v58 = vpack.c.bf16 %v6319_v56, %v6324_v53  ;;  %v803_v59 = vpop.f32.mrb[4].mxu0  ;;  %v5395_v60 = vpop.f32.mrb[4].mxu1 }
 0x1a1   : > { %v5398_v61 = vadd.f32 %v803_v59, %v5359_v39  ;;  %v805_v62 = vpop.f32.mrb[5].mxu0  ;;  %v5400_v63 = vpop.f32.mrb[5].mxu1 }
 0x1a2   : > { %v5403_v1 = vadd.f32 %v805_v62, %v5365_v42  ;;  %v807_v2 = vpop.f32.mrb[6].mxu0  ;;  %v5405_v3 = vpop.f32.mrb[6].mxu1  ;;  %2043 = vmatprep.mubr.bf16.mxu0 %v1792_v58 }
 0x1a3   : > { %v6318_v4 = vmax.f32 %v5398_v61, 0.0  ;;  %v5409_v5 = vadd.f32 %v807_v2, %v5359_v39  ;;  %v809_v6 = vpop.f32.mrb[7].mxu0  ;;  %v849_v7 = vpop.f32.mrb[7].mxu1  ;;  %2044 = vmatmul.mubr.bf16.vlgmr.msra.gmra.mrb[32].mxu0 %v1791_v57 }
 0x1a4   : > { %v6316_v8 = vmax.f32 %v5403_v1, 0.0  ;;  %v5413_v9 = vadd.f32 %v809_v6, %v5365_v42 }
 0x1a5   : > { %v6317_v10 = vmax.f32 %v5409_v5, 0.0 }
 0x1a6   : > { %v6310_v11 = vmax.f32 %v5413_v9, 0.0 }
 0x1a7   : > { %v1793_v12 = vpack.c.bf16 %v6317_v10, %v6318_v4 }
 0x1a8   : > { %v1794_v13 = vpack.c.bf16 %v6310_v11, %v6316_v8  ;;  %v813_v14 = vpop.f32.mrb[8].mxu0  ;;  %v5425_v15 = vpop.f32.mrb[8].mxu1 }
 0x1a9   : > { %v5428_v16 = vadd.f32 %v813_v14, %v5359_v39  ;;  %v815_v17 = vpop.f32.mrb[9].mxu0  ;;  %v5430_v18 = vpop.f32.mrb[9].mxu1 }
 0x1aa   : > { %v5433_v19 = vadd.f32 %v815_v17, %v5365_v42  ;;  %v817_v20 = vpop.f32.mrb[10].mxu0  ;;  %v5435_v21 = vpop.f32.mrb[10].mxu1  ;;  %2053 = vmatprep.mubr.bf16.mxu0 %v1794_v13 }
 0x1ab   : > { %v6309_v22 = vmax.f32 %v5428_v16, 0.0  ;;  %v5439_v23 = vadd.f32 %v817_v20, %v5359_v39  ;;  %v819_v24 = vpop.f32.mrb[11].mxu0  ;;  %v5441_v25 = vpop.f32.mrb[11].mxu1  ;;  %2054 = vmatmul.mubr.bf16.gmra.mrb[36].mxu0 %v1793_v12  ;;  %v5491_v20 = vrot.slane %v5352_v37, %v6301_v47 }
 0x1ac   : > { %v6303_v26 = vmax.f32 %v5433_v19, 0.0  ;;  %v5445_v27 = vadd.f32 %v819_v24, %v5365_v42  ;;  %v6312_v24 = vmax.f32 %v5466_v51, 0.0 }
 0x1ad   : > { %v6308_v28 = vmax.f32 %v5439_v23, 0.0 }
 0x1ae   : > { %v6302_v29 = vmax.f32 %v5445_v27, 0.0 }
 0x1af   : > { %v1795_v30 = vpack.c.bf16 %v6308_v28, %v6309_v22 }
 0x1b0   : > { %v1796_v31 = vpack.c.bf16 %v6302_v29, %v6303_v26  ;;  %v823_v32 = vpop.f32.mrb[12].mxu0  ;;  %v5457_v33 = vpop.f32.mrb[12].mxu1  ;;  %v5512_v29 = vadd.f32 %v5361_v41, %v5359_v39  ;;  %v6314_v41 = vmax.f32 %v5498_v45, 0.0 }
 0x1b1   : > { %v5460_v34 = vadd.f32 %v823_v32, %v5359_v39  ;;  %v825_v40 = vpop.f32.mrb[13].mxu0  ;;  %v5462_v44 = vpop.f32.mrb[13].mxu1 }
 0x1b2   : > { %v5469_v57 = vadd.f32 %v825_v40, %v5365_v42  ;;  %v827_v58 = vpop.f32.mrb[14].mxu0  ;;  %v5471_v59 = vpop.f32.mrb[14].mxu1  ;;  %2063 = vmatprep.mubr.bf16.mxu0 %v1796_v31  ;;  %v6311_v31 = vsub.s32 3, %v5344_v35  ;;  %v496_v40 = vsub.s32 4, %v5344_v35  ;;  %6381 = vst [vmem:[#allocation24_spill] sm:$0xff] %v5512_v29 }
 0x1b3   : > { %v6305_v62 = vmax.f32 %v5460_v34, 0.0  ;;  %v5475_v2 = vadd.f32 %v827_v58, %v5359_v39  ;;  %v829_v6 = vpop.f32.mrb[15].mxu0  ;;  %v5477_v12 = vpop.f32.mrb[15].mxu1  ;;  %2064 = vmatmul.mubr.bf16.gmra.mrb[40].mxu0 %v1795_v30  ;;  %v6313_v58 = vmax.f32 %v5481_v52, 0.0 }
 0x1b4   : > { %v6307_v13 = vmax.f32 %v5469_v57, 0.0  ;;  %v5485_v14 = vadd.f32 %v829_v6, %v5365_v42  ;;  %v5530_v11 = vrot.slane %v5352_v37, %v496_v40 }
 0x1b5   : > { %v6304_v17 = vmax.f32 %v5475_v2, 0.0 }
 0x1b6   : > { %v6306_v30 = vmax.f32 %v5485_v14, 0.0 }
 0x1b7   : > { %v1797_v32 = vpack.c.bf16 %v6304_v17, %v6305_v62  ;;  %v1800_v17 = vpack.c.bf16 %v6312_v24, %v6313_v58  ;;  %v5520_v62 = vadd.f32 %v849_v7, %v5365_v42  ;;  %v5534_v7 = vadd.f32 %v5400_v63, %v5365_v42 }
 0x1b8   : > { %v1798_v6 = vpack.c.bf16 %v6306_v30, %v6307_v13  ;;  %v906_v47 = vpop.f32.mrb[16].mxu1  ;;  %v5525_v30 = vrot.slane %v5352_v37, %v6311_v31  ;;  %v6315_v31 = vmax.f32 %v5512_v29, 0.0 }
 0x1b9   : > { %v907_v48 = vadd.f32 %v906_v47, %v5491_v20  ;;  %v908_v26 = vpop.f32.mrb[17].mxu1  ;;  %6382 = vst [vmem:[#allocation25_spill] sm:$0xff] %v5520_v62  ;;  %6383 = vst [vmem:[#allocation26_spill] sm:$0xff] %v5534_v7 }
 0x1ba   : > { %v910_v13 = vpop.f32.mrb[18].mxu1  ;;  %2073 = vmatprep.mubr.bf16.mxu0 %v1798_v6  ;;  %v6320_v6 = vmax.f32 %v5520_v62, 0.0  ;;  %v1799_v37 = vpack.c.bf16 %v6314_v41, %v6315_v31 }
 0x1bb   : > { %v3506_v28 = vmul.f32 -1.442695, %v907_v48  ;;  %v911_v47 = vadd.f32 %v910_v13, %v5491_v20  ;;  %v912_v22 = vpop.f32.mrb[19].mxu1  ;;  %2074 = vmatmul.mubr.bf16.gmra.mrb[44].mxu0 %v1797_v32  ;;  %v909_v48 = vadd.f32 %v908_v26, %v5525_v30  ;;  %v5545_v13 = vadd.f32 %v5395_v60, %v5359_v39 }
 0x1bc   : > { %2083 = vmatprep.mubr.bf16.mxu0 %v1800_v17  ;;  %v5551_v32 = vadd.f32 %v5405_v3, %v5359_v39  ;;  %v913_v26 = vadd.f32 %v912_v22, %v5525_v30  ;;  %v5557_v60 = vadd.f32 %v5441_v25, %v5365_v42  ;;  %v5567_v22 = vadd.f32 %v5430_v18, %v5365_v42 }
 0x1bd   : > { %4147 = vpow2.f32 %v3506_v28  ;;  %v3507_v24 = vmul.f32 -1.442695, %v911_v47  ;;  %6384 = vst [vmem:[#allocation27_spill] sm:$0xff] %v5545_v13  ;;  %v6321_v28 = vmax.f32 %v5534_v7, 0.0 }
 0x1be   : > { %v3787_v58 = vpop.f32.mrb[16].mxu0  ;;  %6385 = vst [vmem:[#allocation28_spill] sm:$0xff] %v5551_v32  ;;  %6386 = vst [vmem:[#allocation29_spill] sm:$0xff] %v5557_v60  ;;  %v6322_v56 = vmax.f32 %v5551_v32, 0.0  ;;  %v6326_v18 = vmax.f32 %v5557_v60, 0.0 }
 0x1bf   : > { %4149 = vpow2.f32 %v3507_v24  ;;  %v1028_v63 = vadd.f32 %v3787_v58, %v5530_v11  ;;  %v1019_v17 = vpop.f32.mrb[17].mxu0  ;;  %v1802_v3 = vpack.c.bf16 %v6320_v6, %v6321_v28  ;;  %6387 = vst [vmem:[#allocation30_spill] sm:$0xff] %v5567_v22 }
 0x1c0   : > { %v916_v40 = vpop.f32.mrb[20].mxu1  ;;  %v1020_v47 = vadd.f32 %v1019_v17, %v5530_v11  ;;  %v3788_v41 = vpop.f32.mrb[18].mxu0  ;;  %4151 = vtanh.f32 %v909_v48 }
 0x1c1   : > { %v917_v24 = vadd.f32 %v916_v40, %v5491_v20  ;;  %v918_v58 = vpop.f32.mrb[21].mxu1  ;;  %v3524_v31 = vmul.f32 -1.442695, %v1028_v63  ;;  %v1031_v8 = vadd.f32 %v3788_v41, %v5530_v11  ;;  %v1022_v10 = vpop.f32.mrb[19].mxu0 }
 0x1c2   : > { %v919_v25 = vadd.f32 %v918_v58, %v5525_v30  ;;  %v920_v17 = vpop.f32.mrb[22].mxu1  ;;  %v1023_v41 = vadd.f32 %v1022_v10, %v5530_v11  ;;  %v3522_v6 = vmul.f32 -1.442695, %v1020_v47  ;;  %v6323_v58 = vmax.f32 %v5545_v13, 0.0 }
 0x1c3   : > { %v3508_v4 = vmul.f32 -1.442695, %v917_v24  ;;  %v921_v40 = vadd.f32 %v920_v17, %v5491_v20  ;;  %4153 = vpow2.f32 %v3524_v31  ;;  %v922_v63 = vpop.f32.mrb[23].mxu1  ;;  %2084 = vmatmul.mubr.bf16.gmra.mrb[48].mxu0 %v1799_v37  ;;  %v3525_v28 = vmul.f32 -1.442695, %v1031_v8 }
 0x1c4   : > { %4155 = vtanh.f32 %v913_v26  ;;  %2093 = vmatprep.mubr.bf16.mxu0 %v1802_v3  ;;  %v6327_v31 = vmax.f32 %v5567_v22, 0.0  ;;  %v3523_v37 = vmul.f32 -1.442695, %v1023_v41  ;;  %v1801_v26 = vpack.c.bf16 %v6322_v56, %v6323_v58 }
 0x1c5   : > { %4157 = vpow2.f32 %v3508_v4  ;;  %v3509_v48 = vmul.f32 -1.442695, %v921_v40  ;;  %v5584_v4 = vadd.f32 %v5425_v15, %v5359_v39  ;;  %v5590_v40 = vadd.f32 %v5435_v21, %v5359_v39 }
 0x1c6   : > { %4159 = vtanh.f32 %v919_v25  ;;  %v3791_v24 = vpop.f32.mrb[20].mxu0  ;;  %v1804_v41 = vpack.c.bf16 %v6326_v18, %v6327_v31  ;;  %v923_v21 = vadd.f32 %v922_v63, %v5525_v30  ;;  %v5608_v31 = vadd.f32 %v5462_v44, %v5365_v42 }
 0x1c7   : > { %v4148_v17 = vpop.eup %4147  ;;  %4161 = vpow2.f32 %v3509_v48  ;;  %v5576_v10 = vpop.f32.mrb[21].mxu0  ;;  %6388 = vst [vmem:[#allocation31_spill] sm:$0xff] %v5584_v4  ;;  %6389 = vst [vmem:[#allocation32_spill] sm:$0xff] %v5590_v40  ;;  %v6333_v63 = vmax.f32 %v5590_v40, 0.0 }
 0x1c8   : > { %v1162_v8 = vadd.f32 1.0, %v4148_v17  ;;  %4163 = vpow2.f32 %v3522_v6  ;;  %v926_v47 = vpop.f32.mrb[24].mxu1  ;;  %v5586_v3 = vpop.f32.mrb[22].mxu0  ;;  %v5601_v6 = vadd.f32 %v5477_v12, %v5365_v42  ;;  %6391 = vst [vmem:[#allocation34_spill] sm:$0xff] %v5608_v31  ;;  %v6334_v42 = vmax.f32 %v5584_v4, 0.0 }
 0x1c9   : > { %v4150_v25 = vpop.eup %4149  ;;  %4165 = vpow2.f32 %v3525_v28  ;;  %v927_v48 = vadd.f32 %v926_v47, %v5491_v20  ;;  %v928_v15 = vpop.f32.mrb[25].mxu1  ;;  %v1044_v28 = vadd.f32 %v3791_v24, %v5530_v11 }
 0x1ca   : > { %v5597_v56 = vpop.f32.mrb[23].mxu0  ;;  %6390 = vst [vmem:[#allocation33_spill] sm:$0xff] %v5601_v6  ;;  %4167 = vrcp.f32 %v1162_v8  ;;  %v1163_v17 = vadd.f32 1.0, %v4150_v25  ;;  %v930_v58 = vpop.f32.mrb[26].mxu1  ;;  %v929_v12 = vadd.f32 %v928_v15, %v5525_v30  ;;  %v6340_v15 = vmax.f32 %v5608_v31, 0.0 }
 0x1cb   : > { %4169 = vpow2.f32 %v3523_v37  ;;  %v3510_v53 = vmul.f32 -1.442695, %v927_v48  ;;  %v931_v55 = vadd.f32 %v930_v58, %v5491_v20  ;;  %v932_v18 = vpop.f32.mrb[27].mxu1  ;;  %2094 = vmatmul.mubr.bf16.gmra.mrb[52].mxu0 %v1801_v26  ;;  %v4152_v47 = vpop.eup %4151  ;;  %v6339_v58 = vmax.f32 %v5601_v6, 0.0 }
 0x1cc   : > { %4171 = vrcp.f32 %v1163_v17  ;;  %2103 = vmatprep.mubr.bf16.mxu0 %v1804_v41  ;;  %v3528_v44 = vmul.f32 -1.442695, %v1044_v28  ;;  %v5629_v28 = vadd.f32 %v5457_v33, %v5359_v39 }
 0x1cd   : > { %v4154_v8 = vpop.eup %4153  ;;  %4173 = vpow2.f32 %v3510_v53  ;;  %v3511_v37 = vmul.f32 -1.442695, %v931_v55  ;;  %v1806_v35 = vpack.c.bf16 %v6339_v58, %v6340_v15 }
 0x1ce   : > { %v4156_v25 = vpop.eup %4155  ;;  %v1276_v26 = vadd.f32 1.0, %v4154_v8  ;;  %4175 = vtanh.f32 %v923_v21  ;;  %v5613_v24 = vpop.f32.mrb[24].mxu0  ;;  %v1803_v21 = vpack.c.bf16 %v6333_v63, %v6334_v42  ;;  %6392 = vst [vmem:[#allocation35_spill] sm:$0xff] %v5629_v28  ;;  %v933_v42 = vadd.f32 %v932_v18, %v5525_v30 }
 0x1cf   : > { %v4158_v48 = vpop.eup %4157  ;;  %4177 = vpow2.f32 %v3511_v37  ;;  %v5616_v17 = vpop.f32.mrb[25].mxu0  ;;  %v5633_v37 = vadd.f32 %v5471_v59, %v5359_v39  ;;  %v6345_v18 = vmax.f32 %v5629_v28, 0.0 }
 0x1d0   : > { %v5618_v41 = vpop.eup %4159  ;;  %v1164_v53 = vadd.f32 1.0, %v4158_v48  ;;  %4179 = vtanh.f32 %v929_v12  ;;  %v936_v55 = vpop.f32.mrb[28].mxu1 }
 0x1d1   : > { %v5621_v49 = vpop.f32.mrb[26].mxu0  ;;  %v4162_v8 = vpop.eup %4161  ;;  %6393 = vst [vmem:[#allocation36_spill] sm:$0xff] %v5633_v37  ;;  %4181 = vrcp.f32 %v1276_v26  ;;  %v937_v39 = vadd.f32 %v936_v55, %v5491_v20  ;;  %v6344_v6 = vmax.f32 %v5633_v37, 0.0  ;;  %v1036_v37 = vadd.f32 %v5576_v10, %v5530_v11 }
 0x1d2   : > { %v938_v48 = vpop.f32.mrb[29].mxu1  ;;  %v5635_v12 = vpop.f32.mrb[27].mxu0  ;;  %4183 = vrcp.f32 %v1164_v53  ;;  %v1165_v63 = vadd.f32 1.0, %v4162_v8  ;;  %v1039_v10 = vadd.f32 %v5597_v56, %v5530_v11 }
 0x1d3   : > { %v4164_v0 = vpop.eup %4163  ;;  %v940_v33 = vpop.f32.mrb[30].mxu1  ;;  %4185 = vpow2.f32 %v3528_v44  ;;  %2104 = vmatmul.mubr.bf16.gmra.mrb[56].mxu0 %v1803_v21  ;;  %v3512_v21 = vmul.f32 -1.442695, %v937_v39  ;;  %v3526_v28 = vmul.f32 -1.442695, %v1036_v37 }
 0x1d4   : > { %v4166_v60 = vpop.eup %4165  ;;  %v1274_v22 = vadd.f32 1.0, %v4164_v0  ;;  %v5643_v59 = vpop.f32.mrb[31].mxu1  ;;  %4187 = vrcp.f32 %v1165_v63  ;;  %2113 = vmatprep.mubr.bf16.mxu0 %v1806_v35  ;;  %v941_v0 = vadd.f32 %v940_v33, %v5491_v20 }
 0x1d5   : > { %v4168_v26 = vpop.eup %4167 }
 0x1d6   : > { %v4170_v31 = vpop.eup %4169  ;;  %v1322_v58 = vmul.f32 %v4168_v26, %v4152_v47  ;;  %4189 = vrcp.f32 %v1274_v22  ;;  %v3799_v55 = vpop.f32.mrb[28].mxu0 }
 0x1d7   : > { %v4172_v53 = vpop.eup %4171  ;;  %v1275_v8 = vadd.f32 1.0, %v4170_v31  ;;  %4191 = vtanh.f32 %v933_v42  ;;  %v5649_v63 = vadd.f32 %v3799_v55, %v5530_v11  ;;  %v1067_v35 = vpop.f32.mrb[29].mxu0 }
 0x1d8   : > { %v4174_v44 = vpop.eup %4173  ;;  %4193 = vtanh.f32 %v1322_v58  ;;  %v1323_v15 = vmul.f32 %v4172_v53, %v4156_v25  ;;  %v946_v22 = vpop.f32.mrb[32].mxu1  ;;  %v5652_v26 = vadd.f32 %v1067_v35, %v5530_v11  ;;  %v1805_v58 = vpack.c.bf16 %v6344_v6, %v6345_v18 }
 0x1d9   : > { %v4176_v40 = vpop.eup %4175  ;;  %4195 = vrcp.f32 %v1275_v8  ;;  %v1166_v47 = vadd.f32 1.0, %v4174_v44  ;;  %v3800_v31 = vpop.f32.mrb[30].mxu0  ;;  %v1277_v25 = vadd.f32 1.0, %v4166_v60  ;;  %v3513_v44 = vmul.f32 -1.442695, %v941_v0 }
 0x1da   : > { %v4178_v42 = vpop.eup %4177  ;;  %4197 = vtanh.f32 %v1323_v15  ;;  %v5658_v33 = vpop.f32.mrb[33].mxu1  ;;  %v5661_v39 = vadd.f32 %v3800_v31, %v5530_v11  ;;  %v939_v15 = vadd.f32 %v938_v48, %v5525_v30  ;;  %v1047_v31 = vadd.f32 %v5586_v3, %v5530_v11 }
 0x1db   : > { %v1070_v53 = vpop.f32.mrb[31].mxu0  ;;  %v4180_v8 = vpop.eup %4179  ;;  %4199 = vrcp.f32 %v1166_v47  ;;  %v1167_v55 = vadd.f32 1.0, %v4178_v42  ;;  %2114 = vmatmul.mubr.bf16.gmra.mrb[60].mxu0 %v1805_v58 }
 0x1dc   : > { %v950_v35 = vpop.f32.mrb[34].mxu1  ;;  %v5663_v4 = vpop.eup %4181  ;;  %4201 = vpow2.f32 %v3512_v21  ;;  %v5673_v47 = vadd.f32 %v1070_v53, %v5530_v11  ;;  %v3529_v53 = vmul.f32 -1.442695, %v1047_v31 }
 0x1dd   : > { %v5667_v6 = vpop.f32.mrb[35].mxu1  ;;  %v4184_v60 = vpop.eup %4183  ;;  %4203 = vrcp.f32 %v1167_v55  ;;  %v947_v55 = vadd.f32 %v946_v22, %v5491_v20  ;;  %v943_v22 = vadd.f32 %v5643_v59, %v5525_v30 }
 0x1de   : > { %v4186_v0 = vpop.eup %4185  ;;  %v1324_v42 = vmul.f32 %v4184_v60, %v5618_v41  ;;  %4205 = vrcp.f32 %v1277_v25  ;;  %v3527_v41 = vmul.f32 -1.442695, %v1039_v10 }
 0x1df   : > { %v4188_v21 = vpop.eup %4187  ;;  %4207 = vpow2.f32 %v3513_v44  ;;  %v1280_v58 = vadd.f32 1.0, %v4186_v0  ;;  %v3514_v56 = vmul.f32 -1.442695, %v947_v55 }
 0x1e0   : > { %v4190_v18 = vpop.eup %4189  ;;  %4209 = vtanh.f32 %v1324_v42  ;;  %v1325_v48 = vmul.f32 %v4188_v21, %v4176_v40  ;;  %v956_v62 = vpop.f32.mrb[36].mxu1 }
 0x1e1   : > { %v4192_v3 = vpop.eup %4191  ;;  %4211 = vtanh.f32 %v939_v15  ;;  %v958_v25 = vpop.f32.mrb[37].mxu1  ;;  %v951_v15 = vadd.f32 %v950_v35, %v5491_v20 }
 0x1e2   : > { %v4194_v7 = vpop.eup %4193  ;;  %4213 = vtanh.f32 %v1325_v48  ;;  %v960_v32 = vpop.f32.mrb[38].mxu1 }
 0x1e3   : > { %v4196_v60 = vpop.eup %4195  ;;  %4215 = vrcp.f32 %v1280_v58  ;;  %v1354_v44 = vmul.f32 %v4194_v7, %v4190_v18  ;;  %v5681_v40 = vpop.f32.mrb[39].mxu1  ;;  %v957_v7 = vadd.f32 %v956_v62, %v5491_v20  ;;  %v3515_v59 = vmul.f32 -1.442695, %v951_v15 }
 0x1e4   : > { %v4198_v0 = vpop.eup %4197  ;;  %4217 = vpow2.f32 %v3526_v28  ;;  %v6394_v62 = vmov 0  }
 0x1e5   : > { %v4200_v37 = vpop.eup %4199  ;;  %4219 = vpow2.f32 %v3529_v53  ;;  %v1355_v31 = vmul.f32 %v4198_v0, %v4196_v60 }
 0x1e6   : > { %v4202_v42 = vpop.eup %4201  ;;  %v1326_v10 = vmul.f32 %v4200_v37, %v4180_v8  ;;  %4221 = vpow2.f32 %v3527_v41  ;;  %v949_v8 = vadd.f32 %v5658_v33, %v5525_v30  ;;  %v953_v33 = vadd.f32 %v5667_v6, %v5525_v30 }
 0x1e7   : > { %v4204_v21 = vpop.eup %4203  ;;  %v1168_v58 = vadd.f32 1.0, %v4202_v42  ;;  %4223 = vpow2.f32 %v3514_v56  ;;  %v1370_v18 = vpack.c.bf16 %v1355_v31, %v1354_v44  ;;  %v961_v42 = vadd.f32 %v960_v32, %v5491_v20 }
 0x1e8   : > { %v4206_v55 = vpop.eup %4205  ;;  %v1327_v48 = vmul.f32 %v4204_v21, %v4192_v3  ;;  %4225 = vtanh.f32 %v943_v22  ;;  %v966_v13 = vpop.f32.mrb[40].mxu1  ;;  %v3516_v3 = vmul.f32 -1.442695, %v957_v7  ;;  %v1060_v6 = vadd.f32 %v5613_v24, %v5530_v11 }
 0x1e9   : > { %v4208_v28 = vpop.eup %4207  ;;  %4227 = vrcp.f32 %v1168_v58  ;;  %1519 = vmatmul.mubr.bf16.vlgmr.msra.gmra.mrb[48].mxu1 %v1370_v18  ;;  %v5688_v41 = vadd.f32 %v966_v13, %v5491_v20  ;;  %v968_v60 = vpop.f32.mrb[41].mxu1 }
 0x1ea   : > { %v4210_v53 = vpop.eup %4209  ;;  %4229 = vtanh.f32 %v1326_v10  ;;  %v1169_v35 = vadd.f32 1.0, %v4208_v28  ;;  %1528 = vmatprep.mubr.bf16.mxu1 %v6394_v62  ;;  %v5692_v44 = vadd.f32 %v968_v60, %v5525_v30  ;;  %v970_v0 = vpop.f32.mrb[42].mxu1  ;;  %v3532_v24 = vmul.f32 -1.442695, %v1060_v6 }
 0x1eb   : > { %v4212_v56 = vpop.eup %4211  ;;  %4231 = vtanh.f32 %v1327_v48  ;;  %v1356_v22 = vmul.f32 %v4210_v53, %v5663_v4  ;;  %v5698_v13 = vadd.f32 %v970_v0, %v5491_v20  ;;  %v972_v15 = vpop.f32.mrb[43].mxu1  ;;  %v959_v4 = vadd.f32 %v958_v25, %v5525_v30 }
 0x1ec   : > { %v4214_v37 = vpop.eup %4213  ;;  %4233 = vrcp.f32 %v1169_v35  ;;  %v5704_v10 = vadd.f32 %v972_v15, %v5525_v30  ;;  %v3517_v53 = vmul.f32 -1.442695, %v961_v42  ;;  %v1052_v0 = vadd.f32 %v5616_v17, %v5530_v11 }
 0x1ed   : > { %v5700_v31 = vpop.eup %4215  ;;  %4235 = vpow2.f32 %v3515_v59  ;;  %v1357_v21 = vmul.f32 %v4214_v37, %v4206_v55 }
 0x1ee   : > { %v4218_v58 = vpop.eup %4217  ;;  %4237 = vtanh.f32 %v949_v8 }
 0x1ef   : > { %v4220_v7 = vpop.eup %4219  ;;  %v1278_v18 = vadd.f32 1.0, %v4218_v58  ;;  %4239 = vpow2.f32 %v3516_v3  ;;  %v1371_v48 = vpack.c.bf16 %v1357_v21, %v1356_v22 }
 0x1f0   : > { %v4222_v28 = vpop.eup %4221  ;;  %4241 = vtanh.f32 %v953_v33  ;;  %v976_v35 = vpop.f32.mrb[44].mxu1  ;;  %v1281_v42 = vadd.f32 1.0, %v4220_v7 }
 0x1f1   : > { %v4224_v59 = vpop.eup %4223  ;;  %4243 = vrcp.f32 %v1278_v18  ;;  %v1279_v32 = vadd.f32 1.0, %v4222_v28  ;;  %1529 = vmatmul.mubr.bf16.gmra.mrb[52].mxu1 %v1371_v48  ;;  %v977_v25 = vadd.f32 %v976_v35, %v5491_v20  ;;  %v978_v8 = vpop.f32.mrb[45].mxu1  ;;  %v1063_v18 = vadd.f32 %v5621_v49, %v5530_v11 }
 0x1f2   : > { %v4226_v55 = vpop.eup %4225  ;;  %v1170_v60 = vadd.f32 1.0, %v4224_v59  ;;  %4245 = vtanh.f32 %v959_v4  ;;  %1538 = vmatprep.mubr.bf16.mxu1 %v6394_v62  ;;  %v5714_v22 = vadd.f32 %v978_v8, %v5525_v30  ;;  %v980_v37 = vpop.f32.mrb[46].mxu1  ;;  %v1055_v48 = vadd.f32 %v5635_v12, %v5530_v11 }
 0x1f3   : > { %v4228_v3 = vpop.eup %4227  ;;  %4247 = vrcp.f32 %v1279_v32  ;;  %v5717_v21 = vadd.f32 %v980_v37, %v5491_v20  ;;  %v982_v58 = vpop.f32.mrb[47].mxu1  ;;  %v3530_v28 = vmul.f32 -1.442695, %v1052_v0  ;;  %v963_v11 = vadd.f32 %v5681_v40, %v5525_v30 }
 0x1f4   : > { %v4230_v33 = vpop.eup %4229  ;;  %v1328_v15 = vmul.f32 %v4228_v3, %v4212_v56  ;;  %4249 = vrcp.f32 %v1170_v60  ;;  %v5722_v6 = vadd.f32 %v982_v58, %v5525_v30  ;;  %v3531_v60 = vmul.f32 -1.442695, %v1055_v48 }
 0x1f5   : > { %v4232_v4 = vpop.eup %4231  ;;  %4251 = vpow2.f32 %v3517_v53  ;;  %v3533_v53 = vmul.f32 -1.442695, %v1063_v18  ;;  %v3518_v3 = vmul.f32 -1.442695, %v5688_v41  ;;  %v3519_v58 = vmul.f32 -1.442695, %v5698_v13 }
 0x1f6   : > { %v4234_v17 = vpop.eup %4233  ;;  %4253 = vtanh.f32 %v1328_v15 }
 0x1f7   : > { %v4236_v56 = vpop.eup %4235  ;;  %v1329_v7 = vmul.f32 %v4234_v17, %v4226_v55  ;;  %4255 = vpow2.f32 %v3532_v24 }
 0x1f8   : > { %v4238_v20 = vpop.eup %4237  ;;  %4257 = vrcp.f32 %v1281_v42  ;;  %v1171_v59 = vadd.f32 1.0, %v4236_v56  ;;  %v3520_v56 = vmul.f32 -1.442695, %v977_v25 }
 0x1f9   : > { %v4240_v32 = vpop.eup %4239  ;;  %4259 = vtanh.f32 %v1329_v7 }
 0x1fa   : > { %v4242_v35 = vpop.eup %4241  ;;  %4261 = vrcp.f32 %v1171_v59  ;;  %v1172_v49 = vadd.f32 1.0, %v4240_v32 }
 0x1fb   : > { %v4244_v8 = vpop.eup %4243  ;;  %4263 = vpow2.f32 %v3530_v28 }
 0x1fc   : > { %v4246_v37 = vpop.eup %4245  ;;  %4265 = vrcp.f32 %v1172_v49  ;;  %v1358_v12 = vmul.f32 %v4244_v8, %v4230_v33 }
 0x1fd   : > { %v4248_v55 = vpop.eup %4247  ;;  %4267 = vpow2.f32 %v3533_v53 }
 0x1fe   : > { %v4250_v24 = vpop.eup %4249  ;;  %4269 = vpow2.f32 %v3531_v60  ;;  %v1359_v0 = vmul.f32 %v4248_v55, %v4232_v4 }
 0x1ff   : > { %v4252_v15 = vpop.eup %4251  ;;  %v1330_v42 = vmul.f32 %v4250_v24, %v4238_v20  ;;  %4271 = vpow2.f32 %v3518_v3 }
 0x200   : > { %v4254_v18 = vpop.eup %4253  ;;  %v1173_v17 = vadd.f32 1.0, %v4252_v15  ;;  %4273 = vtanh.f32 %v963_v11  ;;  %v1372_v41 = vpack.c.bf16 %v1359_v0, %v1358_v12  ;;  %v3536_v0 = vmul.f32 -1.442695, %v5649_v63 }
 0x201   : > { %v4256_v48 = vpop.eup %4255  ;;  %4275 = vtanh.f32 %v5692_v44  ;;  %v1360_v30 = vmul.f32 %v4254_v18, %v5700_v31 }
 0x202   : > { %v4258_v40 = vpop.eup %4257  ;;  %4277 = vrcp.f32 %v1173_v17  ;;  %v1284_v33 = vadd.f32 1.0, %v4256_v48  ;;  %1539 = vmatmul.mubr.bf16.gmra.mrb[56].mxu1 %v1372_v41  ;;  %v3537_v41 = vmul.f32 -1.442695, %v5661_v39 }
 0x203   : > { %v4260_v4 = vpop.eup %4259  ;;  %4279 = vpow2.f32 %v3519_v58  ;;  %1548 = vmatprep.mubr.bf16.mxu1 %v6394_v62 }
 0x204   : > { %v4262_v7 = vpop.eup %4261  ;;  %4281 = vtanh.f32 %v1330_v42  ;;  %v1361_v13 = vmul.f32 %v4260_v4, %v4258_v40 }
 0x205   : > { %v4264_v28 = vpop.eup %4263  ;;  %v1331_v20 = vmul.f32 %v4262_v7, %v4242_v35  ;;  %4283 = vrcp.f32 %v1284_v33  ;;  %v3521_v35 = vmul.f32 -1.442695, %v5717_v21  ;;  %v3534_v21 = vmul.f32 -1.442695, %v5652_v26 }
 0x206   : > { %v4266_v59 = vpop.eup %4265  ;;  %v1282_v32 = vadd.f32 1.0, %v4264_v28  ;;  %4285 = vpow2.f32 %v3520_v56  ;;  %v1373_v44 = vpack.c.bf16 %v1361_v13, %v1360_v30  ;;  %v3535_v30 = vmul.f32 -1.442695, %v5673_v47 }
 0x207   : > { %v4268_v31 = vpop.eup %4267  ;;  %4287 = vtanh.f32 %v1331_v20  ;;  %v1332_v53 = vmul.f32 %v4266_v59, %v4246_v37 }
 0x208   : > { %v4270_v49 = vpop.eup %4269  ;;  %4289 = vrcp.f32 %v1282_v32  ;;  %v1285_v60 = vadd.f32 1.0, %v4268_v31 }
 0x209   : > { %v4272_v25 = vpop.eup %4271  ;;  %4291 = vtanh.f32 %v1332_v53  ;;  %v1283_v8 = vadd.f32 1.0, %v4270_v49 }
 0x20a   : > { %v4274_v3 = vpop.eup %4273  ;;  %v1174_v11 = vadd.f32 1.0, %v4272_v25  ;;  %4293 = vtanh.f32 %v5704_v10  ;;  %1549 = vmatmul.mubr.bf16.gmra.mrb[60].mxu1 %v1373_v44 }
 0x20b   : > { %v4276_v12 = vpop.eup %4275  ;;  %4295 = vrcp.f32 %v1283_v8  ;;  %1558 = vmatprep.mubr.bf16.mxu1 %v6394_v62 }
 0x20c   : > { %v4278_v55 = vpop.eup %4277  ;;  %4297 = vrcp.f32 %v1174_v11 }
 0x20d   : > { %v4280_v37 = vpop.eup %4279  ;;  %v1333_v24 = vmul.f32 %v4278_v55, %v4274_v3  ;;  %4299 = vrcp.f32 %v1285_v60 }
 0x20e   : > { %v4282_v15 = vpop.eup %4281  ;;  %v1175_v42 = vadd.f32 1.0, %v4280_v37  ;;  %4301 = vpow2.f32 %v3521_v35 }
 0x20f   : > { %v4284_v58 = vpop.eup %4283  ;;  %4303 = vtanh.f32 %v1333_v24 }
 0x210   : > { %v4286_v10 = vpop.eup %4285  ;;  %4305 = vrcp.f32 %v1175_v42 }
 0x211   : > { %v4288_v18 = vpop.eup %4287  ;;  %v1176_v17 = vadd.f32 1.0, %v4286_v10  ;;  %4307 = vpow2.f32 %v3536_v0 }
 0x212   : > { %v4290_v48 = vpop.eup %4289  ;;  %4309 = vtanh.f32 %v5714_v22 }
 0x213   : > { %v4292_v63 = vpop.eup %4291  ;;  %4311 = vrcp.f32 %v1176_v17  ;;  %v1362_v40 = vmul.f32 %v4290_v48, %v4282_v15 }
 0x214   : > { %v4294_v33 = vpop.eup %4293  ;;  %4313 = vpow2.f32 %v3534_v21  ;;  %v1364_v56 = vmul.f32 %v4292_v63, %v4284_v58 }
 0x215   : > { %v4296_v4 = vpop.eup %4295  ;;  %4315 = vpow2.f32 %v3537_v41 }
 0x216   : > { %v4298_v7 = vpop.eup %4297  ;;  %4317 = vpow2.f32 %v3535_v30  ;;  %v1363_v26 = vmul.f32 %v4296_v4, %v4288_v18  ;;  %v4051_v4 = vld [vmem:[#allocation10] ss:$16 sps:$4 sm:$0xff]  }
 0x217   : > { %v4300_v13 = vpop.eup %4299  ;;  %v1334_v28 = vmul.f32 %v4298_v7, %v4276_v12  ;;  %4319 = vtanh.f32 %v5722_v6  ;;  %v4053_v7 = vld [vmem:[#allocation10 + $0x4] ss:$16 sps:$4 sm:$0xff]  }
 0x218   : > { %v4302_v20 = vpop.eup %4301  ;;  %v1374_v39 = vpack.c.bf16 %v1363_v26, %v1362_v40  ;;  %v4054_v26 = vld [vmem:[#allocation10 + $0x8] ss:$16 sps:$4 sm:$0xff]   ;;  %2802 = vmatprep.subr.bf16.mxu1 %v4053_v7 }
 0x219   : > { %v4304_v59 = vpop.eup %4303  ;;  %v1177_v32 = vadd.f32 1.0, %v4302_v20  ;;  %2803 = vmatpush1.bf16.msra.mxu1 %v4051_v4  ;;  %v4059_v20 = vld [vmem:[#allocation10 + $0x24] ss:$16 sps:$4 sm:$0xff]   ;;  %v4111_v4 = vld [vmem:[#allocation10 + $0x140] ss:$16 sps:$4 sm:$0xff]  }
 0x21a   : > { %v4306_v22 = vpop.eup %4305  ;;  %1559 = vmatmul.mubr.bf16.gmra.mrb[64].mxu1 %v1374_v39  ;;  %v1365_v47 = vmul.f32 %v4304_v59, %v4300_v13  ;;  %v4056_v13 = vld [vmem:[#allocation10 + $0xc] ss:$16 sps:$4 sm:$0xff]   ;;  %v4060_v39 = vld [vmem:[#allocation10 + $0x28] ss:$16 sps:$4 sm:$0xff]   ;;  %2804 = vmatprep.subr.bf16.mxu1 %v4059_v20 }
 0x21b   : > { %v4308_v44 = vpop.eup %4307  ;;  %v1335_v31 = vmul.f32 %v4306_v22, %v4294_v33  ;;  %4321 = vrcp.f32 %v1177_v32  ;;  %1568 = vmatprep.mubr.bf16.mxu1 %v6394_v62  ;;  %2915 = vmatprep.subr.bf16.mxu0 %v4056_v13  ;;  %v4062_v59 = vld [vmem:[#allocation10 + $0x2c] ss:$16 sps:$4 sm:$0xff]   ;;  %v4063_v32 = vld [vmem:[#allocation10 + $0x40] ss:$16 sps:$4 sm:$0xff]   ;;  %v4066_v22 = vld [vmem:[#allocation10 + $0x48] ss:$16 sps:$4 sm:$0xff]  }
 0x21c   : > { %v4310_v53 = vpop.eup %4309  ;;  %v1288_v49 = vadd.f32 1.0, %v4308_v44  ;;  %v1375_v25 = vpack.c.bf16 %v1365_v47, %v1364_v56  ;;  %4323 = vtanh.f32 %v1334_v28  ;;  %2916 = vmatpush1.bf16.msra.mxu0 %v4054_v26  ;;  %v4057_v28 = vld [vmem:[#allocation10 + $0x20] ss:$16 sps:$4 sm:$0xff]   ;;  %v4068_v47 = vld [vmem:[#allocation10 + $0x4c] ss:$16 sps:$4 sm:$0xff]  }
 0x21d   : > { %v4312_v60 = vpop.eup %4311  ;;  %4325 = vtanh.f32 %v1335_v31  ;;  %2917 = vmatprep.subr.bf16.mxu0 %v4062_v59  ;;  %2805 = vmatpush1.bf16.msra.mxu1 %v4057_v28  ;;  %v4069_v44 = vld [vmem:[#allocation10 + $0x60] ss:$16 sps:$4 sm:$0xff]   ;;  %v4071_v31 = vld [vmem:[#allocation10 + $0x64] ss:$16 sps:$4 sm:$0xff]   ;;  %v4114_v7 = vld [vmem:[#allocation10 + $0x148] ss:$16 sps:$4 sm:$0xff]  }
 0x21e   : > { %v4314_v8 = vpop.eup %4313  ;;  %v1336_v3 = vmul.f32 %v4312_v60, %v4310_v53  ;;  %4327 = vrcp.f32 %v1288_v49  ;;  %v4072_v53 = vld [vmem:[#allocation10 + $0x68] ss:$16 sps:$4 sm:$0xff]   ;;  %v4074_v49 = vld [vmem:[#allocation10 + $0x6c] ss:$16 sps:$4 sm:$0xff]   ;;  %v4077_v60 = vld [vmem:[#allocation10 + $0x84] ss:$16 sps:$4 sm:$0xff]  }
 0x21f   : > { %v4316_v11 = vpop.eup %4315  ;;  %v1286_v35 = vadd.f32 1.0, %v4314_v8  ;;  %v4078_v8 = vld [vmem:[#allocation10 + $0x88] ss:$16 sps:$4 sm:$0xff]   ;;  %v4119_v26 = vld [vmem:[#allocation10 + $0x164] ss:$16 sps:$4 sm:$0xff]  }
 0x220   : > { %v4318_v12 = vpop.eup %4317  ;;  %4329 = vtanh.f32 %v1336_v3  ;;  %v1289_v55 = vadd.f32 1.0, %v4316_v11  ;;  %2918 = vmatpush1.bf16.msra.mxu0 %v4060_v39  ;;  %v4080_v3 = vld [vmem:[#allocation10 + $0x8c] ss:$16 sps:$4 sm:$0xff]   ;;  %v4083_v11 = vld [vmem:[#allocation10 + $0xa4] ss:$16 sps:$4 sm:$0xff]  }
 0x221   : > { %4331 = vrcp.f32 %v1286_v35  ;;  %v1287_v6 = vadd.f32 1.0, %v4318_v12  ;;  %v4320_v37 = vpop.eup %4319  ;;  %2919 = vmatprep.subr.bf16.mxu0 %v4068_v47  ;;  %v4086_v35 = vld [vmem:[#allocation10 + $0xac] ss:$16 sps:$4 sm:$0xff]   ;;  %v4081_v12 = vld [vmem:[#allocation10 + $0xa0] ss:$16 sps:$4 sm:$0xff]  }
 0x222   : > { %1569 = vmatmul.mubr.bf16.gmra.mrb[68].mxu1 %v1375_v25  ;;  %v4075_v25 = vld [vmem:[#allocation10 + $0x80] ss:$16 sps:$4 sm:$0xff]   ;;  %v4122_v13 = vld [vmem:[#allocation10 + $0x16c] ss:$16 sps:$4 sm:$0xff]   ;;  %v4120_v20 = vld [vmem:[#allocation10 + $0x168] ss:$16 sps:$4 sm:$0xff]  }
 0x223   : > { %4333 = vrcp.f32 %v1287_v6  ;;  %1578 = vmatprep.mubr.bf16.mxu1 %v6394_v62  ;;  %v4084_v6 = vld [vmem:[#allocation10 + $0xa8] ss:$16 sps:$4 sm:$0xff]   ;;  %v4117_v28 = vld [vmem:[#allocation10 + $0x160] ss:$16 sps:$4 sm:$0xff]   ;;  %v4125_v39 = vld [vmem:[#allocation10 + $0x184] ss:$16 sps:$4 sm:$0xff]  }
 0x224   : > { %4335 = vrcp.f32 %v1289_v55  ;;  %2920 = vmatpush1.bf16.msra.mxu0 %v4066_v22  ;;  %v4089_v55 = vld [vmem:[#allocation10 + $0xc4] ss:$16 sps:$4 sm:$0xff]   ;;  %v4128_v59 = vld [vmem:[#allocation10 + $0x18c] ss:$16 sps:$4 sm:$0xff]  }
 0x225   : > { %v4322_v24 = vpop.eup %4321  ;;  %2921 = vmatprep.subr.bf16.mxu0 %v4074_v49  ;;  %v4131_v22 = vld [vmem:[#allocation10 + $0x1a4] ss:$16 sps:$4 sm:$0xff]   ;;  %v4134_v47 = vld [vmem:[#allocation10 + $0x1ac] ss:$16 sps:$4 sm:$0xff]  }
 0x226   : > { %v1337_v0 = vmul.f32 %v4322_v24, %v4320_v37  ;;  %v4324_v15 = vpop.eup %4323  ;;  %v4092_v37 = vld [vmem:[#allocation10 + $0xcc] ss:$16 sps:$4 sm:$0xff]   ;;  %v4087_v24 = vld [vmem:[#allocation10 + $0xc0] ss:$16 sps:$4 sm:$0xff]  }
 0x227   : > { %v4326_v42 = vpop.eup %4325  ;;  %v4140_v49 = vld [vmem:[#allocation10 + $0x1cc] ss:$16 sps:$4 sm:$0xff]  }
 0x228   : > { %4337 = vtanh.f32 %v1337_v0  ;;  %v4328_v58 = vpop.eup %4327  ;;  %2922 = vmatpush1.bf16.msra.mxu0 %v4072_v53  ;;  %v4090_v0 = vld [vmem:[#allocation10 + $0xc8] ss:$16 sps:$4 sm:$0xff]   ;;  %v4137_v53 = vld [vmem:[#allocation10 + $0x1c4] ss:$16 sps:$4 sm:$0xff]  }
 0x229   : > { %2923 = vmatprep.subr.bf16.mxu0 %v4080_v3 }
 0x22a   : > { %v4330_v10 = vpop.eup %4329 }
 0x22b   : > { %v4332_v21 = vpop.eup %4331  ;;  %v1368_v18 = vmul.f32 %v4330_v10, %v4328_v58  ;;  %v4093_v58 = vld [vmem:[#allocation10 + $0xe0] ss:$16 sps:$4 sm:$0xff]   ;;  %v4096_v10 = vld [vmem:[#allocation10 + $0xe8] ss:$16 sps:$4 sm:$0xff]  }
 0x22c   : > { %v1366_v17 = vmul.f32 %v4332_v21, %v4324_v15  ;;  %2924 = vmatpush1.bf16.msra.mxu0 %v4078_v8  ;;  %v4095_v15 = vld [vmem:[#allocation10 + $0xe4] ss:$16 sps:$4 sm:$0xff]  }
 0x22d   : > { %v4334_v41 = vpop.eup %4333  ;;  %2925 = vmatprep.subr.bf16.mxu0 %v4086_v35  ;;  %v4101_v21 = vld [vmem:[#allocation10 + $0x104] ss:$16 sps:$4 sm:$0xff]  }
 0x22e   : > { %v1367_v48 = vmul.f32 %v4334_v41, %v4326_v42  ;;  %v4336_v63 = vpop.eup %4335  ;;  %v4098_v42 = vld [vmem:[#allocation10 + $0xec] ss:$16 sps:$4 sm:$0xff]   ;;  %v4143_v35 = vld [vmem:[#allocation10 + $0x1e4] ss:$16 sps:$4 sm:$0xff]  }
 0x22f   : > { %v4104_v41 = vld [vmem:[#allocation10 + $0x10c] ss:$16 sps:$4 sm:$0xff]  }
 0x230   : > { %v1376_v30 = vpack.c.bf16 %v1367_v48, %v1366_v17  ;;  %2926 = vmatpush1.bf16.msra.mxu0 %v4084_v6  ;;  %v4102_v17 = vld [vmem:[#allocation10 + $0x108] ss:$16 sps:$4 sm:$0xff]   ;;  %v4107_v48 = vld [vmem:[#allocation10 + $0x124] ss:$16 sps:$4 sm:$0xff]  }
 0x231   : > { %2927 = vmatprep.subr.bf16.mxu0 %v4092_v37  ;;  %v4144_v37 = vld [vmem:[#allocation10 + $0x1e8] ss:$16 sps:$4 sm:$0xff]  }
 0x232   : > { %v4338_v40 = vpop.eup %4337  ;;  %1579 = vmatmul.mubr.bf16.gmra.mrb[72].mxu1 %v1376_v30  ;;  %v4110_v30 = vld [vmem:[#allocation10 + $0x12c] ss:$16 sps:$4 sm:$0xff]  }
 0x233   : > { %1588 = vmatprep.mubr.bf16.mxu1 %v6394_v62  ;;  %v1369_v33 = vmul.f32 %v4338_v40, %v4336_v63  ;;  %v4065_v62 = vld [vmem:[#allocation10 + $0x44] ss:$16 sps:$4 sm:$0xff]   ;;  %v4105_v63 = vld [vmem:[#allocation10 + $0x120] ss:$16 sps:$4 sm:$0xff]   ;;  %v4108_v40 = vld [vmem:[#allocation10 + $0x128] ss:$16 sps:$4 sm:$0xff]  }
 0x234   : > { %2806 = vmatprep.subr.bf16.mxu1 %v4065_v62  ;;  %2928 = vmatpush1.bf16.msra.mxu0 %v4090_v0  ;;  %v4126_v62 = vld [vmem:[#allocation10 + $0x188] ss:$16 sps:$4 sm:$0xff]  }
 0x235   : > { %v1377_v56 = vpack.c.bf16 %v1369_v33, %v1368_v18  ;;  %2807 = vmatpush1.bf16.msra.mxu1 %v4063_v32  ;;  %2929 = vmatprep.subr.bf16.mxu0 %v4098_v42  ;;  %v4099_v18 = vld [vmem:[#allocation10 + $0x100] ss:$16 sps:$4 sm:$0xff]   ;;  %v4113_v33 = vld [vmem:[#allocation10 + $0x144] ss:$16 sps:$4 sm:$0xff]  }
 0x236   : > { %2808 = vmatprep.subr.bf16.mxu1 %v4071_v31  ;;  %v4123_v32 = vld [vmem:[#allocation10 + $0x180] ss:$16 sps:$4 sm:$0xff]   ;;  %v4132_v31 = vld [vmem:[#allocation10 + $0x1a8] ss:$16 sps:$4 sm:$0xff]  }
 0x238   : > { %2930 = vmatpush1.bf16.msra.mxu0 %v4096_v10 }
 0x239   : > { %2809 = vmatpush1.bf16.msra.mxu1 %v4069_v44  ;;  %2931 = vmatprep.subr.bf16.mxu0 %v4104_v41  ;;  %v4129_v44 = vld [vmem:[#allocation10 + $0x1a0] ss:$16 sps:$4 sm:$0xff]  }
 0x23a   : > { %1589 = vmatmul.mubr.bf16.gmra.mrb[76].mxu1 %v1377_v56  ;;  %2810 = vmatprep.subr.bf16.mxu1 %v4077_v60  ;;  %v4116_v56 = vld [vmem:[#allocation10 + $0x14c] ss:$16 sps:$4 sm:$0xff]   ;;  %v4138_v60 = vld [vmem:[#allocation10 + $0x1c8] ss:$16 sps:$4 sm:$0xff]  }
 0x23c   : > { %2932 = vmatpush1.bf16.msra.mxu0 %v4102_v17  ;;  %v1839_v17 = vld [vmem:[%s6291_s6] sm:$0x3] }
 0x23d   : > { %2811 = vmatpush1.bf16.msra.mxu1 %v4075_v25  ;;  %2933 = vmatprep.subr.bf16.mxu0 %v4110_v30  ;;  %v4135_v25 = vld [vmem:[#allocation10 + $0x1c0] ss:$16 sps:$4 sm:$0xff]   ;;  %v5749_v41 = vrot.slane %v1839_v17, %v5347_v36  ;;  %v5752_v30 = vrot.slane %v1839_v17, %v5355_v38 }
 0x23e   : > { %2812 = vmatprep.subr.bf16.mxu1 %v4083_v11 }
 0x240   : > { %2934 = vmatpush1.bf16.msra.mxu0 %v4108_v40 }
 0x241   : > { %2813 = vmatpush1.bf16.msra.mxu1 %v4081_v12  ;;  %2935 = vmatprep.subr.bf16.mxu0 %v4116_v56  ;;  %v4146_v12 = vld [vmem:[#allocation10 + $0x1ec] ss:$16 sps:$4 sm:$0xff]  }
 0x242   : > { %2814 = vmatprep.subr.bf16.mxu1 %v4089_v55  ;;  %v4141_v55 = vld [vmem:[#allocation10 + $0x1e0] ss:$16 sps:$4 sm:$0xff]  }
 0x244   : > { %2936 = vmatpush1.bf16.msra.mxu0 %v4114_v7 }
 0x245   : > { %2815 = vmatpush1.bf16.msra.mxu1 %v4087_v24  ;;  %2937 = vmatprep.subr.bf16.mxu0 %v4122_v13 }
 0x246   : > { %2816 = vmatprep.subr.bf16.mxu1 %v4095_v15 }
 0x248   : > { %2938 = vmatpush1.bf16.msra.mxu0 %v4120_v20 }
 0x249   : > { %2817 = vmatpush1.bf16.msra.mxu1 %v4093_v58  ;;  %2939 = vmatprep.subr.bf16.mxu0 %v4128_v59 }
 0x24a   : > { %2818 = vmatprep.subr.bf16.mxu1 %v4101_v21 }
 0x24c   : > { %2940 = vmatpush1.bf16.msra.mxu0 %v4126_v62 }
 0x24d   : > { %2819 = vmatpush1.bf16.msra.mxu1 %v4099_v18  ;;  %2941 = vmatprep.subr.bf16.mxu0 %v4134_v47 }
 0x24e   : > { %2820 = vmatprep.subr.bf16.mxu1 %v4107_v48 }
 0x250   : > { %2942 = vmatpush1.bf16.msra.mxu0 %v4132_v31 }
 0x251   : > { %2821 = vmatpush1.bf16.msra.mxu1 %v4105_v63  ;;  %2943 = vmatprep.subr.bf16.mxu0 %v4140_v49 }
 0x252   : > { %2822 = vmatprep.subr.bf16.mxu1 %v4113_v33 }
 0x254   : > { %2944 = vmatpush1.bf16.msra.mxu0 %v4138_v60 }
 0x255   : > { %2823 = vmatpush1.bf16.msra.mxu1 %v4111_v4  ;;  %2945 = vmatprep.subr.bf16.mxu0 %v4146_v12 }
 0x256   : > { %2824 = vmatprep.subr.bf16.mxu1 %v4119_v26 }
 0x258   : > { %2946 = vmatpush1.bf16.msra.mxu0 %v4144_v37 }
 0x259   : > { %2825 = vmatpush1.bf16.msra.mxu1 %v4117_v28 }
 0x25a   : > { %2826 = vmatprep.subr.bf16.mxu1 %v4125_v39 }
 0x25d   : > { %2827 = vmatpush1.bf16.msra.mxu1 %v4123_v32 }
 0x25e   : > { %2828 = vmatprep.subr.bf16.mxu1 %v4131_v22 }
 0x261   : > { %2829 = vmatpush1.bf16.msra.mxu1 %v4129_v44 }
 0x262   : > { %2830 = vmatprep.subr.bf16.mxu1 %v4137_v53 }
 0x265   : > { %2831 = vmatpush1.bf16.msra.mxu1 %v4135_v25 }
 0x266   : > { %2832 = vmatprep.subr.bf16.mxu1 %v4143_v35 }
 0x269   : > { %2833 = vmatpush1.bf16.msra.mxu1 %v4141_v55 }
 0x276   : > { %v2045_v8 = vpop.f32.mrb[32].mxu0 }
 0x277   : > { %v2047_v3 = vpop.f32.mrb[33].mxu0  ;;  %v2046_v56 = vadd.f32 %v2045_v8, %v5749_v41 }
 0x278   : > { %v2049_v11 = vpop.f32.mrb[34].mxu0  ;;  %v2048_v4 = vadd.f32 %v2047_v3, %v5752_v30 }
 0x279   : > { %v2051_v6 = vpop.f32.mrb[35].mxu0  ;;  %v2050_v7 = vadd.f32 %v2049_v11, %v5749_v41  ;;  %v3618_v26 = vmul.f32 -1.442695, %v2046_v56 }
 0x27a   : > { %v2052_v13 = vadd.f32 %v2051_v6, %v5752_v30  ;;  %v3619_v20 = vmul.f32 -1.442695, %v2048_v4 }
 0x27b   : > { %v3620_v32 = vmul.f32 -1.442695, %v2050_v7  ;;  %4339 = vpow2.f32 %v3618_v26 }
 0x27c   : > { %v3621_v44 = vmul.f32 -1.442695, %v2052_v13  ;;  %4341 = vpow2.f32 %v3619_v20 }
 0x27d   : > { %4343 = vpow2.f32 %v3620_v32 }
 0x27e   : > { %v2055_v24 = vpop.f32.mrb[36].mxu0  ;;  %4345 = vpow2.f32 %v3621_v44 }
 0x27f   : > { %v2057_v0 = vpop.f32.mrb[37].mxu0  ;;  %v2056_v39 = vadd.f32 %v2055_v24, %v5749_v41 }
 0x280   : > { %v2059_v15 = vpop.f32.mrb[38].mxu0  ;;  %v2058_v62 = vadd.f32 %v2057_v0, %v5752_v30 }
 0x281   : > { %v2061_v42 = vpop.f32.mrb[39].mxu0  ;;  %v3622_v31 = vmul.f32 -1.442695, %v2056_v39  ;;  %v2060_v49 = vadd.f32 %v2059_v15, %v5749_v41 }
 0x282   : > { %v3623_v53 = vmul.f32 -1.442695, %v2058_v62  ;;  %v2062_v25 = vadd.f32 %v2061_v42, %v5752_v30 }
 0x283   : > { %4347 = vpow2.f32 %v3622_v31  ;;  %v3624_v35 = vmul.f32 -1.442695, %v2060_v49 }
 0x284   : > { %4349 = vpow2.f32 %v3623_v53  ;;  %v3625_v55 = vmul.f32 -1.442695, %v2062_v25 }
 0x285   : > { %v4340_v42 = vpop.eup %4339  ;;  %4351 = vpow2.f32 %v3624_v35 }
 0x286   : > { %v2065_v58 = vpop.f32.mrb[40].mxu0  ;;  %v4342_v17 = vpop.eup %4341  ;;  %4353 = vpow2.f32 %v3625_v55  ;;  %v2220_v7 = vadd.f32 1.0, %v4340_v42 }
 0x287   : > { %v2067_v10 = vpop.f32.mrb[41].mxu0  ;;  %v2066_v60 = vadd.f32 %v2065_v58, %v5749_v41  ;;  %v4344_v56 = vpop.eup %4343  ;;  %v2221_v20 = vadd.f32 1.0, %v4342_v17 }
 0x288   : > { %v2069_v21 = vpop.f32.mrb[42].mxu0  ;;  %v2068_v3 = vadd.f32 %v2067_v10, %v5752_v30  ;;  %v4346_v13 = vpop.eup %4345  ;;  %v2222_v44 = vadd.f32 1.0, %v4344_v56 }
 0x289   : > { %v2071_v18 = vpop.f32.mrb[43].mxu0  ;;  %v2070_v12 = vadd.f32 %v2069_v21, %v5749_v41  ;;  %v3626_v0 = vmul.f32 -1.442695, %v2066_v60 }
 0x28a   : > { %v2072_v37 = vadd.f32 %v2071_v18, %v5752_v30  ;;  %v3627_v15 = vmul.f32 -1.442695, %v2068_v3  ;;  %v2223_v3 = vadd.f32 1.0, %v4346_v13 }
 0x28b   : > { %v3628_v58 = vmul.f32 -1.442695, %v2070_v12  ;;  %4355 = vpow2.f32 %v3626_v0 }
 0x28c   : > { %v3629_v10 = vmul.f32 -1.442695, %v2072_v37  ;;  %4357 = vpow2.f32 %v3627_v15 }
 0x28d   : > { %4359 = vpow2.f32 %v3628_v58  ;;  %v4348_v62 = vpop.eup %4347 }
 0x28e   : > { %v2075_v48 = vpop.f32.mrb[44].mxu0  ;;  %4361 = vpow2.f32 %v3629_v10  ;;  %v4350_v53 = vpop.eup %4349  ;;  %v2224_v12 = vadd.f32 1.0, %v4348_v62 }
 0x28f   : > { %v5754_v63 = vpop.f32.mrb[45].mxu0  ;;  %v2076_v4 = vadd.f32 %v2075_v48, %v5749_v41  ;;  %4363 = vrcp.f32 %v2220_v7  ;;  %v2225_v37 = vadd.f32 1.0, %v4350_v53  ;;  %v4352_v0 = vpop.eup %4351 }
 0x290   : > { %v5756_v40 = vpop.f32.mrb[46].mxu0  ;;  %v2078_v25 = vadd.f32 %v5754_v63, %v5752_v30  ;;  %4365 = vrcp.f32 %v2221_v20  ;;  %v4354_v63 = vpop.eup %4353  ;;  %v2226_v7 = vadd.f32 1.0, %v4352_v0 }
 0x291   : > { %v5758_v33 = vpop.f32.mrb[47].mxu0  ;;  %v3630_v49 = vmul.f32 -1.442695, %v2076_v4  ;;  %v2080_v35 = vadd.f32 %v5756_v40, %v5749_v41  ;;  %4367 = vrcp.f32 %v2222_v44 }
 0x292   : > { %v2082_v55 = vadd.f32 %v5758_v33, %v5752_v30  ;;  %v3631_v15 = vmul.f32 -1.442695, %v2078_v25 }
 0x293   : > { %4369 = vpow2.f32 %v3630_v49  ;;  %v3632_v58 = vmul.f32 -1.442695, %v2080_v35 }
 0x294   : > { %4371 = vrcp.f32 %v2223_v3  ;;  %v3633_v40 = vmul.f32 -1.442695, %v2082_v55  ;;  %v1394_v55 = vld [vmem:[%s6289_s4] sm:$0x3] }
 0x295   : > { %v4356_v56 = vpop.eup %4355  ;;  %4373 = vrcp.f32 %v2224_v12 }
 0x296   : > { %v5764_v28 = vpop.f32.mrb[48].mxu0  ;;  %4375 = vrcp.f32 %v2225_v37 }
 0x297   : > { %v5767_v59 = vpop.f32.mrb[49].mxu0  ;;  %4377 = vpow2.f32 %v3631_v15  ;;  %v2086_v53 = vadd.f32 %v5764_v28, %v5749_v41 }
 0x298   : > { %v5770_v22 = vpop.f32.mrb[50].mxu0  ;;  %4379 = vpow2.f32 %v3632_v58  ;;  %v2088_v25 = vadd.f32 %v5767_v59, %v5752_v30 }
 0x299   : > { %v5772_v47 = vpop.f32.mrb[51].mxu0  ;;  %4381 = vpow2.f32 %v3633_v40  ;;  %v2090_v12 = vadd.f32 %v5770_v22, %v5749_v41  ;;  %v3634_v59 = vmul.f32 -1.442695, %v2086_v53  ;;  %v5837_v22 = vrot.slane %v1394_v55, %v5347_v36 }
 0x29a   : > { %4383 = vrcp.f32 %v2226_v7  ;;  %v2092_v0 = vadd.f32 %v5772_v47, %v5752_v30 }
 0x29c   : > { %v3637_v47 = vmul.f32 -1.442695, %v2092_v0 }
 0x29e   : > { %v5777_v8 = vpop.f32.mrb[52].mxu0 }
 0x29f   : > { %v5780_v11 = vpop.f32.mrb[53].mxu0 }
 0x2a0   : > { %v5783_v6 = vpop.f32.mrb[54].mxu0 }
 0x2a1   : > { %v5786_v24 = vpop.f32.mrb[55].mxu0 }
 0x2a6   : > { %v2105_v21 = vpop.f32.mrb[56].mxu0 }
 0x2a7   : > { %v5790_v26 = vadd.f32 %v2105_v21, %v5749_v41  ;;  %v2107_v18 = vpop.f32.mrb[57].mxu0  ;;  %v4358_v21 = vpop.eup %4357 }
 0x2a8   : > { %v5793_v39 = vadd.f32 %v2107_v18, %v5752_v30  ;;  %v2109_v32 = vpop.f32.mrb[58].mxu0  ;;  %v4360_v20 = vpop.eup %4359  ;;  %v2229_v49 = vadd.f32 1.0, %v4358_v21 }
 0x2a9   : > { %v5796_v31 = vadd.f32 %v2109_v32, %v5749_v41  ;;  %v2111_v48 = vpop.f32.mrb[59].mxu0  ;;  %v2227_v32 = vadd.f32 1.0, %v4354_v63  ;;  %v4362_v44 = vpop.eup %4361  ;;  %v2230_v35 = vadd.f32 1.0, %v4360_v20  ;;  %v3635_v63 = vmul.f32 -1.442695, %v2088_v25 }
 0x2aa   : > { %v5801_v60 = vadd.f32 %v2111_v48, %v5752_v30  ;;  %v2228_v48 = vadd.f32 1.0, %v4356_v56  ;;  %v5823_v3 = vpop.eup %4363  ;;  %v2231_v28 = vadd.f32 1.0, %v4362_v44  ;;  %v5842_v56 = vrot.slane %v1394_v55, %v5355_v38 }
 0x2ab   : > { %v5830_v37 = vpop.eup %4365  ;;  %4385 = vrcp.f32 %v2227_v32  ;;  %v2096_v25 = vadd.f32 %v5777_v8, %v5749_v41 }
 0x2ac   : > { %v5834_v15 = vpop.eup %4367  ;;  %4387 = vrcp.f32 %v2228_v48 }
 0x2ad   : > { %4389 = vrcp.f32 %v2229_v49 }
 0x2ae   : > { %v2115_v42 = vpop.f32.mrb[60].mxu0  ;;  %4391 = vrcp.f32 %v2230_v35 }
 0x2af   : > { %v5808_v17 = vadd.f32 %v2115_v42, %v5749_v41  ;;  %v2117_v10 = vpop.f32.mrb[61].mxu0  ;;  %v4370_v42 = vpop.eup %4369  ;;  %4393 = vrcp.f32 %v2231_v28 }
 0x2b0   : > { %v5811_v4 = vadd.f32 %v2117_v10, %v5752_v30  ;;  %v2119_v33 = vpop.f32.mrb[62].mxu0  ;;  %v5839_v58 = vpop.eup %4371  ;;  %v3636_v10 = vmul.f32 -1.442695, %v2090_v12  ;;  %v2232_v21 = vadd.f32 1.0, %v4370_v42  ;;  %4395 = vpow2.f32 %v3634_v59 }
 0x2b1   : > { %v5814_v18 = vadd.f32 %v2119_v33, %v5749_v41  ;;  %v2121_v13 = vpop.f32.mrb[63].mxu0  ;;  %v5844_v40 = vpop.eup %4373  ;;  %4397 = vpow2.f32 %v3635_v63 }
 0x2b2   : > { %v5817_v62 = vadd.f32 %v2121_v13, %v5752_v30  ;;  %v5846_v33 = vpop.eup %4375  ;;  %4399 = vpow2.f32 %v3636_v10 }
 0x2b3   : > { %v4378_v13 = vpop.eup %4377  ;;  %4401 = vpow2.f32 %v3637_v47 }
 0x2b4   : > { %v4380_v44 = vpop.eup %4379  ;;  %4403 = vrcp.f32 %v2232_v21  ;;  %v2233_v0 = vadd.f32 1.0, %v4378_v13 }
 0x2b5   : > { %v4382_v49 = vpop.eup %4381  ;;  %v2234_v10 = vadd.f32 1.0, %v4380_v44  ;;  %v2098_v44 = vadd.f32 %v5780_v11, %v5752_v30 }
 0x2b6   : > { %v5853_v28 = vpop.eup %4383 }
 0x2b7   : > { %v5856_v63 = vpop.eup %4385 }
 0x2b8   : > { %v5858_v47 = vpop.eup %4387 }
 0x2b9   : > { %v5860_v8 = vpop.eup %4389 }
 0x2bc   : > { %v1520_v7 = vpop.f32.mrb[48].mxu1 }
 0x2bd   : > { %v1521_v20 = vadd.f32 %v1520_v7, %v5837_v22  ;;  %v1522_v32 = vpop.f32.mrb[49].mxu1 }
 0x2be   : > { %v1523_v48 = vadd.f32 %v1522_v32, %v5842_v56  ;;  %v1524_v53 = vpop.f32.mrb[50].mxu1  ;;  %v2235_v32 = vadd.f32 1.0, %v4382_v49 }
 0x2bf   : > { %v3554_v35 = vmul.f32 -1.442695, %v1521_v20  ;;  %v1525_v12 = vadd.f32 %v1524_v53, %v5837_v22  ;;  %v1526_v55 = vpop.f32.mrb[51].mxu1  ;;  %v3638_v20 = vmul.f32 -1.442695, %v2096_v25  ;;  %v5862_v53 = vpop.eup %4391 }
 0x2c0   : > { %v3555_v59 = vmul.f32 -1.442695, %v1523_v48  ;;  %v1527_v42 = vadd.f32 %v1526_v55, %v5842_v56  ;;  %v5864_v48 = vpop.eup %4393 }
 0x2c1   : > { %4405 = vpow2.f32 %v3554_v35  ;;  %v3556_v7 = vmul.f32 -1.442695, %v1525_v12  ;;  %v4396_v49 = vpop.eup %4395 }
 0x2c2   : > { %4407 = vpow2.f32 %v3555_v59  ;;  %v3557_v21 = vmul.f32 -1.442695, %v1527_v42  ;;  %v4398_v59 = vpop.eup %4397 }
 0x2c3   : > { %4409 = vpow2.f32 %v3556_v7  ;;  %v5871_v36 = vpop.eup %4399 }
 0x2c4   : > { %4411 = vrcp.f32 %v2233_v0  ;;  %v1530_v13 = vpop.f32.mrb[52].mxu1  ;;  %v5874_v38 = vpop.eup %4401 }
 0x2c5   : > { %4413 = vrcp.f32 %v2234_v10  ;;  %v1531_v35 = vadd.f32 %v1530_v13, %v5837_v22  ;;  %v1532_v12 = vpop.f32.mrb[53].mxu1  ;;  %v3639_v13 = vmul.f32 -1.442695, %v2098_v44  ;;  %v5878_v51 = vpop.eup %4403 }
 0x2c6   : > { %4415 = vrcp.f32 %v2235_v32  ;;  %v1533_v55 = vadd.f32 %v1532_v12, %v5842_v56  ;;  %v1534_v25 = vpop.f32.mrb[54].mxu1  ;;  %v2100_v32 = vadd.f32 %v5783_v6, %v5749_v41 }
 0x2c7   : > { %4417 = vpow2.f32 %v3638_v20  ;;  %v3558_v7 = vmul.f32 -1.442695, %v1531_v35  ;;  %v1535_v0 = vadd.f32 %v1534_v25, %v5837_v22  ;;  %v1536_v42 = vpop.f32.mrb[55].mxu1  ;;  %v2102_v20 = vadd.f32 %v5786_v24, %v5752_v30 }
 0x2c8   : > { %4419 = vpow2.f32 %v3557_v21  ;;  %v3559_v10 = vmul.f32 -1.442695, %v1533_v55  ;;  %v1537_v11 = vadd.f32 %v1536_v42, %v5842_v56  ;;  %v3640_v44 = vmul.f32 -1.442695, %v2100_v32 }
 0x2c9   : > { %4421 = vpow2.f32 %v3558_v7  ;;  %v3560_v12 = vmul.f32 -1.442695, %v1535_v0  ;;  %v3641_v41 = vmul.f32 -1.442695, %v2102_v20  ;;  %v2236_v0 = vadd.f32 1.0, %v4396_v49 }
 0x2ca   : > { %4423 = vpow2.f32 %v3559_v10  ;;  %v3561_v35 = vmul.f32 -1.442695, %v1537_v11  ;;  %v2237_v24 = vadd.f32 1.0, %v4398_v59 }
 0x2cb   : > { %v4406_v25 = vpop.eup %4405  ;;  %4425 = vpow2.f32 %v3560_v12 }
 0x2cc   : > { %v4408_v21 = vpop.eup %4407  ;;  %v1695_v55 = vadd.f32 1.0, %v4406_v25  ;;  %4427 = vpow2.f32 %v3561_v35 }
 0x2cd   : > { %v4410_v42 = vpop.eup %4409  ;;  %4429 = vpow2.f32 %v3639_v13  ;;  %v1696_v52 = vadd.f32 1.0, %v4408_v21 }
 0x2ce   : > { %v5882_v45 = vpop.eup %4411  ;;  %4431 = vrcp.f32 %v1695_v55  ;;  %v1697_v6 = vadd.f32 1.0, %v4410_v42 }
 0x2cf   : > { %v5884_v7 = vpop.eup %4413  ;;  %4433 = vrcp.f32 %v1696_v52 }
 0x2d0   : > { %v5886_v30 = vpop.eup %4415  ;;  %4435 = vrcp.f32 %v1697_v6 }
 0x2d1   : > { %v5888_v10 = vpop.eup %4417  ;;  %4437 = vpow2.f32 %v3640_v44 }
 0x2d2   : > { %v4420_v11 = vpop.eup %4419  ;;  %4439 = vpow2.f32 %v3641_v41 }
 0x2d3   : > { %v4422_v13 = vpop.eup %4421  ;;  %4441 = vrcp.f32 %v2236_v0  ;;  %v1698_v32 = vadd.f32 1.0, %v4420_v11 }
 0x2d4   : > { %v4424_v12 = vpop.eup %4423  ;;  %4443 = vrcp.f32 %v2237_v24  ;;  %v1699_v20 = vadd.f32 1.0, %v4422_v13 }
 0x2d5   : > { %v4426_v35 = vpop.eup %4425  ;;  %4445 = vrcp.f32 %v1698_v32  ;;  %v1700_v25 = vadd.f32 1.0, %v4424_v12  ;;  %v1540_v49 = vpop.f32.mrb[56].mxu1 }
 0x2d6   : > { %v4428_v52 = vpop.eup %4427  ;;  %4447 = vrcp.f32 %v1699_v20  ;;  %v1701_v21 = vadd.f32 1.0, %v4426_v35  ;;  %v1541_v59 = vadd.f32 %v1540_v49, %v5837_v22  ;;  %v1542_v55 = vpop.f32.mrb[57].mxu1 }
 0x2d7   : > { %v5891_v42 = vpop.eup %4429  ;;  %4449 = vrcp.f32 %v1700_v25  ;;  %v1702_v44 = vadd.f32 1.0, %v4428_v52  ;;  %v1543_v41 = vadd.f32 %v1542_v55, %v5842_v56  ;;  %v1544_v6 = vpop.f32.mrb[58].mxu1  ;;  %v2238_v25 = vadd.f32 1.0, %v5871_v36 }
 0x2d8   : > { %v4432_v0 = vpop.eup %4431  ;;  %4451 = vrcp.f32 %v1701_v21  ;;  %v3562_v24 = vmul.f32 -1.442695, %v1541_v59  ;;  %v1545_v11 = vadd.f32 %v1544_v6, %v5837_v22  ;;  %v1546_v13 = vpop.f32.mrb[59].mxu1  ;;  %v2239_v21 = vadd.f32 1.0, %v5874_v38 }
 0x2d9   : > { %v4434_v32 = vpop.eup %4433  ;;  %v2316_v12 = vadd.f32 %v4432_v0, %v5823_v3  ;;  %4453 = vrcp.f32 %v1702_v44  ;;  %v3563_v20 = vmul.f32 -1.442695, %v1543_v41  ;;  %v1547_v35 = vadd.f32 %v1546_v13, %v5842_v56 }
 0x2da   : > { %v4436_v49 = vpop.eup %4435  ;;  %4455 = vpow2.f32 %v3562_v24  ;;  %v3564_v52 = vmul.f32 -1.442695, %v1545_v11  ;;  %v2317_v55 = vadd.f32 %v4434_v32, %v5830_v37  ;;  %v3642_v44 = vmul.f32 -1.442695, %v5790_v26 }
 0x2db   : > { %v5899_v29 = vpop.eup %4437  ;;  %v2318_v59 = vadd.f32 %v4436_v49, %v5834_v15  ;;  %4457 = vpow2.f32 %v3563_v20  ;;  %v3565_v6 = vmul.f32 -1.442695, %v1547_v35  ;;  %v6395_v0 = vmax.f32 %v5368_v43, 0.0 }
 0x2dc   : > { %v5903_v3 = vpop.eup %4439  ;;  %4459 = vpow2.f32 %v3564_v52  ;;  %v6396_v24 = vmax.f32 %v5379_v50, 0.0  ;;  %v3643_v26 = vmul.f32 -1.442695, %v5793_v39 }
 0x2dd   : > { %v5906_v41 = vpop.eup %4441  ;;  %4461 = vpow2.f32 %v3565_v6  ;;  %v1550_v36 = vpop.f32.mrb[60].mxu1  ;;  %v2348_v37 = vmul.f32 %v2316_v12, %v6395_v0 }
 0x2de   : > { %v2350_v11 = vmul.f32 %v2318_v59, %v6396_v24  ;;  %v5912_v38 = vpop.eup %4443  ;;  %4463 = vrcp.f32 %v2238_v25  ;;  %v1551_v15 = vadd.f32 %v1550_v36, %v5837_v22  ;;  %v1552_v13 = vpop.f32.mrb[61].mxu1 }
 0x2df   : > { %v4446_v32 = vpop.eup %4445  ;;  %4465 = vrcp.f32 %v2239_v21  ;;  %v1553_v20 = vadd.f32 %v1552_v13, %v5842_v56  ;;  %v1554_v35 = vpop.f32.mrb[62].mxu1  ;;  %v6397_v21 = vmax.f32 %v5373_v46, 0.0 }
 0x2e0   : > { %v2380_v49 = vpack.c.bf16 %v2350_v11, %v2348_v37  ;;  %v4448_v52 = vpop.eup %4447  ;;  %4467 = vpow2.f32 %v3642_v44  ;;  %v3566_v43 = vmul.f32 -1.442695, %v1551_v15  ;;  %v1555_v50 = vadd.f32 %v1554_v35, %v5837_v22  ;;  %v1556_v12 = vpop.f32.mrb[63].mxu1 }
 0x2e1   : > { %v2319_v59 = vadd.f32 %v4446_v32, %v5839_v58  ;;  %v4450_v25 = vpop.eup %4449  ;;  %v3567_v6 = vmul.f32 -1.442695, %v1553_v20  ;;  %v1557_v36 = vadd.f32 %v1556_v12, %v5842_v56  ;;  %v2349_v0 = vmul.f32 %v2317_v55, %v6397_v21 }
 0x2e2   : > { %v2320_v39 = vadd.f32 %v4448_v52, %v5844_v40  ;;  %v4452_v24 = vpop.eup %4451  ;;  %4469 = vpow2.f32 %v3566_v43  ;;  %v3568_v37 = vmul.f32 -1.442695, %v1555_v50  ;;  %v6398_v44 = vmax.f32 %v5383_v54, 0.0 }
 0x2e3   : > { %v2321_v15 = vadd.f32 %v4450_v25, %v5846_v33  ;;  %v4454_v13 = vpop.eup %4453  ;;  %4471 = vpow2.f32 %v3567_v6  ;;  %v3569_v58 = vmul.f32 -1.442695, %v1557_v36  ;;  %v2322_v32 = vadd.f32 %v4452_v24, %v5853_v28 }
 0x2e4   : > { %v2351_v11 = vmul.f32 %v2319_v59, %v6398_v44  ;;  %v4456_v20 = vpop.eup %4455  ;;  %4473 = vpow2.f32 %v3568_v37  ;;  %v2323_v46 = vadd.f32 %v4454_v13, %v5856_v63  ;;  %v6399_v52 = vmax.f32 %v5398_v61, 0.0 }
 0x2e5   : > { %v4458_v55 = vpop.eup %4457  ;;  %v1703_v40 = vadd.f32 1.0, %v4456_v20  ;;  %4475 = vpow2.f32 %v3569_v58  ;;  %v6400_v54 = vmax.f32 %v5409_v5, 0.0  ;;  %v6401_v28 = vmax.f32 %v5403_v1, 0.0 }
 0x2e6   : > { %v2381_v35 = vpack.c.bf16 %v2351_v11, %v2349_v0  ;;  %v2352_v43 = vmul.f32 %v2320_v39, %v6399_v52  ;;  %v4460_v33 = vpop.eup %4459  ;;  %4477 = vpow2.f32 %v3643_v26  ;;  %v1704_v12 = vadd.f32 1.0, %v4458_v55 }
 0x2e7   : > { %v2354_v50 = vmul.f32 %v2322_v32, %v6400_v54  ;;  %v2353_v59 = vmul.f32 %v2321_v15, %v6401_v28  ;;  %v6402_v25 = vmax.f32 %v5413_v9, 0.0  ;;  %v4462_v6 = vpop.eup %4461  ;;  %v3644_v36 = vmul.f32 -1.442695, %v5796_v31 }
 0x2e8   : > { %2834 = vmatprep.mubr.bf16.mxu1 %v2381_v35  ;;  %2947 = vmatprep.mubr.bf16.mxu0 %v2381_v35  ;;  %4479 = vrcp.f32 %v1703_v40  ;;  %v1705_v61 = vadd.f32 1.0, %v4460_v33  ;;  %v5937_v21 = vpop.eup %4463  ;;  %v3645_v26 = vmul.f32 -1.442695, %v5801_v60  ;;  %v1706_v0 = vadd.f32 1.0, %v4462_v6 }
 0x2e9   : > { %v2355_v63 = vmul.f32 %v2323_v46, %v6402_v25  ;;  %2835 = vmatmul.mubr.bf16.vlgmr.msra.gmra.mrb[80].mxu1 %v2380_v49  ;;  %2948 = vmatmul.mubr.bf16.vlgmr.msra.gmra.mrb[64].mxu0 %v2380_v49  ;;  %v2382_v5 = vpack.c.bf16 %v2354_v50, %v2352_v43  ;;  %4481 = vrcp.f32 %v1704_v12  ;;  %v5940_v1 = vpop.eup %4465  ;;  %v2240_v9 = vadd.f32 1.0, %v5888_v10 }
 0x2ea   : > { %4483 = vrcp.f32 %v1705_v61  ;;  %v5943_v24 = vpop.eup %4467  ;;  %v2241_v31 = vadd.f32 1.0, %v5891_v42  ;;  %v2242_v25 = vadd.f32 1.0, %v5899_v29  ;;  %v2243_v61 = vadd.f32 1.0, %v5903_v3 }
 0x2eb   : > { %v2383_v39 = vpack.c.bf16 %v2355_v63, %v2353_v59  ;;  %4485 = vrcp.f32 %v1706_v0  ;;  %v3646_v0 = vmul.f32 -1.442695, %v5808_v17 }
 0x2ec   : > { %4487 = vpow2.f32 %v3644_v36  ;;  %v4470_v49 = vpop.eup %4469 }
 0x2ed   : > { %2844 = vmatprep.mubr.bf16.mxu1 %v2383_v39  ;;  %2957 = vmatprep.mubr.bf16.mxu0 %v2383_v39  ;;  %4489 = vpow2.f32 %v3645_v26  ;;  %v4472_v37 = vpop.eup %4471  ;;  %v1707_v60 = vadd.f32 1.0, %v4470_v49  ;;  %v1560_v44 = vpop.f32.mrb[64].mxu1  ;;  %v6404_v49 = vmax.f32 %v5439_v23, 0.0 }
 0x2ee   : > { %4491 = vrcp.f32 %v2240_v9  ;;  %v4474_v11 = vpop.eup %4473  ;;  %v1708_v15 = vadd.f32 1.0, %v4472_v37  ;;  %v1561_v10 = vadd.f32 %v1560_v44, %v5837_v22  ;;  %v1562_v13 = vpop.f32.mrb[65].mxu1 }
 0x2ef   : > { %4493 = vrcp.f32 %v2241_v31  ;;  %v4476_v58 = vpop.eup %4475  ;;  %v1709_v32 = vadd.f32 1.0, %v4474_v11  ;;  %v1563_v42 = vadd.f32 %v1562_v13, %v5842_v56  ;;  %v1564_v20 = vpop.f32.mrb[66].mxu1  ;;  %v6403_v31 = vmax.f32 %v5428_v16, 0.0 }
 0x2f0   : > { %4495 = vrcp.f32 %v1707_v60  ;;  %v5948_v35 = vpop.eup %4477  ;;  %v1710_v46 = vadd.f32 1.0, %v4476_v58  ;;  %v3570_v55 = vmul.f32 -1.442695, %v1561_v10  ;;  %v1565_v40 = vadd.f32 %v1564_v20, %v5837_v22  ;;  %v1566_v52 = vpop.f32.mrb[67].mxu1 }
 0x2f1   : > { %2845 = vmatmul.mubr.bf16.gmra.mrb[84].mxu1 %v2382_v5  ;;  %2958 = vmatmul.mubr.bf16.gmra.mrb[68].mxu0 %v2382_v5  ;;  %4497 = vrcp.f32 %v1708_v15  ;;  %v3571_v54 = vmul.f32 -1.442695, %v1563_v42  ;;  %v1567_v50 = vadd.f32 %v1566_v52, %v5842_v56  ;;  %v6406_v11 = vmax.f32 %v5445_v27, 0.0 }
 0x2f2   : > { %v4480_v43 = vpop.eup %4479  ;;  %4499 = vrcp.f32 %v1709_v32  ;;  %v3572_v12 = vmul.f32 -1.442695, %v1565_v40 }
 0x2f3   : > { %v4482_v33 = vpop.eup %4481  ;;  %4501 = vrcp.f32 %v1710_v46  ;;  %v2324_v28 = vadd.f32 %v4480_v43, %v5858_v47  ;;  %v3573_v63 = vmul.f32 -1.442695, %v1567_v50  ;;  %v3648_v43 = vmul.f32 -1.442695, %v5814_v18 }
 0x2f4   : > { %v4484_v59 = vpop.eup %4483  ;;  %4503 = vpow2.f32 %v3570_v55  ;;  %v2325_v6 = vadd.f32 %v4482_v33, %v5860_v8  ;;  %v6407_v18 = vmax.f32 %v5460_v34, 0.0 }
 0x2f5   : > { %v4486_v36 = vpop.eup %4485  ;;  %4505 = vpow2.f32 %v3571_v54  ;;  %v2326_v5 = vadd.f32 %v4484_v59, %v5862_v53  ;;  %v1570_v39 = vpop.f32.mrb[68].mxu1  ;;  %v2356_v3 = vmul.f32 %v2324_v28, %v6403_v31 }
 0x2f6   : > { %v5957_v26 = vpop.eup %4487  ;;  %4507 = vpow2.f32 %v3572_v12  ;;  %v2327_v47 = vadd.f32 %v4486_v36, %v5864_v48  ;;  %v1571_v29 = vadd.f32 %v1570_v39, %v5837_v22  ;;  %v1572_v8 = vpop.f32.mrb[69].mxu1  ;;  %v6405_v48 = vmax.f32 %v5433_v19, 0.0 }
 0x2f7   : > { %v5961_v9 = vpop.eup %4489  ;;  %4509 = vpow2.f32 %v3573_v63  ;;  %v2358_v53 = vmul.f32 %v2326_v5, %v6404_v49  ;;  %v1573_v17 = vadd.f32 %v1572_v8, %v5842_v56  ;;  %v1574_v60 = vpop.f32.mrb[70].mxu1  ;;  %v3647_v19 = vmul.f32 -1.442695, %v5811_v4 }
 0x2f8   : > { %v5968_v37 = vpop.eup %4491  ;;  %4511 = vrcp.f32 %v2242_v25  ;;  %v2357_v44 = vmul.f32 %v2325_v6, %v6405_v48  ;;  %v2359_v15 = vmul.f32 %v2327_v47, %v6406_v11  ;;  %v3574_v16 = vmul.f32 -1.442695, %v1571_v29  ;;  %v1576_v23 = vpop.f32.mrb[71].mxu1 }
 0x2f9   : > { %v5975_v10 = vpop.eup %4493  ;;  %4513 = vrcp.f32 %v2243_v61  ;;  %v1575_v13 = vadd.f32 %v1574_v60, %v5837_v22  ;;  %v2384_v58 = vpack.c.bf16 %v2358_v53, %v2356_v3  ;;  %v3575_v42 = vmul.f32 -1.442695, %v1573_v17 }
 0x2fa   : > { %v4496_v32 = vpop.eup %4495  ;;  %4515 = vpow2.f32 %v3646_v0  ;;  %v1577_v20 = vadd.f32 %v1576_v23, %v5842_v56  ;;  %v2385_v46 = vpack.c.bf16 %v2359_v15, %v2357_v44  ;;  %v6408_v63 = vmax.f32 %v5475_v2, 0.0 }
 0x2fb   : > { %v4498_v55 = vpop.eup %4497  ;;  %4517 = vpow2.f32 %v3574_v16  ;;  %v3576_v27 = vmul.f32 -1.442695, %v1575_v13  ;;  %v2328_v40 = vadd.f32 %v4496_v32, %v5878_v51  ;;  %v6409_v61 = vmax.f32 %v5469_v57, 0.0 }
 0x2fc   : > { %v4500_v52 = vpop.eup %4499  ;;  %4519 = vpow2.f32 %v3575_v42  ;;  %v3577_v54 = vmul.f32 -1.442695, %v1577_v20  ;;  %2854 = vmatprep.mubr.bf16.mxu1 %v2385_v46  ;;  %2967 = vmatprep.mubr.bf16.mxu0 %v2385_v46  ;;  %v2329_v50 = vadd.f32 %v4498_v55, %v5882_v45  ;;  %v2244_v2 = vadd.f32 1.0, %v5943_v24 }
 0x2fd   : > { %v4502_v33 = vpop.eup %4501  ;;  %4521 = vpow2.f32 %v3576_v27  ;;  %2855 = vmatmul.mubr.bf16.gmra.mrb[88].mxu1 %v2384_v58  ;;  %2968 = vmatmul.mubr.bf16.gmra.mrb[72].mxu0 %v2384_v58  ;;  %v2330_v12 = vadd.f32 %v4500_v52, %v5884_v7  ;;  %v2360_v25 = vmul.f32 %v2328_v40, %v6407_v18  ;;  %v6410_v7 = vmax.f32 %v5485_v14, 0.0 }
 0x2fe   : > { %v4504_v4 = vpop.eup %4503  ;;  %4523 = vpow2.f32 %v3577_v54  ;;  %v2331_v28 = vadd.f32 %v4502_v33, %v5886_v30  ;;  %v2361_v5 = vmul.f32 %v2329_v50, %v6409_v61  ;;  %v3649_v30 = vmul.f32 -1.442695, %v5817_v62  ;;  %v6413_v61 = vld [vmem:[#allocation23_spill] sm:$0xff] }
 0x2ff   : > { %v4506_v51 = vpop.eup %4505  ;;  %4525 = vpow2.f32 %v3647_v19  ;;  %v1711_v59 = vadd.f32 1.0, %v4504_v4  ;;  %v2362_v6 = vmul.f32 %v2330_v12, %v6408_v63  ;;  %v2245_v57 = vadd.f32 1.0, %v5948_v35 }
 0x300   : > { %v4508_v45 = vpop.eup %4507  ;;  %4527 = vpow2.f32 %v3648_v43  ;;  %v1712_v36 = vadd.f32 1.0, %v4506_v51  ;;  %v2363_v0 = vmul.f32 %v2331_v28, %v6410_v7  ;;  %v2246_v12 = vadd.f32 1.0, %v5957_v26 }
 0x301   : > { %v4510_v39 = vpop.eup %4509  ;;  %4529 = vrcp.f32 %v1711_v59  ;;  %v1713_v47 = vadd.f32 1.0, %v4508_v45  ;;  %v2386_v29 = vpack.c.bf16 %v2362_v6, %v2360_v25  ;;  %v6411_v45 = vld [vmem:[#allocation24_spill] sm:$0xff] }
 0x302   : > { %v5994_v34 = vpop.eup %4511  ;;  %4531 = vrcp.f32 %v1712_v36  ;;  %v1714_v8 = vadd.f32 1.0, %v4510_v39  ;;  %v2387_v31 = vpack.c.bf16 %v2363_v0, %v2361_v5  ;;  %v6412_v26 = vmax.f32 %v6411_v45, 0.0 }
 0x303   : > { %v5997_v3 = vpop.eup %4513  ;;  %4533 = vrcp.f32 %v1713_v47  ;;  %v6414_v5 = vmax.f32 %v6413_v61, 0.0 }
 0x304   : > { %v6000_v14 = vpop.eup %4515  ;;  %4535 = vrcp.f32 %v1714_v8  ;;  %2864 = vmatprep.mubr.bf16.mxu1 %v2387_v31  ;;  %2977 = vmatprep.mubr.bf16.mxu0 %v2387_v31 }
 0x305   : > { %v4518_v62 = vpop.eup %4517  ;;  %4537 = vpow2.f32 %v3649_v30  ;;  %2865 = vmatmul.mubr.bf16.gmra.mrb[92].mxu1 %v2386_v29  ;;  %2978 = vmatmul.mubr.bf16.gmra.mrb[76].mxu0 %v2386_v29  ;;  %v1580_v53 = vpop.f32.mrb[72].mxu1 }
 0x306   : > { %v4520_v49 = vpop.eup %4519  ;;  %4539 = vrcp.f32 %v2244_v2  ;;  %v1715_v24 = vadd.f32 1.0, %v4518_v62  ;;  %v1581_v48 = vadd.f32 %v1580_v53, %v5837_v22  ;;  %v1582_v35 = vpop.f32.mrb[73].mxu1  ;;  %v6417_v2 = vld [vmem:[#allocation21_spill] sm:$0xff] }
 0x307   : > { %v4522_v17 = vpop.eup %4521  ;;  %4541 = vrcp.f32 %v2245_v57  ;;  %v1716_v60 = vadd.f32 1.0, %v4520_v49  ;;  %v1583_v15 = vadd.f32 %v1582_v35, %v5842_v56  ;;  %v1584_v16 = vpop.f32.mrb[74].mxu1 }
 0x308   : > { %v4524_v44 = vpop.eup %4523  ;;  %4543 = vrcp.f32 %v1715_v24  ;;  %v1717_v11 = vadd.f32 1.0, %v4522_v17  ;;  %v3578_v58 = vmul.f32 -1.442695, %v1581_v48  ;;  %v1585_v32 = vadd.f32 %v1584_v16, %v5837_v22  ;;  %v1586_v42 = vpop.f32.mrb[75].mxu1 }
 0x309   : > { %v6004_v13 = vpop.eup %4525  ;;  %4545 = vrcp.f32 %v1716_v60  ;;  %v1718_v23 = vadd.f32 1.0, %v4524_v44  ;;  %v3579_v46 = vmul.f32 -1.442695, %v1583_v15  ;;  %v1587_v55 = vadd.f32 %v1586_v42, %v5842_v56  ;;  %v6421_v42 = vld [vmem:[#allocation28_spill] sm:$0xff] }
 0x30a   : > { %v6007_v20 = vpop.eup %4527  ;;  %4547 = vrcp.f32 %v1717_v11  ;;  %v3580_v27 = vmul.f32 -1.442695, %v1585_v32  ;;  %v2248_v48 = vadd.f32 1.0, %v6000_v14  ;;  %v6419_v14 = vld [vmem:[#allocation27_spill] sm:$0xff] }
 0x30b   : > { %v4530_v19 = vpop.eup %4529  ;;  %4549 = vrcp.f32 %v1718_v23  ;;  %v3581_v52 = vmul.f32 -1.442695, %v1587_v55 }
 0x30c   : > { %v4532_v40 = vpop.eup %4531  ;;  %4551 = vpow2.f32 %v3578_v58  ;;  %v2332_v43 = vadd.f32 %v4530_v19, %v5906_v41  ;;  %v2247_v41 = vadd.f32 1.0, %v5961_v9  ;;  %v6418_v9 = vmax.f32 %v6417_v2, 0.0 }
 0x30d   : > { %v4534_v54 = vpop.eup %4533  ;;  %4553 = vpow2.f32 %v3579_v46  ;;  %v2333_v50 = vadd.f32 %v4532_v40, %v5912_v38  ;;  %v1590_v4 = vpop.f32.mrb[76].mxu1  ;;  %v6420_v58 = vmax.f32 %v6419_v14, 0.0 }
 0x30e   : > { %v4536_v33 = vpop.eup %4535  ;;  %4555 = vpow2.f32 %v3580_v27  ;;  %v2334_v28 = vadd.f32 %v4534_v54, %v5937_v21  ;;  %v1591_v59 = vadd.f32 %v1590_v4, %v5837_v22  ;;  %v1592_v18 = vpop.f32.mrb[77].mxu1  ;;  %v2364_v36 = vmul.f32 %v2332_v43, %v6412_v26  ;;  %v6423_v27 = vld [vmem:[#allocation26_spill] sm:$0xff] }
 0x30f   : > { %v4538_v51 = vpop.eup %4537  ;;  %4557 = vpow2.f32 %v3581_v52  ;;  %v2335_v25 = vadd.f32 %v4536_v33, %v5940_v1  ;;  %v1593_v38 = vadd.f32 %v1592_v18, %v5842_v56  ;;  %v1594_v6 = vpop.f32.mrb[78].mxu1  ;;  %v6415_v1 = vld [vmem:[#allocation22_spill] sm:$0xff]  ;;  %v6425_v52 = vld [vmem:[#allocation25_spill] sm:$0xff]  ;;  %v2250_v4 = vadd.f32 1.0, %v6007_v20 }
 0x310   : > { %v6016_v63 = vpop.eup %4539  ;;  %v2366_v21 = vmul.f32 %v2334_v28, %v6414_v5  ;;  %v3582_v0 = vmul.f32 -1.442695, %v1591_v59  ;;  %v1595_v39 = vadd.f32 %v1594_v6, %v5837_v22  ;;  %v1596_v30 = vpop.f32.mrb[79].mxu1  ;;  %v6416_v47 = vmax.f32 %v6415_v1, 0.0 }
 0x311   : > { %v6024_v7 = vpop.eup %4541  ;;  %v2367_v8 = vmul.f32 %v2335_v25, %v6418_v9  ;;  %4559 = vrcp.f32 %v2246_v12  ;;  %v3583_v57 = vmul.f32 -1.442695, %v1593_v38  ;;  %v1597_v62 = vadd.f32 %v1596_v30, %v5842_v56 }
 0x312   : > { %v2365_v29 = vmul.f32 %v2333_v50, %v6416_v47  ;;  %v4544_v31 = vpop.eup %4543  ;;  %v2388_v49 = vpack.c.bf16 %v2366_v21, %v2364_v36  ;;  %4561 = vpow2.f32 %v3582_v0  ;;  %v3584_v53 = vmul.f32 -1.442695, %v1595_v39 }
 0x313   : > { %v4546_v24 = vpop.eup %4545  ;;  %v2336_v60 = vadd.f32 %v4544_v31, %v5968_v37  ;;  %4563 = vpow2.f32 %v3583_v57  ;;  %v3585_v35 = vmul.f32 -1.442695, %v1597_v62  ;;  %v6426_v43 = vmax.f32 %v6425_v52, 0.0  ;;  %v6429_v62 = vld [vmem:[#allocation32_spill] sm:$0xff]  ;;  %v6441_v52 = vld [vmem:[#allocation33_spill] sm:$0xff] }
 0x314   : > { %v2389_v17 = vpack.c.bf16 %v2367_v8, %v2365_v29  ;;  %v4548_v22 = vpop.eup %4547  ;;  %v2337_v44 = vadd.f32 %v4546_v24, %v5975_v10  ;;  %4565 = vpow2.f32 %v3584_v53  ;;  %v6422_v10 = vmax.f32 %v6421_v42, 0.0  ;;  %v6427_v8 = vld [vmem:[#allocation31_spill] sm:$0xff] }
 0x315   : > { %v4550_v11 = vpop.eup %4549  ;;  %v2338_v56 = vadd.f32 %v4548_v22, %v5994_v34  ;;  %4567 = vpow2.f32 %v3585_v35  ;;  %v2368_v32 = vmul.f32 %v2336_v60, %v6420_v58  ;;  %v6424_v34 = vmax.f32 %v6423_v27, 0.0  ;;  %v6439_v27 = vld [vmem:[#allocation34_spill] sm:$0xff] }
 0x316   : > { %2874 = vmatprep.mubr.bf16.mxu1 %v2389_v17  ;;  %2987 = vmatprep.mubr.bf16.mxu0 %v2389_v17  ;;  %v4552_v15 = vpop.eup %4551  ;;  %v2339_v16 = vadd.f32 %v4550_v11, %v5997_v3  ;;  %4569 = vrcp.f32 %v2247_v41  ;;  %v2249_v3 = vadd.f32 1.0, %v6004_v13  ;;  %v2251_v18 = vadd.f32 1.0, %v4538_v51  ;;  %v6431_v17 = vld [vmem:[#allocation30_spill] sm:$0xff] }
 0x317   : > { %2875 = vmatmul.mubr.bf16.gmra.mrb[96].mxu1 %v2388_v49  ;;  %2988 = vmatmul.mubr.bf16.gmra.mrb[80].mxu0 %v2388_v49  ;;  %v4554_v37 = vpop.eup %4553  ;;  %v1719_v23 = vadd.f32 1.0, %v4552_v15  ;;  %v2370_v46 = vmul.f32 %v2338_v56, %v6422_v10  ;;  %4571 = vrcp.f32 %v2248_v48  ;;  %v2369_v40 = vmul.f32 %v2337_v44, %v6424_v34  ;;  %v6433_v48 = vld [vmem:[#allocation29_spill] sm:$0xff] }
 0x318   : > { %v4556_v55 = vpop.eup %4555  ;;  %v1720_v19 = vadd.f32 1.0, %v4554_v37  ;;  %v2371_v54 = vmul.f32 %v2339_v16, %v6426_v43  ;;  %v6428_v31 = vmax.f32 %v6427_v8, 0.0  ;;  %v6430_v49 = vmax.f32 %v6429_v62, 0.0 }
 0x319   : > { %v4558_v50 = vpop.eup %4557  ;;  %4573 = vrcp.f32 %v1719_v23  ;;  %v1721_v33 = vadd.f32 1.0, %v4556_v55  ;;  %v2390_v12 = vpack.c.bf16 %v2370_v46, %v2368_v32  ;;  %v6432_v60 = vmax.f32 %v6431_v17, 0.0  ;;  %v6435_v32 = vld [vmem:[#allocation35_spill] sm:$0xff]  ;;  %v6437_v46 = vld [vmem:[#allocation36_spill] sm:$0xff] }
 0x31a   : > { %4575 = vrcp.f32 %v1720_v19  ;;  %v1722_v28 = vadd.f32 1.0, %v4558_v50  ;;  %v2391_v59 = vpack.c.bf16 %v2371_v54, %v2369_v40  ;;  %v6436_v42 = vmax.f32 %v6435_v32, 0.0 }
 0x31b   : > { %4577 = vrcp.f32 %v1721_v33  ;;  %v4560_v25 = vpop.eup %4559  ;;  %v6438_v55 = vmax.f32 %v6437_v46, 0.0  ;;  %v6440_v34 = vmax.f32 %v6439_v27, 0.0  ;;  %v6442_v43 = vmax.f32 %v6441_v52, 0.0  ;;  %v6068_v33 = vld [vmem:[%s6443_s26] sm:$0xf] }
 0x31c   : > { %4579 = vrcp.f32 %v1722_v28  ;;  %2884 = vmatprep.mubr.bf16.mxu1 %v2391_v59  ;;  %2997 = vmatprep.mubr.bf16.mxu0 %v2391_v59  ;;  %v4562_v41 = vpop.eup %4561  ;;  %v6445_v28 = vld [vmem:[#allocation18_spill] sm:$0xff] }
 0x31d   : > { %4581 = vrcp.f32 %v2249_v3  ;;  %v4564_v38 = vpop.eup %4563  ;;  %v1723_v6 = vadd.f32 1.0, %v4562_v41  ;;  %v6446_v59 = vsub.s32 3, %v6445_v28 }
 0x31e   : > { %4583 = vrcp.f32 %v2250_v4  ;;  %v4566_v13 = vpop.eup %4565  ;;  %v1724_v45 = vadd.f32 1.0, %v4564_v38 }
 0x31f   : > { %2885 = vmatmul.mubr.bf16.gmra.mrb[100].mxu1 %v2390_v12  ;;  %2998 = vmatmul.mubr.bf16.gmra.mrb[84].mxu0 %v2390_v12  ;;  %4585 = vrcp.f32 %v2251_v18  ;;  %v4568_v20 = vpop.eup %4567  ;;  %v1725_v26 = vadd.f32 1.0, %v4566_v13  ;;  %v6444_v12 = vld [vmem:[#allocation20_spill] sm:$0xff]  ;;  %v6077_v18 = vrot.slane %v6068_v33, %v6446_v59 }
 0x320   : > { %4587 = vrcp.f32 %v1723_v6  ;;  %v4570_v36 = vpop.eup %4569  ;;  %v1726_v51 = vadd.f32 1.0, %v4568_v20  ;;  %v6072_v4 = vrot.slane %v6068_v33, %v6444_v12 }
 0x321   : > { %4589 = vrcp.f32 %v1724_v45  ;;  %v4572_v61 = vpop.eup %4571 }
 0x322   : > { %4591 = vrcp.f32 %v1725_v26 }
 0x323   : > { %v4574_v5 = vpop.eup %4573  ;;  %4593 = vrcp.f32 %v1726_v51 }
 0x324   : > { %v4576_v21 = vpop.eup %4575  ;;  %v2340_v0 = vadd.f32 %v4574_v5, %v6016_v63  ;;  %v6434_v63 = vmax.f32 %v6433_v48, 0.0 }
 0x325   : > { %v4578_v39 = vpop.eup %4577  ;;  %v2341_v30 = vadd.f32 %v4576_v21, %v6024_v7 }
 0x326   : > { %v4580_v1 = vpop.eup %4579  ;;  %v2342_v47 = vadd.f32 %v4578_v39, %v4560_v25  ;;  %v2372_v57 = vmul.f32 %v2340_v0, %v6428_v31 }
 0x327   : > { %v4582_v29 = vpop.eup %4581  ;;  %v2343_v2 = vadd.f32 %v4580_v1, %v4570_v36  ;;  %v2373_v22 = vmul.f32 %v2341_v30, %v6432_v60 }
 0x328   : > { %v4584_v9 = vpop.eup %4583  ;;  %v2374_v24 = vmul.f32 %v2342_v47, %v6430_v49 }
 0x329   : > { %v4586_v53 = vpop.eup %4585  ;;  %v2375_v35 = vmul.f32 %v2343_v2, %v6434_v63 }
 0x32a   : > { %v4588_v44 = vpop.eup %4587  ;;  %v2392_v7 = vpack.c.bf16 %v2374_v24, %v2372_v57 }
 0x32b   : > { %v4590_v11 = vpop.eup %4589  ;;  %v2393_v56 = vpack.c.bf16 %v2375_v35, %v2373_v22  ;;  %v2344_v15 = vadd.f32 %v4588_v44, %v4572_v61 }
 0x32c   : > { %v4592_v16 = vpop.eup %4591  ;;  %v2345_v37 = vadd.f32 %v4590_v11, %v4582_v29  ;;  %v6447_v29 = vsub.s32 2, %v6445_v28 }
 0x32d   : > { %v4594_v23 = vpop.eup %4593  ;;  %2894 = vmatprep.mubr.bf16.mxu1 %v2393_v56  ;;  %3007 = vmatprep.mubr.bf16.mxu0 %v2393_v56  ;;  %v2346_v14 = vadd.f32 %v4592_v16, %v4584_v9  ;;  %v2376_v10 = vmul.f32 %v2344_v15, %v6436_v42 }
 0x32e   : > { %2895 = vmatmul.mubr.bf16.gmra.mrb[104].mxu1 %v2392_v7  ;;  %3008 = vmatmul.mubr.bf16.gmra.mrb[88].mxu0 %v2392_v7  ;;  %v2347_v58 = vadd.f32 %v4594_v23, %v4586_v53  ;;  %v2377_v40 = vmul.f32 %v2345_v37, %v6440_v34  ;;  %v6092_v2 = vrot.slane %v6068_v33, %v6447_v29 }
 0x32f   : > { %v2378_v19 = vmul.f32 %v2346_v14, %v6438_v55 }
 0x330   : > { %v2379_v54 = vmul.f32 %v2347_v58, %v6442_v43 }
 0x331   : > { %v2394_v50 = vpack.c.bf16 %v2378_v19, %v2376_v10 }
 0x332   : > { %v2395_v3 = vpack.c.bf16 %v2379_v54, %v2377_v40 }
 0x334   : > { %2904 = vmatprep.mubr.bf16.mxu1 %v2395_v3  ;;  %3017 = vmatprep.mubr.bf16.mxu0 %v2395_v3 }
 0x336   : > { %2905 = vmatmul.mubr.bf16.gmra.mrb[108].mxu1 %v2394_v50  ;;  %3018 = vmatmul.mubr.bf16.gmra.mrb[92].mxu0 %v2394_v50 }
 0x3bc   : > { %v6079_v25 = vpop.f32.mrb[80].mxu1  ;;  %v2949_v41 = vpop.f32.mrb[64].mxu0 }
 0x3bd   : > { %v2838_v38 = vpop.f32.mrb[81].mxu1  ;;  %v2951_v6 = vpop.f32.mrb[65].mxu0  ;;  %v2950_v22 = vadd.f32 %v2949_v41, %v6092_v2 }
 0x3be   : > { %v2839_v13 = vadd.f32 %v2838_v38, %v6072_v4  ;;  %v2952_v45 = vadd.f32 %v2951_v6, %v6077_v18  ;;  %v6083_v20 = vpop.f32.mrb[82].mxu1  ;;  %v2953_v26 = vpop.f32.mrb[66].mxu0 }
 0x3bf   : > { %v2842_v36 = vpop.f32.mrb[83].mxu1  ;;  %v2955_v51 = vpop.f32.mrb[67].mxu0  ;;  %v2954_v48 = vadd.f32 %v2953_v26, %v6092_v2 }
 0x3c0   : > { %v3714_v61 = vmul.f32 -1.442695, %v2839_v13  ;;  %v2843_v5 = vadd.f32 %v2842_v36, %v6072_v4  ;;  %v2956_v21 = vadd.f32 %v2955_v51, %v6077_v18  ;;  %v3730_v0 = vmul.f32 -1.442695, %v2952_v45 }
 0x3c2   : > { %4595 = vpow2.f32 %v3714_v61  ;;  %v3715_v39 = vmul.f32 -1.442695, %v2843_v5  ;;  %v3731_v30 = vmul.f32 -1.442695, %v2956_v21 }
 0x3c4   : > { %4597 = vpow2.f32 %v3715_v39  ;;  %v6087_v1 = vpop.f32.mrb[84].mxu1  ;;  %v2959_v47 = vpop.f32.mrb[68].mxu0 }
 0x3c5   : > { %4599 = vpow2.f32 %v3730_v0  ;;  %v2848_v9 = vpop.f32.mrb[85].mxu1  ;;  %v2961_v8 = vpop.f32.mrb[69].mxu0  ;;  %v2960_v23 = vadd.f32 %v2959_v47, %v6092_v2 }
 0x3c6   : > { %v2849_v31 = vadd.f32 %v2848_v9, %v6072_v4  ;;  %v6095_v57 = vpop.f32.mrb[86].mxu1  ;;  %v2963_v62 = vpop.f32.mrb[70].mxu0  ;;  %4601 = vpow2.f32 %v3731_v30  ;;  %v2962_v17 = vadd.f32 %v2961_v8, %v6077_v18 }
 0x3c7   : > { %v2852_v49 = vpop.f32.mrb[87].mxu1  ;;  %v2965_v24 = vpop.f32.mrb[71].mxu0  ;;  %v2964_v58 = vadd.f32 %v2963_v62, %v6092_v2 }
 0x3c8   : > { %v3716_v53 = vmul.f32 -1.442695, %v2849_v31  ;;  %v2853_v60 = vadd.f32 %v2852_v49, %v6072_v4  ;;  %v2966_v35 = vadd.f32 %v2965_v24, %v6077_v18  ;;  %v3732_v7 = vmul.f32 -1.442695, %v2962_v17 }
 0x3ca   : > { %4603 = vpow2.f32 %v3716_v53  ;;  %v3717_v63 = vmul.f32 -1.442695, %v2853_v60  ;;  %v3733_v15 = vmul.f32 -1.442695, %v2966_v35 }
 0x3cc   : > { %v4596_v44 = vpop.eup %4595  ;;  %4605 = vpow2.f32 %v3717_v63 }
 0x3cd   : > { %4607 = vtanh.f32 %v2950_v22  ;;  %v3076_v11 = vadd.f32 1.0, %v4596_v44 }
 0x3ce   : > { %v4598_v56 = vpop.eup %4597  ;;  %4609 = vtanh.f32 %v2954_v48 }
 0x3cf   : > { %v4600_v16 = vpop.eup %4599  ;;  %4611 = vrcp.f32 %v3076_v11  ;;  %v3077_v37 = vadd.f32 1.0, %v4598_v56 }
 0x3d0   : > { %4613 = vpow2.f32 %v3732_v7  ;;  %v4602_v14 = vpop.eup %4601  ;;  %v6104_v32 = vpop.f32.mrb[88].mxu1  ;;  %v3188_v10 = vadd.f32 1.0, %v4600_v16 }
 0x3d1   : > { %4615 = vrcp.f32 %v3077_v37  ;;  %v2969_v42 = vpop.f32.mrb[72].mxu0  ;;  %v2858_v46 = vpop.f32.mrb[89].mxu1  ;;  %v3189_v52 = vadd.f32 1.0, %v4602_v14 }
 0x3d2   : > { %4617 = vpow2.f32 %v3733_v15  ;;  %v2971_v55 = vpop.f32.mrb[73].mxu0  ;;  %v2859_v19 = vadd.f32 %v2858_v46, %v6072_v4  ;;  %v6107_v27 = vpop.f32.mrb[90].mxu1  ;;  %v2970_v28 = vadd.f32 %v2969_v42, %v6092_v2 }
 0x3d3   : > { %v6109_v34 = vpop.f32.mrb[74].mxu0  ;;  %4619 = vtanh.f32 %v2960_v23  ;;  %v2862_v43 = vpop.f32.mrb[91].mxu1  ;;  %v2972_v3 = vadd.f32 %v2971_v55, %v6077_v18  ;;  %v6448_v23 = vld [vmem:[#allocation19_spill] sm:$0xff] }
 0x3d4   : > { %v4604_v40 = vpop.eup %4603  ;;  %v2975_v54 = vpop.f32.mrb[75].mxu0  ;;  %4621 = vtanh.f32 %v2964_v58  ;;  %v3718_v38 = vmul.f32 -1.442695, %v2859_v19  ;;  %v2863_v6 = vadd.f32 %v2862_v43, %v6072_v4  ;;  %v6124_v14 = vrot.slane %v6068_v33, %v6448_v23 }
 0x3d5   : > { %v3078_v50 = vadd.f32 1.0, %v4604_v40  ;;  %4623 = vrcp.f32 %v3188_v10  ;;  %v2976_v45 = vadd.f32 %v2975_v54, %v6077_v18  ;;  %v3734_v36 = vmul.f32 -1.442695, %v2972_v3 }
 0x3d6   : > { %v4606_v12 = vpop.eup %4605  ;;  %v3719_v47 = vmul.f32 -1.442695, %v2863_v6  ;;  %v2974_v19 = vadd.f32 %v6109_v34, %v6092_v2  ;;  %v2837_v54 = vadd.f32 %v6079_v25, %v6124_v14 }
 0x3d7   : > { %v4608_v59 = vpop.eup %4607  ;;  %4625 = vrcp.f32 %v3078_v50  ;;  %v3079_v41 = vadd.f32 1.0, %v4606_v12  ;;  %v3735_v49 = vmul.f32 -1.442695, %v2976_v45 }
 0x3d8   : > { %v4610_v13 = vpop.eup %4609  ;;  %4627 = vrcp.f32 %v3189_v52  ;;  %v6115_v51 = vpop.f32.mrb[92].mxu1 }
 0x3d9   : > { %v4612_v26 = vpop.eup %4611  ;;  %4629 = vrcp.f32 %v3079_v41  ;;  %v2979_v61 = vpop.f32.mrb[76].mxu0 }
 0x3da   : > { %v4614_v5 = vpop.eup %4613  ;;  %v3236_v21 = vmul.f32 %v4612_v26, %v4608_v59  ;;  %4631 = vtanh.f32 %v2970_v28  ;;  %v2868_v0 = vpop.f32.mrb[93].mxu1  ;;  %v2980_v33 = vadd.f32 %v2979_v61, %v6092_v2  ;;  %v2841_v28 = vadd.f32 %v6083_v20, %v6124_v14 }
 0x3db   : > { %v2981_v39 = vpop.f32.mrb[77].mxu0  ;;  %v4616_v30 = vpop.eup %4615  ;;  %4633 = vpow2.f32 %v3718_v38  ;;  %v2869_v29 = vadd.f32 %v2868_v0, %v6072_v4  ;;  %v3190_v17 = vadd.f32 1.0, %v4614_v5 }
 0x3dc   : > { %v6118_v9 = vpop.f32.mrb[94].mxu1  ;;  %v2983_v8 = vpop.f32.mrb[78].mxu0  ;;  %4635 = vtanh.f32 %v3236_v21  ;;  %v3237_v62 = vmul.f32 %v4616_v30, %v4610_v13  ;;  %v2982_v60 = vadd.f32 %v2981_v39, %v6077_v18 }
 0x3dd   : > { %v4618_v31 = vpop.eup %4617  ;;  %v2872_v24 = vpop.f32.mrb[95].mxu1  ;;  %4637 = vpow2.f32 %v3734_v36  ;;  %v3720_v48 = vmul.f32 -1.442695, %v2869_v29  ;;  %v2984_v38 = vadd.f32 %v2983_v8, %v6092_v2 }
 0x3de   : > { %v2985_v53 = vpop.f32.mrb[79].mxu0  ;;  %v4620_v22 = vpop.eup %4619  ;;  %4639 = vtanh.f32 %v3237_v62  ;;  %v3191_v35 = vadd.f32 1.0, %v4618_v31  ;;  %v2873_v44 = vadd.f32 %v2872_v24, %v6072_v4  ;;  %v3736_v56 = vmul.f32 -1.442695, %v2982_v60 }
 0x3df   : > { %v4622_v63 = vpop.eup %4621  ;;  %4641 = vpow2.f32 %v3719_v47  ;;  %v2986_v42 = vadd.f32 %v2985_v53, %v6077_v18  ;;  %v2847_v53 = vadd.f32 %v6087_v1, %v6124_v14  ;;  %v2851_v1 = vadd.f32 %v6095_v57, %v6124_v14 }
 0x3e0   : > { %v4624_v7 = vpop.eup %4623  ;;  %4643 = vpow2.f32 %v3735_v49  ;;  %v3721_v58 = vmul.f32 -1.442695, %v2873_v44 }
 0x3e1   : > { %v4626_v11 = vpop.eup %4625  ;;  %4645 = vrcp.f32 %v3190_v17  ;;  %v3737_v3 = vmul.f32 -1.442695, %v2986_v42 }
 0x3e2   : > { %v4628_v15 = vpop.eup %4627  ;;  %v3238_v16 = vmul.f32 %v4626_v11, %v4620_v22  ;;  %4647 = vpow2.f32 %v3720_v48 }
 0x3e3   : > { %v4630_v37 = vpop.eup %4629  ;;  %4649 = vrcp.f32 %v3191_v35 }
 0x3e4   : > { %v6127_v10 = vpop.eup %4631  ;;  %4651 = vtanh.f32 %v3238_v16  ;;  %v3239_v46 = vmul.f32 %v4630_v37, %v4622_v63 }
 0x3e5   : > { %v4634_v55 = vpop.eup %4633  ;;  %4653 = vpow2.f32 %v3736_v56 }
 0x3e6   : > { %v4636_v40 = vpop.eup %4635  ;;  %4655 = vtanh.f32 %v3239_v46  ;;  %v3080_v52 = vadd.f32 1.0, %v4634_v55 }
 0x3e7   : > { %v4638_v43 = vpop.eup %4637  ;;  %v3268_v50 = vmul.f32 %v4636_v40, %v4624_v7  ;;  %4657 = vpow2.f32 %v3721_v58 }
 0x3e8   : > { %v4640_v12 = vpop.eup %4639  ;;  %4659 = vrcp.f32 %v3080_v52  ;;  %v3192_v13 = vadd.f32 1.0, %v4638_v43 }
 0x3e9   : > { %v4642_v59 = vpop.eup %4641  ;;  %v3284_v34 = vadd.f32 %v3268_v50, %v2837_v54  ;;  %v3269_v41 = vmul.f32 %v4640_v12, %v4628_v15  ;;  %4661 = vtanh.f32 %v2974_v19 }
 0x3ea   : > { %v4644_v6 = vpop.eup %4643  ;;  %v3081_v45 = vadd.f32 1.0, %v4642_v59  ;;  %4663 = vtanh.f32 %v2980_v33  ;;  %v6138_v26 = vpop.f32.mrb[96].mxu1 }
 0x3eb   : > { %v2989_v25 = vpop.f32.mrb[80].mxu0  ;;  %v4646_v36 = vpop.eup %4645  ;;  %3300 = vst [vmem:[%s6140_s21] sm:$0xff] %v3284_v34  ;;  %v3285_v20 = vadd.f32 %v3269_v41, %v2841_v28  ;;  %4665 = vpow2.f32 %v3737_v3  ;;  %v3193_v0 = vadd.f32 1.0, %v4644_v6 }
 0x3ec   : > { %v2878_v61 = vpop.f32.mrb[97].mxu1  ;;  %v2991_v5 = vpop.f32.mrb[81].mxu0  ;;  %4667 = vrcp.f32 %v3081_v45  ;;  %v2990_v63 = vadd.f32 %v2989_v25, %v6092_v2 }
 0x3ed   : > { %v4648_v21 = vpop.eup %4647  ;;  %v2879_v39 = vadd.f32 %v2878_v61, %v6072_v4  ;;  %v2992_v30 = vadd.f32 %v2991_v5, %v6077_v18  ;;  %v6145_v47 = vpop.f32.mrb[98].mxu1  ;;  %3301 = vst [vmem:[%s6140_s21 + $0x8] sm:$0xff] %v3285_v20  ;;  %4669 = vtanh.f32 %v2984_v38 }
 0x3ee   : > { %v2993_v29 = vpop.f32.mrb[82].mxu0  ;;  %v4650_v8 = vpop.eup %4649  ;;  %v3082_v31 = vadd.f32 1.0, %v4648_v21  ;;  %4671 = vrcp.f32 %v3192_v13 }
 0x3ef   : > { %v2882_v62 = vpop.f32.mrb[99].mxu1  ;;  %v2995_v49 = vpop.f32.mrb[83].mxu0  ;;  %v3722_v17 = vmul.f32 -1.442695, %v2879_v39  ;;  %v3738_v60 = vmul.f32 -1.442695, %v2992_v30 }
 0x3f0   : > { %v4652_v24 = vpop.eup %4651  ;;  %4673 = vrcp.f32 %v3082_v31  ;;  %v2883_v35 = vadd.f32 %v2882_v62, %v6072_v4  ;;  %v2996_v7 = vadd.f32 %v2995_v49, %v6077_v18 }
 0x3f1   : > { %v4654_v22 = vpop.eup %4653  ;;  %v3270_v48 = vmul.f32 %v4652_v24, %v4646_v36  ;;  %4675 = vrcp.f32 %v3193_v0 }
 0x3f2   : > { %v4656_v44 = vpop.eup %4655  ;;  %4677 = vpow2.f32 %v3722_v17  ;;  %v3194_v37 = vadd.f32 1.0, %v4654_v22  ;;  %v6155_v58 = vpop.f32.mrb[100].mxu1  ;;  %v3723_v40 = vmul.f32 -1.442695, %v2883_v35  ;;  %v3739_v43 = vmul.f32 -1.442695, %v2996_v7 }
 0x3f3   : > { %v4658_v11 = vpop.eup %4657  ;;  %v3286_v56 = vadd.f32 %v3270_v48, %v2847_v53  ;;  %v3271_v15 = vmul.f32 %v4656_v44, %v4650_v8  ;;  %4679 = vpow2.f32 %v3738_v60  ;;  %v2999_v42 = vpop.f32.mrb[84].mxu0  ;;  %v2857_v22 = vadd.f32 %v6104_v32, %v6124_v14 }
 0x3f4   : > { %v4660_v16 = vpop.eup %4659  ;;  %v3083_v23 = vadd.f32 1.0, %v4658_v11  ;;  %4681 = vtanh.f32 %v2990_v63  ;;  %v2888_v52 = vpop.f32.mrb[101].mxu1  ;;  %v3000_v0 = vadd.f32 %v2999_v42, %v6092_v2  ;;  %v2861_v42 = vadd.f32 %v6107_v27, %v6124_v14 }
 0x3f5   : > { %v4662_v46 = vpop.eup %4661  ;;  %3302 = vst [vmem:[%s6140_s21 + $0x10] sm:$0xff] %v3286_v56  ;;  %v3287_v55 = vadd.f32 %v3271_v15, %v2851_v1  ;;  %v3240_v19 = vmul.f32 %v4660_v16, %v6127_v10  ;;  %v3001_v33 = vpop.f32.mrb[85].mxu0  ;;  %v2889_v54 = vadd.f32 %v2888_v52, %v6072_v4  ;;  %v2994_v10 = vadd.f32 %v2993_v29, %v6092_v2 }
 0x3f6   : > { %v4664_v57 = vpop.eup %4663  ;;  %4683 = vrcp.f32 %v3083_v23  ;;  %v6160_v50 = vpop.f32.mrb[102].mxu1  ;;  %v3002_v45 = vadd.f32 %v3001_v33, %v6077_v18  ;;  %v2867_v27 = vadd.f32 %v6115_v51, %v6124_v14 }
 0x3f7   : > { %v3003_v3 = vpop.f32.mrb[86].mxu0  ;;  %v4666_v12 = vpop.eup %4665  ;;  %3303 = vst [vmem:[%s6140_s21 + $0x18] sm:$0xff] %v3287_v55  ;;  %4685 = vtanh.f32 %v3240_v19  ;;  %v3724_v6 = vmul.f32 -1.442695, %v2889_v54 }
 0x3f8   : > { %v2892_v28 = vpop.f32.mrb[103].mxu1  ;;  %v3005_v59 = vpop.f32.mrb[87].mxu0  ;;  %4687 = vrcp.f32 %v3194_v37  ;;  %v3195_v36 = vadd.f32 1.0, %v4666_v12  ;;  %v3740_v29 = vmul.f32 -1.442695, %v3002_v45  ;;  %v3004_v35 = vadd.f32 %v3003_v3, %v6092_v2 }
 0x3f9   : > { %v4668_v34 = vpop.eup %4667  ;;  %4689 = vpow2.f32 %v3723_v40  ;;  %v2893_v5 = vadd.f32 %v2892_v28, %v6072_v4  ;;  %v3006_v17 = vadd.f32 %v3005_v59, %v6077_v18 }
 0x3fa   : > { %v4670_v41 = vpop.eup %4669  ;;  %v3241_v38 = vmul.f32 %v4668_v34, %v4662_v46  ;;  %4691 = vpow2.f32 %v3739_v43 }
 0x3fb   : > { %v4672_v13 = vpop.eup %4671  ;;  %v3725_v62 = vmul.f32 -1.442695, %v2893_v5  ;;  %v3741_v16 = vmul.f32 -1.442695, %v3006_v17 }
 0x3fc   : > { %v4674_v25 = vpop.eup %4673  ;;  %4693 = vtanh.f32 %v3241_v38 }
 0x3fd   : > { %v4676_v20 = vpop.eup %4675  ;;  %v3242_v61 = vmul.f32 %v4674_v25, %v4664_v57  ;;  %4695 = vtanh.f32 %v2994_v10 }
 0x3fe   : > { %v4678_v21 = vpop.eup %4677  ;;  %4697 = vpow2.f32 %v3724_v6 }
 0x3ff   : > { %v4680_v39 = vpop.eup %4679  ;;  %4699 = vtanh.f32 %v3242_v61  ;;  %v3084_v30 = vadd.f32 1.0, %v4678_v21  ;;  %v2871_v21 = vadd.f32 %v6118_v9, %v6124_v14 }
 0x400   : > { %v4682_v8 = vpop.eup %4681  ;;  %4701 = vrcp.f32 %v3195_v36  ;;  %v3196_v53 = vadd.f32 1.0, %v4680_v39 }
 0x401   : > { %v4684_v31 = vpop.eup %4683  ;;  %4703 = vrcp.f32 %v3084_v30  ;;  %v6171_v56 = vpop.f32.mrb[104].mxu1 }
 0x402   : > { %v4686_v49 = vpop.eup %4685  ;;  %v3243_v24 = vmul.f32 %v4684_v31, %v4670_v41  ;;  %4705 = vtanh.f32 %v3000_v0  ;;  %v3009_v1 = vpop.f32.mrb[88].mxu0 }
 0x403   : > { %v4688_v60 = vpop.eup %4687  ;;  %v3272_v48 = vmul.f32 %v4686_v49, %v4672_v13  ;;  %4707 = vpow2.f32 %v3740_v29  ;;  %v2898_v37 = vpop.f32.mrb[105].mxu1 }
 0x404   : > { %v4690_v63 = vpop.eup %4689  ;;  %4709 = vtanh.f32 %v3243_v24  ;;  %v3011_v23 = vpop.f32.mrb[89].mxu0  ;;  %v2899_v55 = vadd.f32 %v2898_v37, %v6072_v4 }
 0x405   : > { %v4692_v44 = vpop.eup %4691  ;;  %v3288_v7 = vadd.f32 %v3272_v48, %v2857_v22  ;;  %v3085_v11 = vadd.f32 1.0, %v4690_v63  ;;  %4711 = vpow2.f32 %v3725_v62  ;;  %v6177_v19 = vpop.f32.mrb[106].mxu1  ;;  %v3012_v38 = vadd.f32 %v3011_v23, %v6077_v18 }
 0x406   : > { %v4694_v15 = vpop.eup %4693  ;;  %4713 = vrcp.f32 %v3196_v53  ;;  %v6179_v40 = vpop.f32.mrb[90].mxu0  ;;  %v3197_v3 = vadd.f32 1.0, %v4692_v44  ;;  %v3726_v28 = vmul.f32 -1.442695, %v2899_v55 }
 0x407   : > { %v4696_v32 = vpop.eup %4695  ;;  %3304 = vst [vmem:[%s6140_s21 + $0x20] sm:$0xff] %v3288_v7  ;;  %v3273_v46 = vmul.f32 %v4694_v15, %v4676_v20  ;;  %4715 = vrcp.f32 %v3085_v11  ;;  %v2902_v33 = vpop.f32.mrb[107].mxu1  ;;  %v3010_v20 = vadd.f32 %v3009_v1, %v6092_v2 }
 0x408   : > { %v4698_v52 = vpop.eup %4697  ;;  %4717 = vtanh.f32 %v3004_v35  ;;  %v3015_v57 = vpop.f32.mrb[91].mxu0  ;;  %v2903_v10 = vadd.f32 %v2902_v33, %v6072_v4 }
 0x409   : > { %v4700_v43 = vpop.eup %4699  ;;  %v3289_v54 = vadd.f32 %v3273_v46, %v2861_v42  ;;  %v3086_v12 = vadd.f32 1.0, %v4698_v52  ;;  %4719 = vpow2.f32 %v3741_v16  ;;  %v6187_v51 = vpop.f32.mrb[108].mxu1  ;;  %v3016_v31 = vadd.f32 %v3015_v57, %v6077_v18 }
 0x40a   : > { %v4702_v59 = vpop.eup %4701  ;;  %v3274_v34 = vmul.f32 %v4700_v43, %v4688_v60  ;;  %v3727_v25 = vmul.f32 -1.442695, %v2903_v10  ;;  %v6189_v61 = vpop.f32.mrb[92].mxu0  ;;  %v3014_v42 = vadd.f32 %v6179_v40, %v6092_v2  ;;  %v2877_v57 = vadd.f32 %v6138_v26, %v6124_v14 }
 0x40b   : > { %v4704_v41 = vpop.eup %4703  ;;  %3305 = vst [vmem:[%s6140_s21 + $0x28] sm:$0xff] %v3289_v54  ;;  %4721 = vrcp.f32 %v3086_v12  ;;  %v2908_v0 = vpop.f32.mrb[109].mxu1  ;;  %v3743_v11 = vmul.f32 -1.442695, %v3016_v31  ;;  %v3020_v26 = vadd.f32 %v6189_v61, %v6092_v2  ;;  %v2887_v61 = vadd.f32 %v6155_v58, %v6124_v14 }
 0x40c   : > { %v4706_v6 = vpop.eup %4705  ;;  %v3290_v13 = vadd.f32 %v3274_v34, %v2867_v27  ;;  %v3244_v45 = vmul.f32 %v4704_v41, %v4682_v8  ;;  %4723 = vpow2.f32 %v3726_v28  ;;  %v3021_v39 = vpop.f32.mrb[93].mxu0  ;;  %v3742_v8 = vmul.f32 -1.442695, %v3012_v38 }
 0x40d   : > { %v4708_v36 = vpop.eup %4707  ;;  %4725 = vrcp.f32 %v3197_v3  ;;  %v2909_v62 = vadd.f32 %v2908_v0, %v6072_v4  ;;  %v6196_v49 = vpop.f32.mrb[110].mxu1  ;;  %v3022_v46 = vadd.f32 %v3021_v39, %v6077_v18 }
 0x40e   : > { %v4710_v5 = vpop.eup %4709  ;;  %3306 = vst [vmem:[%s6140_s21 + $0x30] sm:$0xff] %v3290_v13  ;;  %4727 = vtanh.f32 %v3244_v45  ;;  %v6198_v24 = vpop.f32.mrb[94].mxu0  ;;  %v3198_v63 = vadd.f32 1.0, %v4708_v36 }
 0x40f   : > { %v4712_v30 = vpop.eup %4711  ;;  %v3275_v29 = vmul.f32 %v4710_v5, %v4702_v59  ;;  %4729 = vpow2.f32 %v3727_v25  ;;  %v2912_v60 = vpop.f32.mrb[111].mxu1  ;;  %v3728_v7 = vmul.f32 -1.442695, %v2909_v62  ;;  %v3744_v3 = vmul.f32 -1.442695, %v3022_v46 }
 0x410   : > { %v4714_v53 = vpop.eup %4713  ;;  %v3087_v17 = vadd.f32 1.0, %v4712_v30  ;;  %v3025_v9 = vpop.f32.mrb[95].mxu0  ;;  %4731 = vtanh.f32 %v3010_v20  ;;  %v2913_v1 = vadd.f32 %v2912_v60, %v6072_v4 }
 0x411   : > { %v4716_v22 = vpop.eup %4715  ;;  %v3291_v48 = vadd.f32 %v3275_v29, %v2871_v21  ;;  %v3026_v40 = vadd.f32 %v3025_v9, %v6077_v18  ;;  %v2881_v18 = vadd.f32 %v6145_v47, %v6124_v14  ;;  %v3024_v47 = vadd.f32 %v6198_v24, %v6092_v2 }
 0x412   : > { %v4718_v35 = vpop.eup %4717  ;;  %v3245_v44 = vmul.f32 %v4716_v22, %v4696_v32  ;;  %4733 = vrcp.f32 %v3087_v17  ;;  %v3729_v52 = vmul.f32 -1.442695, %v2913_v1  ;;  %v2891_v2 = vadd.f32 %v6160_v50, %v6124_v14 }
 0x413   : > { %3307 = vst [vmem:[%s6140_s21 + $0x38] sm:$0xff] %v3291_v48  ;;  %4735 = vpow2.f32 %v3742_v8  ;;  %v4720_v15 = vpop.eup %4719  ;;  %v3745_v38 = vmul.f32 -1.442695, %v3026_v40  ;;  %v2897_v50 = vadd.f32 %v6171_v56, %v6124_v14 }
 0x414   : > { %4737 = vtanh.f32 %v3245_v44  ;;  %v3199_v4 = vadd.f32 1.0, %v4720_v15 }
 0x415   : > { %v4722_v16 = vpop.eup %4721  ;;  %4739 = vrcp.f32 %v3198_v63 }
 0x416   : > { %v4724_v37 = vpop.eup %4723  ;;  %v3246_v23 = vmul.f32 %v4722_v16, %v4706_v6  ;;  %4741 = vpow2.f32 %v3728_v7 }
 0x417   : > { %v4726_v32 = vpop.eup %4725  ;;  %v3088_v55 = vadd.f32 1.0, %v4724_v37  ;;  %4743 = vpow2.f32 %v3743_v11 }
 0x418   : > { %v4728_v33 = vpop.eup %4727  ;;  %4745 = vtanh.f32 %v3246_v23 }
 0x419   : > { %v3276_v43 = vmul.f32 %v4728_v33, %v4714_v53  ;;  %4747 = vrcp.f32 %v3088_v55  ;;  %v4730_v54 = vpop.eup %4729  ;;  %v2901_v33 = vadd.f32 %v6177_v19, %v6124_v14  ;;  %v2911_v19 = vadd.f32 %v6196_v49, %v6124_v14 }
 0x41a   : > { %4749 = vtanh.f32 %v3014_v42  ;;  %v4732_v12 = vpop.eup %4731  ;;  %v3089_v59 = vadd.f32 1.0, %v4730_v54  ;;  %v2907_v54 = vadd.f32 %v6187_v51, %v6124_v14 }
 0x41b   : > { %v3292_v28 = vadd.f32 %v3276_v43, %v2877_v57  ;;  %4751 = vpow2.f32 %v3729_v52 }
 0x41c   : > { %v4734_v27 = vpop.eup %4733  ;;  %4753 = vrcp.f32 %v3199_v4 }
 0x41d   : > { %v4736_v34 = vpop.eup %4735  ;;  %3308 = vst [vmem:[%s6140_s21 + $0x40] sm:$0xff] %v3292_v28  ;;  %v3247_v10 = vmul.f32 %v4734_v27, %v4718_v35  ;;  %4755 = vrcp.f32 %v3089_v59 }
 0x41e   : > { %v4738_v41 = vpop.eup %4737  ;;  %4757 = vpow2.f32 %v3744_v3  ;;  %v3200_v20 = vadd.f32 1.0, %v4736_v34 }
 0x41f   : > { %v4740_v6 = vpop.eup %4739  ;;  %v3277_v13 = vmul.f32 %v4738_v41, %v4726_v32  ;;  %4759 = vtanh.f32 %v3247_v10 }
 0x420   : > { %v4742_v45 = vpop.eup %4741  ;;  %4761 = vtanh.f32 %v3020_v26 }
 0x421   : > { %v4744_v25 = vpop.eup %4743  ;;  %v3293_v36 = vadd.f32 %v3277_v13, %v2881_v18  ;;  %v3090_v5 = vadd.f32 1.0, %v4742_v45  ;;  %4763 = vpow2.f32 %v3745_v38 }
 0x422   : > { %v4746_v21 = vpop.eup %4745  ;;  %v3201_v62 = vadd.f32 1.0, %v4744_v25 }
 0x423   : > { %v4748_v0 = vpop.eup %4747  ;;  %3309 = vst [vmem:[%s6140_s21 + $0x48] sm:$0xff] %v3293_v36  ;;  %v3278_v39 = vmul.f32 %v4746_v21, %v4740_v6  ;;  %4765 = vrcp.f32 %v3090_v5 }
 0x424   : > { %v4750_v30 = vpop.eup %4749  ;;  %v3248_v29 = vmul.f32 %v4748_v0, %v4732_v12  ;;  %4767 = vrcp.f32 %v3200_v20 }
 0x425   : > { %v4752_v8 = vpop.eup %4751  ;;  %v3294_v31 = vadd.f32 %v3278_v39, %v2887_v61 }
 0x426   : > { %v4754_v53 = vpop.eup %4753  ;;  %4769 = vtanh.f32 %v3248_v29  ;;  %v3091_v17 = vadd.f32 1.0, %v4752_v8 }
 0x427   : > { %v4756_v60 = vpop.eup %4755  ;;  %3310 = vst [vmem:[%s6140_s21 + $0x50] sm:$0xff] %v3294_v31  ;;  %4771 = vtanh.f32 %v3024_v47 }
 0x428   : > { %v4758_v9 = vpop.eup %4757  ;;  %v3249_v58 = vmul.f32 %v4756_v60, %v4750_v30  ;;  %4773 = vrcp.f32 %v3091_v17 }
 0x429   : > { %v4760_v22 = vpop.eup %4759  ;;  %4775 = vrcp.f32 %v3201_v62  ;;  %v3202_v63 = vadd.f32 1.0, %v4758_v9 }
 0x42a   : > { %v3279_v24 = vmul.f32 %v4760_v22, %v4754_v53  ;;  %4777 = vtanh.f32 %v3249_v58  ;;  %v4762_v48 = vpop.eup %4761 }
 0x42b   : > { %v4764_v35 = vpop.eup %4763  ;;  %4779 = vrcp.f32 %v3202_v63 }
 0x42c   : > { %v3295_v44 = vadd.f32 %v3279_v24, %v2891_v2  ;;  %v3203_v16 = vadd.f32 1.0, %v4764_v35 }
 0x42d   : > { %v4766_v7 = vpop.eup %4765 }
 0x42e   : > { %3311 = vst [vmem:[%s6140_s21 + $0x58] sm:$0xff] %v3295_v44  ;;  %v3250_v11 = vmul.f32 %v4766_v7, %v4762_v48  ;;  %v4768_v1 = vpop.eup %4767 }
 0x430   : > { %v4770_v15 = vpop.eup %4769  ;;  %4781 = vtanh.f32 %v3250_v11 }
 0x431   : > { %v4772_v37 = vpop.eup %4771  ;;  %v3280_v23 = vmul.f32 %v4770_v15, %v4768_v1  ;;  %4783 = vrcp.f32 %v3203_v16 }
 0x432   : > { %v4774_v42 = vpop.eup %4773 }
 0x433   : > { %v4776_v46 = vpop.eup %4775  ;;  %v3296_v32 = vadd.f32 %v3280_v23, %v2897_v50  ;;  %v3251_v55 = vmul.f32 %v4774_v42, %v4772_v37 }
 0x434   : > { %v4778_v52 = vpop.eup %4777 }
 0x435   : > { %3312 = vst [vmem:[%s6140_s21 + $0x60] sm:$0xff] %v3296_v32  ;;  %v3281_v4 = vmul.f32 %v4778_v52, %v4776_v46  ;;  %4785 = vtanh.f32 %v3251_v55  ;;  %v4780_v43 = vpop.eup %4779 }
 0x437   : > { %v3297_v57 = vadd.f32 %v3281_v4, %v2901_v33 }
 0x439   : > { %3313 = vst [vmem:[%s6140_s21 + $0x68] sm:$0xff] %v3297_v57 }
 0x43a   : > { %v4782_v56 = vpop.eup %4781 }
 0x43b   : > { %v3282_v3 = vmul.f32 %v4782_v56, %v4780_v43  ;;  %v4784_v12 = vpop.eup %4783 }
 0x43d   : > { %v3298_v40 = vadd.f32 %v3282_v3, %v2907_v54 }
 0x43f   : > { %v4786_v28 = vpop.eup %4785  ;;  %3314 = vst [vmem:[%s6140_s21 + $0x70] sm:$0xff] %v3298_v40 }
 0x440   : > { %v3283_v59 = vmul.f32 %v4786_v28, %v4784_v12 }
 0x442   : > { %v3299_v51 = vadd.f32 %v3283_v59, %v2911_v19 }
 0x444   : > { %3315 = vst [vmem:[%s6140_s21 + $0x78] sm:$0xff] %v3299_v51 }
 0x445   : > { %4942 = shalt.err (!%p4939_p13)
}
 0x446   : > { %s4943_s20 = scalar_lea.hbm %s6238_s17, 2048  ;;  %s4947_s14 = scalar_lea.hbm %s6449_s15, 4096 }
 0x447   : > { %p4944_p0 = scmp.ne.s32.totalorder %s6238_s17, %s4943_s20  ;;  %p4948_p1 = scmp.lt.u32.totalorder %s6238_s17, %s6449_s15 }
 0x448   : > { %p4949_p2 = scmp.lt.u32.totalorder %s4947_s14, %s4943_s20  ;;  %p4951_p6 = scmp.lt.u32.totalorder %s4943_s20, %s6238_s17 }
 0x449   : > { %p4945_p5 = pnand %p4944_p0, %p5217_p8 }
 0x44a   : > { %p4950_p4 = por %p4949_p2, %p4948_p1 }
 0x44b   : > { %p4946_p11 = pneg %p4945_p5 }
 0x44c   : > { %p4952_p10 = por %p4951_p6, %p4950_p4 }
 0x44e   : > { %p4953_p12 = pnand %p4952_p10, %p4946_p11 }
 0x450   : > { %4956 = shalt.err (!%p4953_p12)
}
 0x451   : > { %s5020_s24 = smov 128   ;;  %s5021_s9 = smov 8  }
 0x452   : > { %3835 = dma.vmem_to_hbm [thread:$0]  (%p5217_p8), %s6240_s8, 2048, %s6238_s17, %s3317_s13, %s5020_s24, %s5020_s24, %s5021_s9  }
 0x453 PF: > { %s6450_s29 = sld [smem:[#allocation16_spill]]  ;;  %s6451_s27 = sld [smem:[#allocation17_spill]] }
 0x454   : > { %p6453_p7 = scmp.ge.s32.totalorder %s5003_s12, 2 }
 0x459   : > { %s3345_s30 = sand.u32 1, %s6450_s29   ;;  %p6452_p3 = scmp.ne.s32.totalorder %s6451_s27, 0 }
 0x45a   : > { %s3346_s28 = scalar_lea.sflag [#allocation4], %s3345_s30 }
 0x45b   : > { %p3855_p9 = pnand %p6453_p7, %p6452_p3 }
 0x45d   : > { %4986 = dma.done.wait (!%p3855_p9), %s3346_s28, 2048  }
 0x45e   : > { %4988 = vsyncadd (!%p3855_p9), %s3346_s28, 4294965248  ;;  %p24_p13 = scmp.ge.s32.totalorder %s5204_s22, 4   ;;  %s6454_s30 = smov %s4995_s10 }
 0x45f   : > { %s6455_s10 = smov %s4999_s11  ;;  %s6456_s11 = smov %s5213_s16 }
 0x460   : > { %s6457_s12 = smov %s5204_s22  ;;  %26 = sbr.rel (!%p24_p13) target bundleno = 10 (0xa), region = 117 }
 0x467   :  { %3351 = vsyncpa [#allocation3], 1 }
 0x468   :  { %3353 = vsyncpa [#allocation3 + $0x1], 1 }
 0x469   :  { %3354 = vsyncpa [#allocation6], 1 }
 0x46a   :  { %3355 = vsyncpa [#allocation9], 1 }
 0x46b   :  { %3356 = vsyncpa [#allocation4], 1 }
 0x46c   :  { %3358 = vsyncpa [#allocation4 + $0x1], 1 }

</bundles_post_ra>
